<compile_context>
chip_gen: v7x
topology: tpu7x:2x2x1
jax: 0.10.0
libtpu: 0.0.40
codegen_flags: <defaults>
</compile_context>

<pallas_src>
import jax
import jax.numpy as jnp
from jax import lax
from jax.experimental import pallas as pl
from jax.experimental.pallas import tpu as pltpu

EMBED_DIM = 256
H1, H2, H3 = 1024, 512, 256
OUT = 200           # logical output width (nn.Linear(256, 200))
OUT_PAD = 256       # lane-dense padded output width (2 x 128 lanes)
EPS = 1e-12         # torch.nn.functional.normalize default eps

VMEM_LIMIT_BYTES = 64 * 1024 * 1024  # actual usage at tm=2048 is ~28-30 MiB


def _embedding_net_kernel(x_ref,
                          w1_ref, b1_ref,
                          w2_ref, b2_ref,
                          w3_ref, b3_ref,
                          w4_ref, b4_ref,
                          o_ref):
    # bf16 operands into the MXU, f32 accumulation; biases + normalize in f32.
    x = x_ref[...].astype(jnp.bfloat16)

    h = jnp.dot(x, w1_ref[...], preferred_element_type=jnp.float32) + b1_ref[...]
    h = jnp.maximum(h, 0.0).astype(jnp.bfloat16)

    h = jnp.dot(h, w2_ref[...], preferred_element_type=jnp.float32) + b2_ref[...]
    h = jnp.maximum(h, 0.0).astype(jnp.bfloat16)

    h = jnp.dot(h, w3_ref[...], preferred_element_type=jnp.float32) + b3_ref[...]
    h = jnp.maximum(h, 0.0).astype(jnp.bfloat16)

    y = jnp.dot(h, w4_ref[...], preferred_element_type=jnp.float32) + b4_ref[...]

    # F.normalize(y, p=2, dim=-1) = y / max(||y||, eps) = y * rsqrt(max(ss, eps^2)).
    # Padded columns of w4/b4 are zero, so they contribute nothing to ss and the
    # padded output columns stay exactly zero.
    ss = jnp.sum(y * y, axis=-1, keepdims=True)
    y = y * lax.rsqrt(jnp.maximum(ss, EPS * EPS))

    o_ref[...] = y.astype(o_ref.dtype)


def _round_up(n, m):
    return ((n + m - 1) // m) * m


def _pick_tm(B):
    """Row-tile heuristic.

    B <= 512  -> single grid step (block equals the full batch dim).
    B  > 512  -> at least two steps (so v7x's two TensorCores both get work via
                 the "parallel" axis), each as large as possible but capped at
                 2048 rows so the resident footprint fits v7x's 64 MiB VMEM
                 while still amortizing the ~0.35 us/step pipeline overhead.
    """
    if B <= 512:
        return B
    half = _round_up(pl.cdiv(B, 2), 8)
    return min(2048, half)


def _const_spec(shape, single_buffer):
    # Constant index_map -> block is fetched once and stays resident across the
    # grid. Single-buffer it (the index never changes, so a second buffer is
    # wasted VMEM); fall back if this jax build doesn't accept pipeline_mode.
    idx = lambda i: (0, 0)
    if single_buffer:
        return pl.BlockSpec(shape, idx, pipeline_mode=pl.Buffered(1))
    return pl.BlockSpec(shape, idx)


def _forward_padded(x, params, tm, single_buffer_weights):
    B, D = x.shape
    w1, b1 = params["w1"], params["b1"]
    w2, b2 = params["w2"], params["b2"]
    w3, b3 = params["w3"], params["b3"]
    w4, b4 = params["w4"], params["b4"]

    grid = (pl.cdiv(B, tm),)

    weight_bytes = sum(int(a.size) * a.dtype.itemsize
                       for a in (w1, b1, w2, b2, w3, b3, w4, b4))
    flops_per_row = 2 * (D * H1 + H1 * H2 + H2 * H3 + H3 * OUT_PAD)
    cost = pl.CostEstimate(
        flops=flops_per_row * B,
        transcendentals=B,  # one rsqrt per row
        bytes_accessed=int(x.size) * x.dtype.itemsize
        + weight_bytes
        + B * OUT_PAD * 4,
    )

    cs = lambda shape: _const_spec(shape, single_buffer_weights)

    return pl.pallas_call(
        _embedding_net_kernel,
        out_shape=jax.ShapeDtypeStruct((B, OUT_PAD), jnp.float32),
        grid_spec=pltpu.PrefetchScalarGridSpec(
            num_scalar_prefetch=0,
            grid=grid,
            in_specs=[
                pl.BlockSpec((tm, D), lambda i: (i, 0)),      # x row tile
                cs((D, H1)), cs((1, H1)),
                cs((H1, H2)), cs((1, H2)),
                cs((H2, H3)), cs((1, H3)),
                cs((H3, OUT_PAD)), cs((1, OUT_PAD)),
            ],
            out_specs=pl.BlockSpec((tm, OUT_PAD), lambda i: (i, 0)),
        ),
        compiler_params=pltpu.CompilerParams(
            dimension_semantics=("parallel",),
            vmem_limit_bytes=VMEM_LIMIT_BYTES,
        ),
        cost_estimate=cost,
    )(x, w1, b1, w2, b2, w3, b3, w4, b4)


def embedding_net_forward(x, params, *, tm=None, trim_output=False):
    """x: (B, EMBED_DIM) float32. params: pre-transposed (in, out) bf16 weights,
    (1, out) f32 biases; fc4 zero-padded to OUT_PAD output columns.

    Returns a lane-dense (B, OUT_PAD) slab whose columns OUT..OUT_PAD-1 are
    exactly zero (consumer can slice/fuse); pass trim_output=True to get the
    torch-shaped (B, OUT) array (costs one extra HBM copy under jit).
    """
    B, D = x.shape
    assert D == EMBED_DIM
    if tm is None:
        tm = _pick_tm(B)
    tm = min(tm, B)
    assert tm >= 1 and (tm == B or tm % 8 == 0), (
        "row tile must equal B or be a multiple of the f32 sublane (8)")

    try:
        out_padded = _forward_padded(x, params, tm, single_buffer_weights=True)
    except Exception:
        # Older jax without BlockSpec(pipeline_mode=...) support: default
        # double-buffered weights (only ~1.9 MiB extra VMEM).
        out_padded = _forward_padded(x, params, tm, single_buffer_weights=False)

    if trim_output:
        return out_padded[:, :OUT]
    return out_padded


def init_params(key):
    """Deterministic synthetic parameters matching nn.Linear init shapes.
    Weights stored as (in, out) bf16; biases as (1, out) f32; fc4 zero-padded
    from 200 to OUT_PAD output columns."""
    keys = jax.random.split(key, 8)

    def linear(kw, kb, fan_in, fan_out, pad_to=None):
        bound = 1.0 / jnp.sqrt(fan_in)
        w = jax.random.uniform(kw, (fan_in, fan_out), jnp.float32, -bound, bound)
        b = jax.random.uniform(kb, (1, fan_out), jnp.float32, -bound, bound)
        if pad_to is not None and pad_to > fan_out:
            w = jnp.pad(w, ((0, 0), (0, pad_to - fan_out)))
            b = jnp.pad(b, ((0, 0), (0, pad_to - fan_out)))
        return w.astype(jnp.bfloat16), b

    w1, b1 = linear(keys[0], keys[1], EMBED_DIM, H1)
    w2, b2 = linear(keys[2], keys[3], H1, H2)
    w3, b3 = linear(keys[4], keys[5], H2, H3)
    w4, b4 = linear(keys[6], keys[7], H3, OUT, pad_to=OUT_PAD)
    return dict(w1=w1, b1=b1, w2=w2, b2=b2, w3=w3, b3=b3, w4=w4, b4=b4)


def reference_forward(x, p):
    """Pure-JAX reference mirroring the kernel math (bf16 matmul inputs, f32 accum)."""
    def dot(a, w):
        return jnp.dot(a.astype(jnp.bfloat16), w, preferred_element_type=jnp.float32)

    h = jnp.maximum(dot(x, p["w1"]) + p["b1"], 0.0)
    h = jnp.maximum(dot(h, p["w2"]) + p["b2"], 0.0)
    h = jnp.maximum(dot(h, p["w3"]) + p["b3"], 0.0)
    y = dot(h, p["w4"]) + p["b4"]
    ss = jnp.sum(y * y, axis=-1, keepdims=True)
    y = y * lax.rsqrt(jnp.maximum(ss, EPS * EPS))
    return y[:, :OUT]


if __name__ == "__main__":
    # TODO(synk): the torch `isinstance(x, list): torch.cat(x, dim=0)` branch is
    # host-side input plumbing; concatenate batches in JAX before calling the kernel.
    key = jax.random.PRNGKey(0)
    kx, kx2, kp = jax.random.split(key, 3)

    params = init_params(kp)

    # Small-batch path: single grid step, padded slab output.
    B = 16
    x = jax.random.normal(kx, (B, EMBED_DIM), jnp.float32)
    out_padded = jax.block_until_ready(embedding_net_forward(x, params))
    assert out_padded.shape == (B, OUT_PAD)
    assert float(jnp.max(jnp.abs(out_padded[:, OUT:]))) == 0.0, \
        "padded output columns must be exactly zero"

    ref = reference_forward(x, params)
    out = out_padded[:, :OUT]
    max_err = float(jnp.max(jnp.abs(out - ref)))
    assert jnp.allclose(out, ref, atol=2e-2, rtol=2e-2), (
        f"mismatch vs JAX reference (max abs err {max_err})")

    # Ragged multi-step grid + trimmed (torch-shaped) output path.
    B2 = 20
    x2 = jax.random.normal(kx2, (B2, EMBED_DIM), jnp.float32)
    out2 = jax.block_until_ready(
        embedding_net_forward(x2, params, tm=8, trim_output=True))
    ref2 = reference_forward(x2, params)
    assert out2.shape == (B2, OUT)
    max_err2 = float(jnp.max(jnp.abs(out2 - ref2)))
    assert jnp.allclose(out2, ref2, atol=2e-2, rtol=2e-2), (
        f"ragged-grid mismatch vs JAX reference (max abs err {max_err2})")

    print("KERNEL_OK")
</pallas_src>

<mosaic_0001>
module attributes {stable_mosaic.version = 11 : i64} {
  func.func @_embedding_net_kernel(%arg0: i32, %arg1: memref<16x256xf32, #tpu.memory_space<vmem>>, %arg2: memref<256x1024xbf16, #tpu.memory_space<vmem>>, %arg3: memref<1x1024xf32, #tpu.memory_space<vmem>>, %arg4: memref<1024x512xbf16, #tpu.memory_space<vmem>>, %arg5: memref<1x512xf32, #tpu.memory_space<vmem>>, %arg6: memref<512x256xbf16, #tpu.memory_space<vmem>>, %arg7: memref<1x256xf32, #tpu.memory_space<vmem>>, %arg8: memref<256x256xbf16, #tpu.memory_space<vmem>>, %arg9: memref<1x256xf32, #tpu.memory_space<vmem>>, %arg10: memref<16x256xf32, #tpu.memory_space<vmem>>) attributes {dimension_semantics = [#tpu.dimension_semantics<parallel>], iteration_bounds = array<i64: 1>, scalar_prefetch = 0 : i64, scratch_operands = 0 : i64, tpu.core_type = #tpu.core_type<tc>, window_params = [{transform_indices = @transform_0, window_bounds = array<i64: 16, 256>}, {pipeline_mode = #tpu.pipeline_mode<synchronous>, transform_indices = @transform_1, window_bounds = array<i64: 256, 1024>}, {pipeline_mode = #tpu.pipeline_mode<synchronous>, transform_indices = @transform_2, window_bounds = array<i64: 1, 1024>}, {pipeline_mode = #tpu.pipeline_mode<synchronous>, transform_indices = @transform_3, window_bounds = array<i64: 1024, 512>}, {pipeline_mode = #tpu.pipeline_mode<synchronous>, transform_indices = @transform_4, window_bounds = array<i64: 1, 512>}, {pipeline_mode = #tpu.pipeline_mode<synchronous>, transform_indices = @transform_5, window_bounds = array<i64: 512, 256>}, {pipeline_mode = #tpu.pipeline_mode<synchronous>, transform_indices = @transform_6, window_bounds = array<i64: 1, 256>}, {pipeline_mode = #tpu.pipeline_mode<synchronous>, transform_indices = @transform_7, window_bounds = array<i64: 256, 256>}, {pipeline_mode = #tpu.pipeline_mode<synchronous>, transform_indices = @transform_8, window_bounds = array<i64: 1, 256>}, {transform_indices = @transform_9, window_bounds = array<i64: 16, 256>}]} {
    %c0 = arith.constant 0 : index
    %c0_0 = arith.constant 0 : index
    %0 = vector.load %arg1[%c0, %c0_0] : memref<16x256xf32, #tpu.memory_space<vmem>>, vector<16x256xf32>
    %1 = arith.truncf %0 : vector<16x256xf32> to vector<16x256xbf16>
    %c0_1 = arith.constant 0 : index
    %c0_2 = arith.constant 0 : index
    %2 = vector.load %arg2[%c0_1, %c0_2] : memref<256x1024xbf16, #tpu.memory_space<vmem>>, vector<256x1024xbf16>
    %cst = arith.constant dense<0.000000e+00> : vector<16x1024xf32>
    %3 = tpu.matmul %1, %2, %cst {dimension_numbers = #tpu.dot_dimension_numbers<[1], [0], [0], [1], [0, 0, 1, 1], [], []>} : vector<16x256xbf16>, vector<256x1024xbf16>, vector<16x1024xf32> -> vector<16x1024xf32>
    %c0_3 = arith.constant 0 : index
    %c0_4 = arith.constant 0 : index
    %4 = vector.load %arg3[%c0_3, %c0_4] : memref<1x1024xf32, #tpu.memory_space<vmem>>, vector<1x1024xf32>
    %5 = vector.broadcast %4 : vector<1x1024xf32> to vector<16x1024xf32>
    %6 = arith.addf %3, %5 : vector<16x1024xf32>
    %cst_5 = arith.constant 0.000000e+00 : f32
    %7 = vector.broadcast %cst_5 : f32 to vector<16x1024xf32>
    %8 = arith.maximumf %6, %7 : vector<16x1024xf32>
    %9 = arith.truncf %8 : vector<16x1024xf32> to vector<16x1024xbf16>
    %c0_6 = arith.constant 0 : index
    %c0_7 = arith.constant 0 : index
    %10 = vector.load %arg4[%c0_6, %c0_7] : memref<1024x512xbf16, #tpu.memory_space<vmem>>, vector<1024x512xbf16>
    %cst_8 = arith.constant dense<0.000000e+00> : vector<16x512xf32>
    %11 = tpu.matmul %9, %10, %cst_8 {dimension_numbers = #tpu.dot_dimension_numbers<[1], [0], [0], [1], [0, 0, 1, 1], [], []>} : vector<16x1024xbf16>, vector<1024x512xbf16>, vector<16x512xf32> -> vector<16x512xf32>
    %c0_9 = arith.constant 0 : index
    %c0_10 = arith.constant 0 : index
    %12 = vector.load %arg5[%c0_9, %c0_10] : memref<1x512xf32, #tpu.memory_space<vmem>>, vector<1x512xf32>
    %13 = vector.broadcast %12 : vector<1x512xf32> to vector<16x512xf32>
    %14 = arith.addf %11, %13 : vector<16x512xf32>
    %cst_11 = arith.constant 0.000000e+00 : f32
    %15 = vector.broadcast %cst_11 : f32 to vector<16x512xf32>
    %16 = arith.maximumf %14, %15 : vector<16x512xf32>
    %17 = arith.truncf %16 : vector<16x512xf32> to vector<16x512xbf16>
    %c0_12 = arith.constant 0 : index
    %c0_13 = arith.constant 0 : index
    %18 = vector.load %arg6[%c0_12, %c0_13] : memref<512x256xbf16, #tpu.memory_space<vmem>>, vector<512x256xbf16>
    %cst_14 = arith.constant dense<0.000000e+00> : vector<16x256xf32>
    %19 = tpu.matmul %17, %18, %cst_14 {dimension_numbers = #tpu.dot_dimension_numbers<[1], [0], [0], [1], [0, 0, 1, 1], [], []>} : vector<16x512xbf16>, vector<512x256xbf16>, vector<16x256xf32> -> vector<16x256xf32>
    %c0_15 = arith.constant 0 : index
    %c0_16 = arith.constant 0 : index
    %20 = vector.load %arg7[%c0_15, %c0_16] : memref<1x256xf32, #tpu.memory_space<vmem>>, vector<1x256xf32>
    %21 = vector.broadcast %20 : vector<1x256xf32> to vector<16x256xf32>
    %22 = arith.addf %19, %21 : vector<16x256xf32>
    %cst_17 = arith.constant 0.000000e+00 : f32
    %23 = vector.broadcast %cst_17 : f32 to vector<16x256xf32>
    %24 = arith.maximumf %22, %23 : vector<16x256xf32>
    %25 = arith.truncf %24 : vector<16x256xf32> to vector<16x256xbf16>
    %c0_18 = arith.constant 0 : index
    %c0_19 = arith.constant 0 : index
    %26 = vector.load %arg8[%c0_18, %c0_19] : memref<256x256xbf16, #tpu.memory_space<vmem>>, vector<256x256xbf16>
    %cst_20 = arith.constant dense<0.000000e+00> : vector<16x256xf32>
    %27 = tpu.matmul %25, %26, %cst_20 {dimension_numbers = #tpu.dot_dimension_numbers<[1], [0], [0], [1], [0, 0, 1, 1], [], []>} : vector<16x256xbf16>, vector<256x256xbf16>, vector<16x256xf32> -> vector<16x256xf32>
    %c0_21 = arith.constant 0 : index
    %c0_22 = arith.constant 0 : index
    %28 = vector.load %arg9[%c0_21, %c0_22] : memref<1x256xf32, #tpu.memory_space<vmem>>, vector<1x256xf32>
    %29 = vector.broadcast %28 : vector<1x256xf32> to vector<16x256xf32>
    %30 = arith.addf %27, %29 : vector<16x256xf32>
    %31 = arith.mulf %30, %30 : vector<16x256xf32>
    %cst_23 = arith.constant dense<0.000000e+00> : vector<16xf32>
    %32 = vector.multi_reduction <add>, %31, %cst_23 [1] : vector<16x256xf32> to vector<16xf32>
    %33 = vector.shape_cast %32 : vector<16xf32> to vector<16x1xf32>
    %cst_24 = arith.constant 1.000000e-24 : f32
    %34 = vector.broadcast %cst_24 : f32 to vector<16x1xf32>
    %35 = arith.maximumf %33, %34 : vector<16x1xf32>
    %36 = math.rsqrt %35 : vector<16x1xf32>
    %37 = vector.broadcast %36 : vector<16x1xf32> to vector<16x256xf32>
    %38 = arith.mulf %30, %37 : vector<16x256xf32>
    %c0_25 = arith.constant 0 : index
    %c0_26 = arith.constant 0 : index
    %39 = vector.load %arg10[%c0_25, %c0_26] : memref<16x256xf32, #tpu.memory_space<vmem>>, vector<16x256xf32>
    tpu.vector_store %arg10[%c0_25, %c0_26], %38 {strides = array<i32>} : memref<16x256xf32, #tpu.memory_space<vmem>>, vector<16x256xf32>,
    return
  }
  func.func @transform_0(%arg0: i32) -> (i32, i32) {
    %c0_i32 = arith.constant 0 : i32
    %c0_i32_0 = arith.constant 0 : i32
    return %arg0, %c0_i32 : i32, i32
  }
  func.func @transform_1(%arg0: i32) -> (i32, i32) {
    %c0_i32 = arith.constant 0 : i32
    %c0_i32_0 = arith.constant 0 : i32
    %c0_i32_1 = arith.constant 0 : i32
    return %c0_i32, %c0_i32_0 : i32, i32
  }
  func.func @transform_2(%arg0: i32) -> (i32, i32) {
    %c0_i32 = arith.constant 0 : i32
    %c0_i32_0 = arith.constant 0 : i32
    %c0_i32_1 = arith.constant 0 : i32
    return %c0_i32, %c0_i32_0 : i32, i32
  }
  func.func @transform_3(%arg0: i32) -> (i32, i32) {
    %c0_i32 = arith.constant 0 : i32
    %c0_i32_0 = arith.constant 0 : i32
    %c0_i32_1 = arith.constant 0 : i32
    return %c0_i32, %c0_i32_0 : i32, i32
  }
  func.func @transform_4(%arg0: i32) -> (i32, i32) {
    %c0_i32 = arith.constant 0 : i32
    %c0_i32_0 = arith.constant 0 : i32
    %c0_i32_1 = arith.constant 0 : i32
    return %c0_i32, %c0_i32_0 : i32, i32
  }
  func.func @transform_5(%arg0: i32) -> (i32, i32) {
    %c0_i32 = arith.constant 0 : i32
    %c0_i32_0 = arith.constant 0 : i32
    %c0_i32_1 = arith.constant 0 : i32
    return %c0_i32, %c0_i32_0 : i32, i32
  }
  func.func @transform_6(%arg0: i32) -> (i32, i32) {
    %c0_i32 = arith.constant 0 : i32
    %c0_i32_0 = arith.constant 0 : i32
    %c0_i32_1 = arith.constant 0 : i32
    return %c0_i32, %c0_i32_0 : i32, i32
  }
  func.func @transform_7(%arg0: i32) -> (i32, i32) {
    %c0_i32 = arith.constant 0 : i32
    %c0_i32_0 = arith.constant 0 : i32
    %c0_i32_1 = arith.constant 0 : i32
    return %c0_i32, %c0_i32_0 : i32, i32
  }
  func.func @transform_8(%arg0: i32) -> (i32, i32) {
    %c0_i32 = arith.constant 0 : i32
    %c0_i32_0 = arith.constant 0 : i32
    %c0_i32_1 = arith.constant 0 : i32
    return %c0_i32, %c0_i32_0 : i32, i32
  }
  func.func @transform_9(%arg0: i32) -> (i32, i32) {
    %c0_i32 = arith.constant 0 : i32
    %c0_i32_0 = arith.constant 0 : i32
    return %arg0, %c0_i32 : i32, i32
  }
}

module attributes {stable_mosaic.version = 11 : i64} {
  func.func @_embedding_net_kernel(%arg0: i32, %arg1: memref<16x256xf32, #tpu.memory_space<vmem>>, %arg2: memref<256x1024xbf16, #tpu.memory_space<vmem>>, %arg3: memref<1x1024xf32, #tpu.memory_space<vmem>>, %arg4: memref<1024x512xbf16, #tpu.memory_space<vmem>>, %arg5: memref<1x512xf32, #tpu.memory_space<vmem>>, %arg6: memref<512x256xbf16, #tpu.memory_space<vmem>>, %arg7: memref<1x256xf32, #tpu.memory_space<vmem>>, %arg8: memref<256x256xbf16, #tpu.memory_space<vmem>>, %arg9: memref<1x256xf32, #tpu.memory_space<vmem>>, %arg10: memref<16x256xf32, #tpu.memory_space<vmem>>) attributes {dimension_semantics = [#tpu.dimension_semantics<parallel>], iteration_bounds = array<i64: 1>, scalar_prefetch = 0 : i64, scratch_operands = 0 : i64, tpu.core_type = #tpu.core_type<tc>, window_params = [{transform_indices = @transform_0, window_bounds = array<i64: 16, 256>}, {pipeline_mode = #tpu.pipeline_mode<synchronous>, transform_indices = @transform_1, window_bounds = array<i64: 256, 1024>}, {pipeline_mode = #tpu.pipeline_mode<synchronous>, transform_indices = @transform_2, window_bounds = array<i64: 1, 1024>}, {pipeline_mode = #tpu.pipeline_mode<synchronous>, transform_indices = @transform_3, window_bounds = array<i64: 1024, 512>}, {pipeline_mode = #tpu.pipeline_mode<synchronous>, transform_indices = @transform_4, window_bounds = array<i64: 1, 512>}, {pipeline_mode = #tpu.pipeline_mode<synchronous>, transform_indices = @transform_5, window_bounds = array<i64: 512, 256>}, {pipeline_mode = #tpu.pipeline_mode<synchronous>, transform_indices = @transform_6, window_bounds = array<i64: 1, 256>}, {pipeline_mode = #tpu.pipeline_mode<synchronous>, transform_indices = @transform_7, window_bounds = array<i64: 256, 256>}, {pipeline_mode = #tpu.pipeline_mode<synchronous>, transform_indices = @transform_8, window_bounds = array<i64: 1, 256>}, {transform_indices = @transform_9, window_bounds = array<i64: 16, 256>}]} {
    %c0 = arith.constant 0 : index
    %c0_0 = arith.constant 0 : index
    %0 = vector.load %arg1[%c0, %c0_0] : memref<16x256xf32, #tpu.memory_space<vmem>>, vector<16x256xf32>
    %1 = arith.truncf %0 : vector<16x256xf32> to vector<16x256xbf16>
    %c0_1 = arith.constant 0 : index
    %c0_2 = arith.constant 0 : index
    %2 = vector.load %arg2[%c0_1, %c0_2] : memref<256x1024xbf16, #tpu.memory_space<vmem>>, vector<256x1024xbf16>
    %cst = arith.constant dense<0.000000e+00> : vector<16x1024xf32>
    %3 = tpu.matmul %1, %2, %cst {dimension_numbers = #tpu.dot_dimension_numbers<[1], [0], [0], [1], [0, 0, 1, 1], [], []>} : vector<16x256xbf16>, vector<256x1024xbf16>, vector<16x1024xf32> -> vector<16x1024xf32>
    %c0_3 = arith.constant 0 : index
    %c0_4 = arith.constant 0 : index
    %4 = vector.load %arg3[%c0_3, %c0_4] : memref<1x1024xf32, #tpu.memory_space<vmem>>, vector<1x1024xf32>
    %5 = vector.broadcast %4 : vector<1x1024xf32> to vector<16x1024xf32>
    %6 = arith.addf %3, %5 : vector<16x1024xf32>
    %cst_5 = arith.constant 0.000000e+00 : f32
    %7 = vector.broadcast %cst_5 : f32 to vector<16x1024xf32>
    %8 = arith.maximumf %6, %7 : vector<16x1024xf32>
    %9 = arith.truncf %8 : vector<16x1024xf32> to vector<16x1024xbf16>
    %c0_6 = arith.constant 0 : index
    %c0_7 = arith.constant 0 : index
    %10 = vector.load %arg4[%c0_6, %c0_7] : memref<1024x512xbf16, #tpu.memory_space<vmem>>, vector<1024x512xbf16>
    %cst_8 = arith.constant dense<0.000000e+00> : vector<16x512xf32>
    %11 = tpu.matmul %9, %10, %cst_8 {dimension_numbers = #tpu.dot_dimension_numbers<[1], [0], [0], [1], [0, 0, 1, 1], [], []>} : vector<16x1024xbf16>, vector<1024x512xbf16>, vector<16x512xf32> -> vector<16x512xf32>
    %c0_9 = arith.constant 0 : index
    %c0_10 = arith.constant 0 : index
    %12 = vector.load %arg5[%c0_9, %c0_10] : memref<1x512xf32, #tpu.memory_space<vmem>>, vector<1x512xf32>
    %13 = vector.broadcast %12 : vector<1x512xf32> to vector<16x512xf32>
    %14 = arith.addf %11, %13 : vector<16x512xf32>
    %cst_11 = arith.constant 0.000000e+00 : f32
    %15 = vector.broadcast %cst_11 : f32 to vector<16x512xf32>
    %16 = arith.maximumf %14, %15 : vector<16x512xf32>
    %17 = arith.truncf %16 : vector<16x512xf32> to vector<16x512xbf16>
    %c0_12 = arith.constant 0 : index
    %c0_13 = arith.constant 0 : index
    %18 = vector.load %arg6[%c0_12, %c0_13] : memref<512x256xbf16, #tpu.memory_space<vmem>>, vector<512x256xbf16>
    %cst_14 = arith.constant dense<0.000000e+00> : vector<16x256xf32>
    %19 = tpu.matmul %17, %18, %cst_14 {dimension_numbers = #tpu.dot_dimension_numbers<[1], [0], [0], [1], [0, 0, 1, 1], [], []>} : vector<16x512xbf16>, vector<512x256xbf16>, vector<16x256xf32> -> vector<16x256xf32>
    %c0_15 = arith.constant 0 : index
    %c0_16 = arith.constant 0 : index
    %20 = vector.load %arg7[%c0_15, %c0_16] : memref<1x256xf32, #tpu.memory_space<vmem>>, vector<1x256xf32>
    %21 = vector.broadcast %20 : vector<1x256xf32> to vector<16x256xf32>
    %22 = arith.addf %19, %21 : vector<16x256xf32>
    %cst_17 = arith.constant 0.000000e+00 : f32
    %23 = vector.broadcast %cst_17 : f32 to vector<16x256xf32>
    %24 = arith.maximumf %22, %23 : vector<16x256xf32>
    %25 = arith.truncf %24 : vector<16x256xf32> to vector<16x256xbf16>
    %c0_18 = arith.constant 0 : index
    %c0_19 = arith.constant 0 : index
    %26 = vector.load %arg8[%c0_18, %c0_19] : memref<256x256xbf16, #tpu.memory_space<vmem>>, vector<256x256xbf16>
    %cst_20 = arith.constant dense<0.000000e+00> : vector<16x256xf32>
    %27 = tpu.matmul %25, %26, %cst_20 {dimension_numbers = #tpu.dot_dimension_numbers<[1], [0], [0], [1], [0, 0, 1, 1], [], []>} : vector<16x256xbf16>, vector<256x256xbf16>, vector<16x256xf32> -> vector<16x256xf32>
    %c0_21 = arith.constant 0 : index
    %c0_22 = arith.constant 0 : index
    %28 = vector.load %arg9[%c0_21, %c0_22] : memref<1x256xf32, #tpu.memory_space<vmem>>, vector<1x256xf32>
    %29 = vector.broadcast %28 : vector<1x256xf32> to vector<16x256xf32>
    %30 = arith.addf %27, %29 : vector<16x256xf32>
    %31 = arith.mulf %30, %30 : vector<16x256xf32>
    %cst_23 = arith.constant dense<0.000000e+00> : vector<16xf32>
    %32 = vector.multi_reduction <add>, %31, %cst_23 [1] : vector<16x256xf32> to vector<16xf32>
    %33 = vector.shape_cast %32 : vector<16xf32> to vector<16x1xf32>
    %cst_24 = arith.constant 1.000000e-24 : f32
    %34 = vector.broadcast %cst_24 : f32 to vector<16x1xf32>
    %35 = arith.maximumf %33, %34 : vector<16x1xf32>
    %36 = math.rsqrt %35 : vector<16x1xf32>
    %37 = vector.broadcast %36 : vector<16x1xf32> to vector<16x256xf32>
    %38 = arith.mulf %30, %37 : vector<16x256xf32>
    %c0_25 = arith.constant 0 : index
    %c0_26 = arith.constant 0 : index
    %39 = vector.load %arg10[%c0_25, %c0_26] : memref<16x256xf32, #tpu.memory_space<vmem>>, vector<16x256xf32>
    tpu.vector_store %arg10[%c0_25, %c0_26], %38 {strides = array<i32>} : memref<16x256xf32, #tpu.memory_space<vmem>>, vector<16x256xf32>,
    return
  }
  func.func @transform_0(%arg0: i32) -> (i32, i32) {
    %c0_i32 = arith.constant 0 : i32
    %c0_i32_0 = arith.constant 0 : i32
    return %arg0, %c0_i32 : i32, i32
  }
  func.func @transform_1(%arg0: i32) -> (i32, i32) {
    %c0_i32 = arith.constant 0 : i32
    %c0_i32_0 = arith.constant 0 : i32
    %c0_i32_1 = arith.constant 0 : i32
    return %c0_i32, %c0_i32_0 : i32, i32
  }
  func.func @transform_2(%arg0: i32) -> (i32, i32) {
    %c0_i32 = arith.constant 0 : i32
    %c0_i32_0 = arith.constant 0 : i32
    %c0_i32_1 = arith.constant 0 : i32
    return %c0_i32, %c0_i32_0 : i32, i32
  }
  func.func @transform_3(%arg0: i32) -> (i32, i32) {
    %c0_i32 = arith.constant 0 : i32
    %c0_i32_0 = arith.constant 0 : i32
    %c0_i32_1 = arith.constant 0 : i32
    return %c0_i32, %c0_i32_0 : i32, i32
  }
  func.func @transform_4(%arg0: i32) -> (i32, i32) {
    %c0_i32 = arith.constant 0 : i32
    %c0_i32_0 = arith.constant 0 : i32
    %c0_i32_1 = arith.constant 0 : i32
    return %c0_i32, %c0_i32_0 : i32, i32
  }
  func.func @transform_5(%arg0: i32) -> (i32, i32) {
    %c0_i32 = arith.constant 0 : i32
    %c0_i32_0 = arith.constant 0 : i32
    %c0_i32_1 = arith.constant 0 : i32
    return %c0_i32, %c0_i32_0 : i32, i32
  }
  func.func @transform_6(%arg0: i32) -> (i32, i32) {
    %c0_i32 = arith.constant 0 : i32
    %c0_i32_0 = arith.constant 0 : i32
    %c0_i32_1 = arith.constant 0 : i32
    return %c0_i32, %c0_i32_0 : i32, i32
  }
  func.func @transform_7(%arg0: i32) -> (i32, i32) {
    %c0_i32 = arith.constant 0 : i32
    %c0_i32_0 = arith.constant 0 : i32
    %c0_i32_1 = arith.constant 0 : i32
    return %c0_i32, %c0_i32_0 : i32, i32
  }
  func.func @transform_8(%arg0: i32) -> (i32, i32) {
    %c0_i32 = arith.constant 0 : i32
    %c0_i32_0 = arith.constant 0 : i32
    %c0_i32_1 = arith.constant 0 : i32
    return %c0_i32, %c0_i32_0 : i32, i32
  }
  func.func @transform_9(%arg0: i32) -> (i32, i32) {
    %c0_i32 = arith.constant 0 : i32
    %c0_i32_0 = arith.constant 0 : i32
    return %arg0, %c0_i32 : i32, i32
  }
}

</mosaic_0001>

<bundles_post_ra>
// kernel: tpu_custom_call.1
= control target key start
LH: loop header
LB: loop body
LE: loop exit
PB: predicated region body
PF: predicated region fallthrough
CT: control target
= control target key end

     0   :  { %14 = vsyncpa [#allocation3], 0  ;;  %s5417_s0 = inlined_call_operand.hbm [shape: f32[16,256], index: 0, kind: input, shape index: {}]   ;;  %s5418_s1 = inlined_call_operand.hbm [shape: bf16[256,1024], index: 1, kind: input, shape index: {}]   ;;  %s5419_s2 = inlined_call_operand.hbm [shape: f32[1,1024], index: 2, kind: input, shape index: {}]   ;;  %s5420_s3 = inlined_call_operand.hbm [shape: bf16[1024,512], index: 3, kind: input, shape index: {}]   ;;  %s5421_s4 = inlined_call_operand.hbm [shape: f32[1,512], index: 4, kind: input, shape index: {}]   ;;  %s5422_s5 = inlined_call_operand.hbm [shape: bf16[512,256], index: 5, kind: input, shape index: {}]   ;;  %s5423_s6 = inlined_call_operand.hbm [shape: f32[1,256], index: 6, kind: input, shape index: {}]   ;;  %s5424_s7 = inlined_call_operand.hbm [shape: bf16[256,256], index: 7, kind: input, shape index: {}]   ;;  %s5425_s8 = inlined_call_operand.hbm [shape: f32[1,256], index: 8, kind: input, shape index: {}]   ;;  %s5426_s9 = inlined_call_operand.hbm [shape: f32[16,256], index: 9, kind: output, shape index: {}]  }
   0x1   :  { %15 = vsyncpa [#allocation6], 0 }
   0x2   :  { %16 = vsyncpa [#allocation9], 0 }
   0x3   :  { %17 = vsyncpa [#allocation12], 0 }
   0x4   :  { %18 = vsyncpa [#allocation15], 0 }
   0x5   :  { %19 = vsyncpa [#allocation4], 0  ;;  %s5151_s30 = smov [#allocation5]   ;;  %s4919_s13 = scalar_lea.hbm %s5418_s1, 16384 }
   0x6   :  { %s37_s10 = sshll.u32 %s5151_s30, 4  ;;  %p4920_p0 = scmp.ne.s32.totalorder %s5418_s1, %s4919_s13  ;;  %s38_s10 = int_to_ptr.vmem [resolvable:$true] %s37_s10 }
   0x7   :  { %p4923_p1 = scmp.lt.u32.totalorder %s4919_s13, %s5418_s1 }
   0x9   :  { %p4925_p2 = pnand %p4923_p1, %p4920_p0 }
   0xb   :  { %4928 = shalt.err (!%p4925_p2)
}
   0xc   :  { %s4929_s18 = scalar_lea.vmem %s38_s10, 16384  ;;  %p4934_p4 = scmp.lt.s32.totalorder %s38_s10, %s38_s10 }
   0xd   :  { %p4930_p3 = scmp.ne.s32.totalorder %s38_s10, %s4929_s18  ;;  %p4935_p5 = scmp.lt.s32.totalorder %s4929_s18, %s4929_s18 }
   0xf   :  { %p4936_p6 = por %p4935_p5, %p4934_p4 }
  0x11   :  { %p4937_p7 = pnand %p4936_p6, %p4930_p3 }
  0x13   :  { %4940 = shalt.err (!%p4937_p7)
}
  0x14   :  { %s5152_s19 = smov 512   ;;  %s5153_s20 = smov 32  }
  0x15   :  { %43 = dma.hbm_to_vmem [thread:$0]  %s5418_s1, 16384, %s38_s10, [#allocation6], %s5152_s19, %s5152_s19, %s5153_s20  }
  0x16   :  { %s5154_s23 = smov [#allocation8]   ;;  %s5155_s25 = smov [#allocation11]  }
  0x17   :  { %s59_s24 = sshll.u32 %s5154_s23, 4  ;;  %s81_s26 = sshll.u32 %s5155_s25, 4  ;;  %s60_s24 = int_to_ptr.vmem [resolvable:$true] %s59_s24  ;;  %s82_s26 = int_to_ptr.vmem [resolvable:$true] %s81_s26 }
  0x18   :  { %s4941_s29 = scalar_lea.hbm %s5420_s3, 32768 }
  0x19   :  { %p4942_p8 = scmp.ne.s32.totalorder %s5420_s3, %s4941_s29  ;;  %p4945_p9 = scmp.lt.u32.totalorder %s4941_s29, %s5420_s3 }
  0x1b   :  { %p4947_p10 = pnand %p4945_p9, %p4942_p8 }
  0x1d   :  { %4950 = shalt.err (!%p4947_p10)
}
  0x1e   :  { %s4951_s1 = scalar_lea.vmem %s60_s24, 32768  ;;  %p4956_p12 = scmp.lt.s32.totalorder %s60_s24, %s60_s24 }
  0x1f   :  { %p4952_p11 = scmp.ne.s32.totalorder %s60_s24, %s4951_s1  ;;  %p4957_p13 = scmp.lt.s32.totalorder %s4951_s1, %s4951_s1 }
  0x21   :  { %p4958_p0 = por %p4957_p13, %p4956_p12 }
  0x23   :  { %p4959_p1 = pnand %p4958_p0, %p4952_p11 }
  0x25   :  { %4962 = shalt.err (!%p4959_p1)
}
  0x26   :  { %s5156_s10 = smov 256   ;;  %s5157_s14 = smov 16  }
  0x27   :  { %65 = dma.hbm_to_vmem [thread:$0]  %s5420_s3, 32768, %s60_s24, [#allocation9], %s5156_s10, %s5156_s10, %s5157_s14  }
  0x28   :  { %s4963_s19 = scalar_lea.hbm %s5422_s5, 8192 }
  0x29   :  { %p4964_p2 = scmp.ne.s32.totalorder %s5422_s5, %s4963_s19  ;;  %p4967_p3 = scmp.lt.u32.totalorder %s4963_s19, %s5422_s5 }
  0x2b   :  { %p4969_p4 = pnand %p4967_p3, %p4964_p2 }
  0x2d   :  { %4972 = shalt.err (!%p4969_p4)
}
  0x2e   :  { %s4973_s25 = scalar_lea.vmem %s82_s26, 8192  ;;  %p4978_p6 = scmp.lt.s32.totalorder %s82_s26, %s82_s26 }
  0x2f   :  { %p4974_p5 = scmp.ne.s32.totalorder %s82_s26, %s4973_s25  ;;  %p4979_p7 = scmp.lt.s32.totalorder %s4973_s25, %s4973_s25 }
  0x31   :  { %p4980_p8 = por %p4979_p7, %p4978_p6 }
  0x33   :  { %p4981_p9 = pnand %p4980_p8, %p4974_p5 }
  0x35   :  { %4984 = shalt.err (!%p4981_p9)
}
  0x36   :  { %s5158_s3 = smov 128   ;;  %s5159_s24 = smov 8  }
  0x37   :  { %87 = dma.hbm_to_vmem [thread:$0]  %s5422_s5, 8192, %s82_s26, [#allocation12], %s5158_s3, %s5158_s3, %s5159_s24  }
  0x38   :  { %s5160_s29 = smov [#allocation14]   ;;  %s5161_s11 = smov [#allocation2]  }
  0x39   :  { %s103_s30 = sshll.u32 %s5160_s29, 4  ;;  %s25_s12 = sshll.u32 %s5161_s11, 4  ;;  %s104_s30 = int_to_ptr.vmem [resolvable:$true] %s103_s30  ;;  %s26_s12 = int_to_ptr.vmem [resolvable:$true] %s25_s12 }
  0x3a   :  { %s4985_s15 = scalar_lea.hbm %s5424_s7, 4096 }
  0x3b   :  { %p4986_p10 = scmp.ne.s32.totalorder %s5424_s7, %s4985_s15  ;;  %p4989_p11 = scmp.lt.u32.totalorder %s4985_s15, %s5424_s7 }
  0x3d   :  { %p4991_p12 = pnand %p4989_p11, %p4986_p10 }
  0x3f   :  { %4994 = shalt.err (!%p4991_p12)
}
  0x40   :  { %s4995_s5 = scalar_lea.vmem %s104_s30, 4096  ;;  %p5000_p0 = scmp.lt.s32.totalorder %s104_s30, %s104_s30 }
  0x41   :  { %p4996_p13 = scmp.ne.s32.totalorder %s104_s30, %s4995_s5  ;;  %p5001_p1 = scmp.lt.s32.totalorder %s4995_s5, %s4995_s5 }
  0x43   :  { %p5002_p2 = por %p5001_p1, %p5000_p0 }
  0x45   :  { %p5003_p3 = pnand %p5002_p2, %p4996_p13 }
  0x47   :  { %5006 = shalt.err (!%p5003_p3)
}
  0x48   :  { %109 = dma.hbm_to_vmem [thread:$0]  %s5424_s7, 4096, %s104_s30, [#allocation15], %s5158_s3, %s5158_s3, %s5159_s24  }
  0x49   :  { %s5007_s23 = scalar_lea.hbm %s5417_s0, 512 }
  0x4a   :  { %p5008_p4 = scmp.ne.s32.totalorder %s5417_s0, %s5007_s23  ;;  %p5011_p5 = scmp.lt.u32.totalorder %s5007_s23, %s5417_s0 }
  0x4c   :  { %p5013_p6 = pnand %p5011_p5, %p5008_p4 }
  0x4e   :  { %5016 = shalt.err (!%p5013_p6)
}
  0x4f   :  { %s5017_s11 = scalar_lea.vmem %s26_s12, 512  ;;  %p5022_p8 = scmp.lt.s32.totalorder %s26_s12, %s26_s12 }
  0x50   :  { %p5018_p7 = scmp.ne.s32.totalorder %s26_s12, %s5017_s11  ;;  %p5023_p9 = scmp.lt.s32.totalorder %s5017_s11, %s5017_s11 }
  0x52   :  { %p5024_p10 = por %p5023_p9, %p5022_p8 }
  0x54   :  { %p5025_p11 = pnand %p5024_p10, %p5018_p7 }
  0x56   :  { %5028 = shalt.err (!%p5025_p11)
}
  0x57   :  { %31 = dma.hbm_to_vmem [thread:$0]  %s5417_s0, 512, %s26_s12, [#allocation3], %s5156_s10, %s5156_s10, %s5157_s14  }
  0x58   :  { %s5162_s24 = smov [#allocation7]   ;;  %s5163_s13 = smov [#allocation10]  }
  0x59   :  { %s50_s30 = sshll.u32 %s5162_s24, 4  ;;  %s72_s1 = sshll.u32 %s5163_s13, 4  ;;  %s51_s30 = int_to_ptr.vmem [resolvable:$true] %s50_s30  ;;  %s73_s1 = int_to_ptr.vmem [resolvable:$true] %s72_s1 }
  0x5a   :  { %s5029_s17 = scalar_lea.hbm %s5419_s2, 128 }
  0x5b   :  { %p5030_p12 = scmp.ne.s32.totalorder %s5419_s2, %s5029_s17  ;;  %p5033_p13 = scmp.lt.u32.totalorder %s5029_s17, %s5419_s2 }
  0x5d   :  { %p5035_p0 = pnand %p5033_p13, %p5030_p12 }
  0x5f   :  { %5038 = shalt.err (!%p5035_p0)
}
  0x60   :  { %s5039_s0 = scalar_lea.vmem %s51_s30, 128  ;;  %p5044_p2 = scmp.lt.s32.totalorder %s51_s30, %s51_s30 }
  0x61   :  { %p5040_p1 = scmp.ne.s32.totalorder %s51_s30, %s5039_s0  ;;  %p5045_p3 = scmp.lt.s32.totalorder %s5039_s0, %s5039_s0 }
  0x63   :  { %p5046_p4 = por %p5045_p3, %p5044_p2 }
  0x65   :  { %p5047_p5 = pnand %p5046_p4, %p5040_p1 }
  0x67   :  { %5050 = shalt.err (!%p5047_p5)
}
  0x68   :  { %53 = dma.hbm_to_vmem [thread:$0]  %s5419_s2, 128, %s51_s30, [#allocation6]  }
  0x69   :  { %s5051_s23 = scalar_lea.hbm %s5421_s4, 64 }
  0x6a   :  { %p5052_p6 = scmp.ne.s32.totalorder %s5421_s4, %s5051_s23  ;;  %p5055_p7 = scmp.lt.u32.totalorder %s5051_s23, %s5421_s4 }
  0x6c   :  { %p5057_p8 = pnand %p5055_p7, %p5052_p6 }
  0x6e   :  { %5060 = shalt.err (!%p5057_p8)
}
  0x6f   :  { %s5061_s11 = scalar_lea.vmem %s73_s1, 64  ;;  %p5066_p10 = scmp.lt.s32.totalorder %s73_s1, %s73_s1 }
  0x70   :  { %p5062_p9 = scmp.ne.s32.totalorder %s73_s1, %s5061_s11  ;;  %p5067_p11 = scmp.lt.s32.totalorder %s5061_s11, %s5061_s11 }
  0x72   :  { %p5068_p12 = por %p5067_p11, %p5066_p10 }
  0x74   :  { %p5069_p13 = pnand %p5068_p12, %p5062_p9 }
  0x76   :  { %5072 = shalt.err (!%p5069_p13)
}
  0x77   :  { %75 = dma.hbm_to_vmem [thread:$0]  %s5421_s4, 64, %s73_s1, [#allocation9]  }
  0x78   :  { %s5164_s3 = smov [#allocation13]   ;;  %s5165_s30 = smov [#allocation16]  }
  0x79   :  { %s94_s24 = sshll.u32 %s5164_s3, 4  ;;  %s116_s13 = sshll.u32 %s5165_s30, 4  ;;  %s95_s24 = int_to_ptr.vmem [resolvable:$true] %s94_s24  ;;  %s117_s13 = int_to_ptr.vmem [resolvable:$true] %s116_s13 }
  0x7a   :  { %s5073_s17 = scalar_lea.hbm %s5423_s6, 32 }
  0x7b   :  { %p5074_p0 = scmp.ne.s32.totalorder %s5423_s6, %s5073_s17  ;;  %p5077_p1 = scmp.lt.u32.totalorder %s5073_s17, %s5423_s6 }
  0x7d   :  { %p5079_p2 = pnand %p5077_p1, %p5074_p0 }
  0x7f   :  { %5082 = shalt.err (!%p5079_p2)
}
  0x80   :  { %s5083_s4 = scalar_lea.vmem %s95_s24, 32  ;;  %p5088_p4 = scmp.lt.s32.totalorder %s95_s24, %s95_s24 }
  0x81   :  { %p5084_p3 = scmp.ne.s32.totalorder %s95_s24, %s5083_s4  ;;  %p5089_p5 = scmp.lt.s32.totalorder %s5083_s4, %s5083_s4 }
  0x83   :  { %p5090_p6 = por %p5089_p5, %p5088_p4 }
  0x85   :  { %p5091_p7 = pnand %p5090_p6, %p5084_p3 }
  0x87   :  { %5094 = shalt.err (!%p5091_p7)
}
  0x88   :  { %97 = dma.hbm_to_vmem [thread:$0]  %s5423_s6, 32, %s95_s24, [#allocation12]  }
  0x89   :  { %s5095_s21 = scalar_lea.hbm %s5425_s8, 32 }
  0x8a   :  { %p5096_p8 = scmp.ne.s32.totalorder %s5425_s8, %s5095_s21  ;;  %p5099_p9 = scmp.lt.u32.totalorder %s5095_s21, %s5425_s8 }
  0x8c   :  { %p5101_p10 = pnand %p5099_p9, %p5096_p8 }
  0x8e   :  { %5104 = shalt.err (!%p5101_p10)
}
  0x8f   :  { %s5105_s28 = scalar_lea.vmem %s117_s13, 32  ;;  %p5110_p12 = scmp.lt.s32.totalorder %s117_s13, %s117_s13 }
  0x90   :  { %p5106_p11 = scmp.ne.s32.totalorder %s117_s13, %s5105_s28  ;;  %p5111_p13 = scmp.lt.s32.totalorder %s5105_s28, %s5105_s28 }
  0x92   :  { %p5112_p0 = por %p5111_p13, %p5110_p12 }
  0x94   :  { %p5113_p1 = pnand %p5112_p0, %p5106_p11 }
  0x96   :  { %5116 = shalt.err (!%p5113_p1)
}
  0x97   :  { %119 = dma.hbm_to_vmem [thread:$0]  %s5425_s8, 32, %s117_s13, [#allocation15]  }
  0x98   :  { %5139 = dma.done.wait [#allocation3], 512  }
  0x99   :  { %5140 = vsyncadd [#allocation3], 4294966784 }
  0x9a   :  { %5141 = dma.done.wait [#allocation6], 16512  }
  0x9b   :  { %5142 = vsyncadd [#allocation6], 4294950784 }
  0x9c   :  { %5143 = dma.done.wait [#allocation9], 32832  }
  0x9d   :  { %5144 = vsyncadd [#allocation9], 4294934464 }
  0x9e   :  { %5145 = dma.done.wait [#allocation12], 8224  }
  0x9f   :  { %5146 = vsyncadd [#allocation12], 4294959072 }
  0xa0   :  { %5147 = dma.done.wait [#allocation15], 4128  }
  0xa1   :  { %5148 = vsyncadd [#allocation15], 4294963168  ;;  %v153_v0 = vld [vmem:[#allocation5] sm:$0xff]  ;;  %v154_v17 = vld [vmem:[#allocation5 + $0x8] sm:$0xff]  ;;  %s5166_s8 = smov [#allocation17]  }
  0xa2   :  { %v157_v1 = vld [vmem:[#allocation5 + $0x20] sm:$0xff]  ;;  %v158_v18 = vld [vmem:[#allocation5 + $0x28] sm:$0xff]  ;;  %v150_v20 = vld [vmem:[#allocation2 + $0x18] sm:$0xff]  ;;  %s3835_s11 = sshll.u32 %s5166_s8, 4  ;;  %s3836_s11 = int_to_ptr.vmem [resolvable:$true] %s3835_s11 }
  0xa3   :  { %v161_v2 = vld [vmem:[#allocation5 + $0x40] sm:$0xff]  ;;  %v3852_v3 = vcombine.high %v153_v0, %v157_v1  ;;  %v3851_v4 = vcombine.low %v153_v0, %v157_v1  ;;  %v148_v19 = vld [vmem:[#allocation2 + $0x8] sm:$0xff]  ;;  %v3854_v22 = vcombine.high %v154_v17, %v158_v18  ;;  %v3853_v23 = vcombine.low %v154_v17, %v158_v18  ;;  %s5117_s2 = scalar_lea.vmem %s3836_s11, 512  ;;  %p5122_p3 = scmp.lt.s32.totalorder %s3836_s11, %s3836_s11 }
  0xa4   :  { %v165_v5 = vld [vmem:[#allocation5 + $0x60] sm:$0xff]  ;;  %v5331_v24 = vpack.c.bf16 %v150_v20, %v148_v19  ;;  %v162_v25 = vld [vmem:[#allocation5 + $0x48] sm:$0xff]  ;;  %p5118_p2 = scmp.ne.s32.totalorder %s3836_s11, %s5117_s2  ;;  %p5123_p4 = scmp.lt.s32.totalorder %s5117_s2, %s5117_s2 }
  0xa5   :  { %v3860_v6 = vcombine.high %v161_v2, %v165_v5  ;;  %v169_v7 = vld [vmem:[#allocation5 + $0x80] sm:$0xff]  ;;  %963 = vmatprep.subr.bf16.mxu0 %v3852_v3  ;;  %v3859_v9 = vcombine.low %v161_v2, %v165_v5  ;;  %v166_v27 = vld [vmem:[#allocation5 + $0x68] sm:$0xff]  ;;  %1006 = vmatprep.subr.bf16.mxu1 %v3854_v22 }
  0xa6   :  { %v173_v8 = vld [vmem:[#allocation5 + $0xa0] sm:$0xff]  ;;  %964 = vmatpush1.bf16.msra.mxu0 %v3851_v4  ;;  %v170_v28 = vld [vmem:[#allocation5 + $0x88] sm:$0xff]  ;;  %995 = vmatprep.mubr.bf16.mxu0 %v5331_v24  ;;  %v3862_v32 = vcombine.high %v162_v25, %v166_v27  ;;  %v3861_v33 = vcombine.low %v162_v25, %v166_v27  ;;  %p5124_p5 = por %p5123_p4, %p5122_p3 }
  0xa7   :  { %965 = vmatprep.subr.bf16.mxu0 %v3860_v6  ;;  %v3868_v10 = vcombine.high %v169_v7, %v173_v8  ;;  %v177_v11 = vld [vmem:[#allocation5 + $0xc0] sm:$0xff]  ;;  %v3867_v13 = vcombine.low %v169_v7, %v173_v8  ;;  %v174_v29 = vld [vmem:[#allocation5 + $0xa8] sm:$0xff]  ;;  %1007 = vmatpush1.bf16.msra.mxu1 %v3853_v23 }
  0xa8   :  { %v181_v12 = vld [vmem:[#allocation5 + $0xe0] sm:$0xff]  ;;  %1038 = vmatprep.mubr.bf16.mxu1 %v5331_v24  ;;  %1008 = vmatprep.subr.bf16.mxu1 %v3862_v32  ;;  %v3870_v35 = vcombine.high %v170_v28, %v174_v29  ;;  %v178_v37 = vld [vmem:[#allocation5 + $0xc8] sm:$0xff]  ;;  %v3869_v41 = vcombine.low %v170_v28, %v174_v29  ;;  %p5125_p6 = pnand %p5124_p5, %p5118_p2 }
  0xa9   :  { %v3876_v14 = vcombine.high %v177_v11, %v181_v12  ;;  %v185_v15 = vld [vmem:[#allocation5 + $0x100] sm:$0xff]  ;;  %v3875_v21 = vcombine.low %v177_v11, %v181_v12  ;;  %v182_v38 = vld [vmem:[#allocation5 + $0xe8] sm:$0xff] }
  0xaa   :  { %966 = vmatpush1.bf16.msra.mxu0 %v3859_v9  ;;  %v189_v16 = vld [vmem:[#allocation5 + $0x120] sm:$0xff]  ;;  %v3878_v43 = vcombine.high %v178_v37, %v182_v38  ;;  %v186_v45 = vld [vmem:[#allocation5 + $0x108] sm:$0xff]  ;;  %v3877_v49 = vcombine.low %v178_v37, %v182_v38 }
  0xab   :  { %967 = vmatprep.subr.bf16.mxu0 %v3868_v10  ;;  %v3884_v26 = vcombine.high %v185_v15, %v189_v16  ;;  %v193_v30 = vld [vmem:[#allocation5 + $0x140] sm:$0xff]  ;;  %v3883_v34 = vcombine.low %v185_v15, %v189_v16  ;;  %1009 = vmatpush1.bf16.msra.mxu1 %v3861_v33  ;;  %v190_v46 = vld [vmem:[#allocation5 + $0x128] sm:$0xff] }
  0xac   :  { %v197_v31 = vld [vmem:[#allocation5 + $0x160] sm:$0xff]  ;;  %1010 = vmatprep.subr.bf16.mxu1 %v3870_v35  ;;  %v3886_v51 = vcombine.high %v186_v45, %v190_v46  ;;  %v194_v53 = vld [vmem:[#allocation5 + $0x148] sm:$0xff]  ;;  %v3885_v57 = vcombine.low %v186_v45, %v190_v46 }
  0xad   :  { %v3892_v36 = vcombine.high %v193_v30, %v197_v31  ;;  %v201_v39 = vld [vmem:[#allocation5 + $0x180] sm:$0xff]  ;;  %v3891_v42 = vcombine.low %v193_v30, %v197_v31  ;;  %v198_v54 = vld [vmem:[#allocation5 + $0x168] sm:$0xff] }
  0xae   :  { %968 = vmatpush1.bf16.msra.mxu0 %v3867_v13  ;;  %v205_v40 = vld [vmem:[#allocation5 + $0x1a0] sm:$0xff]  ;;  %v3894_v59 = vcombine.high %v194_v53, %v198_v54  ;;  %v202_v61 = vld [vmem:[#allocation5 + $0x188] sm:$0xff]  ;;  %v3893_v1 = vcombine.low %v194_v53, %v198_v54 }
  0xaf   :  { %969 = vmatprep.subr.bf16.mxu0 %v3876_v14  ;;  %v3900_v44 = vcombine.high %v201_v39, %v205_v40  ;;  %v209_v47 = vld [vmem:[#allocation5 + $0x1c0] sm:$0xff]  ;;  %1011 = vmatpush1.bf16.msra.mxu1 %v3869_v41  ;;  %v3899_v50 = vcombine.low %v201_v39, %v205_v40  ;;  %v206_v62 = vld [vmem:[#allocation5 + $0x1a8] sm:$0xff] }
  0xb0   :  { %v213_v48 = vld [vmem:[#allocation5 + $0x1e0] sm:$0xff]  ;;  %1012 = vmatprep.subr.bf16.mxu1 %v3878_v43  ;;  %v3902_v3 = vcombine.high %v202_v61, %v206_v62  ;;  %v210_v5 = vld [vmem:[#allocation5 + $0x1c8] sm:$0xff]  ;;  %v3901_v9 = vcombine.low %v202_v61, %v206_v62 }
  0xb1   :  { %v3908_v52 = vcombine.high %v209_v47, %v213_v48  ;;  %v217_v55 = vld [vmem:[#allocation5 + $0x200] sm:$0xff]  ;;  %v3907_v58 = vcombine.low %v209_v47, %v213_v48  ;;  %v214_v6 = vld [vmem:[#allocation5 + $0x1e8] sm:$0xff] }
  0xb2   :  { %970 = vmatpush1.bf16.msra.mxu0 %v3875_v21  ;;  %v221_v56 = vld [vmem:[#allocation5 + $0x220] sm:$0xff]  ;;  %v3910_v11 = vcombine.high %v210_v5, %v214_v6  ;;  %v218_v13 = vld [vmem:[#allocation5 + $0x208] sm:$0xff]  ;;  %v3909_v17 = vcombine.low %v210_v5, %v214_v6 }
  0xb3   :  { %971 = vmatprep.subr.bf16.mxu0 %v3884_v26  ;;  %1013 = vmatpush1.bf16.msra.mxu1 %v3877_v49  ;;  %v3916_v60 = vcombine.high %v217_v55, %v221_v56  ;;  %v225_v63 = vld [vmem:[#allocation5 + $0x240] sm:$0xff]  ;;  %v3915_v2 = vcombine.low %v217_v55, %v221_v56  ;;  %v222_v14 = vld [vmem:[#allocation5 + $0x228] sm:$0xff]  ;;  %v155_v56 = vld [vmem:[#allocation5 + $0x10] sm:$0xff] }
  0xb4   :  { %1014 = vmatprep.subr.bf16.mxu1 %v3886_v51  ;;  %v229_v0 = vld [vmem:[#allocation5 + $0x260] sm:$0xff]  ;;  %v3918_v19 = vcombine.high %v218_v13, %v222_v14  ;;  %v226_v21 = vld [vmem:[#allocation5 + $0x248] sm:$0xff]  ;;  %v3917_v26 = vcombine.low %v218_v13, %v222_v14 }
  0xb5   :  { %v3924_v4 = vcombine.high %v225_v63, %v229_v0  ;;  %v233_v7 = vld [vmem:[#allocation5 + $0x280] sm:$0xff]  ;;  %v3923_v10 = vcombine.low %v225_v63, %v229_v0  ;;  %v230_v22 = vld [vmem:[#allocation5 + $0x268] sm:$0xff] }
  0xb6   :  { %972 = vmatpush1.bf16.msra.mxu0 %v3883_v34  ;;  %v237_v8 = vld [vmem:[#allocation5 + $0x2a0] sm:$0xff]  ;;  %v3926_v28 = vcombine.high %v226_v21, %v230_v22  ;;  %v234_v29 = vld [vmem:[#allocation5 + $0x288] sm:$0xff]  ;;  %v3925_v34 = vcombine.low %v226_v21, %v230_v22 }
  0xb7   :  { %973 = vmatprep.subr.bf16.mxu0 %v3892_v36  ;;  %1015 = vmatpush1.bf16.msra.mxu1 %v3885_v57  ;;  %v3932_v12 = vcombine.high %v233_v7, %v237_v8  ;;  %v241_v15 = vld [vmem:[#allocation5 + $0x2c0] sm:$0xff]  ;;  %v3931_v18 = vcombine.low %v233_v7, %v237_v8  ;;  %v238_v31 = vld [vmem:[#allocation5 + $0x2a8] sm:$0xff]  ;;  %v159_v57 = vld [vmem:[#allocation5 + $0x30] sm:$0xff] }
  0xb8   :  { %1016 = vmatprep.subr.bf16.mxu1 %v3894_v59  ;;  %v245_v16 = vld [vmem:[#allocation5 + $0x2e0] sm:$0xff]  ;;  %v3934_v36 = vcombine.high %v234_v29, %v238_v31  ;;  %v242_v37 = vld [vmem:[#allocation5 + $0x2c8] sm:$0xff]  ;;  %v149_v59 = vld [vmem:[#allocation2 + $0x10] sm:$0xff]  ;;  %v3855_v8 = vcombine.low %v155_v56, %v159_v57 }
  0xb9   :  { %v3940_v20 = vcombine.high %v241_v15, %v245_v16  ;;  %v249_v23 = vld [vmem:[#allocation5 + $0x300] sm:$0xff]  ;;  %v3939_v27 = vcombine.low %v241_v15, %v245_v16  ;;  %v246_v39 = vld [vmem:[#allocation5 + $0x2e8] sm:$0xff]  ;;  %v156_v16 = vld [vmem:[#allocation5 + $0x18] sm:$0xff] }
  0xba   :  { %974 = vmatpush1.bf16.msra.mxu0 %v3891_v42  ;;  %v253_v25 = vld [vmem:[#allocation5 + $0x320] sm:$0xff]  ;;  %v3933_v42 = vcombine.low %v234_v29, %v238_v31  ;;  %v250_v45 = vld [vmem:[#allocation5 + $0x308] sm:$0xff]  ;;  %v191_v29 = vld [vmem:[#allocation5 + $0x130] sm:$0xff] }
  0xbb   :  { %975 = vmatprep.subr.bf16.mxu0 %v3900_v44  ;;  %1017 = vmatpush1.bf16.msra.mxu1 %v3893_v1  ;;  %v3948_v30 = vcombine.high %v249_v23, %v253_v25  ;;  %v257_v32 = vld [vmem:[#allocation5 + $0x340] sm:$0xff]  ;;  %v3947_v35 = vcombine.low %v249_v23, %v253_v25  ;;  %v3942_v44 = vcombine.high %v242_v37, %v246_v39  ;;  %v254_v47 = vld [vmem:[#allocation5 + $0x328] sm:$0xff]  ;;  %v164_v25 = vld [vmem:[#allocation5 + $0x58] sm:$0xff] }
  0xbc   :  { %1018 = vmatprep.subr.bf16.mxu1 %v3902_v3  ;;  %v261_v33 = vld [vmem:[#allocation5 + $0x360] sm:$0xff]  ;;  %v258_v53 = vld [vmem:[#allocation5 + $0x348] sm:$0xff]  ;;  %v3856_v1 = vcombine.high %v155_v56, %v159_v57  ;;  %v167_v3 = vld [vmem:[#allocation5 + $0x70] sm:$0xff] }
  0xbd   :  { %v3956_v38 = vcombine.high %v257_v32, %v261_v33  ;;  %v265_v40 = vld [vmem:[#allocation5 + $0x380] sm:$0xff]  ;;  %v3955_v43 = vcombine.low %v257_v32, %v261_v33  ;;  %v262_v55 = vld [vmem:[#allocation5 + $0x368] sm:$0xff]  ;;  %v172_v33 = vld [vmem:[#allocation5 + $0x98] sm:$0xff] }
  0xbe   :  { %976 = vmatpush1.bf16.msra.mxu0 %v3899_v50  ;;  %v269_v41 = vld [vmem:[#allocation5 + $0x3a0] sm:$0xff]  ;;  %v3941_v50 = vcombine.low %v242_v37, %v246_v39  ;;  %v3958_v62 = vcombine.high %v258_v53, %v262_v55  ;;  %v266_v63 = vld [vmem:[#allocation5 + $0x388] sm:$0xff]  ;;  %v3957_v5 = vcombine.low %v258_v53, %v262_v55  ;;  %v199_v37 = vld [vmem:[#allocation5 + $0x170] sm:$0xff] }
  0xbf   :  { %977 = vmatprep.subr.bf16.mxu0 %v3908_v52  ;;  %1019 = vmatpush1.bf16.msra.mxu1 %v3901_v9  ;;  %v3964_v46 = vcombine.high %v265_v40, %v269_v41  ;;  %v273_v48 = vld [vmem:[#allocation5 + $0x3c0] sm:$0xff]  ;;  %v3963_v51 = vcombine.low %v265_v40, %v269_v41  ;;  %v3950_v52 = vcombine.high %v250_v45, %v254_v47  ;;  %v270_v0 = vld [vmem:[#allocation5 + $0x3a8] sm:$0xff]  ;;  %v203_v40 = vld [vmem:[#allocation5 + $0x190] sm:$0xff] }
  0xc0   :  { %1020 = vmatprep.subr.bf16.mxu1 %v3910_v11  ;;  %v277_v49 = vld [vmem:[#allocation5 + $0x3e0] sm:$0xff]  ;;  %v3966_v6 = vcombine.high %v266_v63, %v270_v0  ;;  %v274_v7 = vld [vmem:[#allocation5 + $0x3c8] sm:$0xff]  ;;  %v171_v11 = vld [vmem:[#allocation5 + $0x90] sm:$0xff]  ;;  %v3965_v13 = vcombine.low %v266_v63, %v270_v0 }
  0xc1   :  { %v3972_v54 = vcombine.high %v273_v48, %v277_v49  ;;  %v3971_v61 = vcombine.low %v273_v48, %v277_v49  ;;  %v278_v9 = vld [vmem:[#allocation5 + $0x3e8] sm:$0xff]  ;;  %v207_v41 = vld [vmem:[#allocation5 + $0x1b0] sm:$0xff]  ;;  %v192_v48 = vld [vmem:[#allocation5 + $0x138] sm:$0xff] }
  0xc2   :  { %978 = vmatpush1.bf16.msra.mxu0 %v3907_v58  ;;  %v147_v58 = vld [vmem:[#allocation2] sm:$0xff]  ;;  %v3974_v14 = vcombine.high %v274_v7, %v278_v9  ;;  %v3973_v21 = vcombine.low %v274_v7, %v278_v9  ;;  %v200_v55 = vld [vmem:[#allocation5 + $0x178] sm:$0xff]  ;;  %v3903_v56 = vcombine.low %v203_v40, %v207_v41  ;;  %v219_v57 = vld [vmem:[#allocation5 + $0x210] sm:$0xff] }
  0xc3   :  { %979 = vmatprep.subr.bf16.mxu0 %v3916_v60  ;;  %1021 = vmatpush1.bf16.msra.mxu1 %v3909_v17  ;;  %v3949_v60 = vcombine.low %v250_v45, %v254_v47  ;;  %v184_v45 = vld [vmem:[#allocation5 + $0xf8] sm:$0xff] }
  0xc4   :  { %1022 = vmatprep.subr.bf16.mxu1 %v3918_v19  ;;  %v179_v19 = vld [vmem:[#allocation5 + $0xd0] sm:$0xff]  ;;  %v188_v47 = vld [vmem:[#allocation5 + $0x118] sm:$0xff] }
  0xc5   :  { %v208_v63 = vld [vmem:[#allocation5 + $0x1b8] sm:$0xff] }
  0xc6   :  { %980 = vmatpush1.bf16.msra.mxu0 %v3915_v2  ;;  %v163_v2 = vld [vmem:[#allocation5 + $0x50] sm:$0xff]  ;;  %v212_v7 = vld [vmem:[#allocation5 + $0x1d8] sm:$0xff] }
  0xc7   :  { %981 = vmatprep.subr.bf16.mxu0 %v3924_v4  ;;  %1023 = vmatpush1.bf16.msra.mxu1 %v3917_v26  ;;  %v5335_v4 = vpack.c.bf16 %v149_v59, %v147_v58  ;;  %v3863_v15 = vcombine.low %v163_v2, %v167_v3  ;;  %v223_v58 = vld [vmem:[#allocation5 + $0x230] sm:$0xff]  ;;  %v3890_v59 = vcombine.high %v188_v47, %v192_v48 }
  0xc8   :  { %1024 = vmatprep.subr.bf16.mxu1 %v3926_v28  ;;  %v187_v28 = vld [vmem:[#allocation5 + $0x110] sm:$0xff]  ;;  %v3919_v9 = vcombine.low %v219_v57, %v223_v58 }
  0xc9   :  { %v3887_v39 = vcombine.low %v187_v28, %v191_v29 }
  0xca   :  { %982 = vmatpush1.bf16.msra.mxu0 %v3923_v10  ;;  %v3864_v10 = vcombine.high %v163_v2, %v167_v3  ;;  %v231_v2 = vld [vmem:[#allocation5 + $0x270] sm:$0xff] }
  0xcb   :  { %983 = vmatprep.subr.bf16.mxu0 %v3932_v12  ;;  %1025 = vmatpush1.bf16.msra.mxu1 %v3925_v34  ;;  %v175_v12 = vld [vmem:[#allocation5 + $0xb0] sm:$0xff]  ;;  %v3888_v34 = vcombine.high %v187_v28, %v191_v29 }
  0xcc   :  { %1026 = vmatprep.subr.bf16.mxu1 %v3934_v36  ;;  %v3872_v17 = vcombine.high %v171_v11, %v175_v12  ;;  %v3871_v22 = vcombine.low %v171_v11, %v175_v12  ;;  %v195_v36 = vld [vmem:[#allocation5 + $0x150] sm:$0xff] }
  0xcd   :  { %v3895_v49 = vcombine.low %v195_v36, %v199_v37  ;;  %v239_v11 = vld [vmem:[#allocation5 + $0x2b0] sm:$0xff] }
  0xce   :  { %984 = vmatpush1.bf16.msra.mxu0 %v3931_v18  ;;  %v160_v18 = vld [vmem:[#allocation5 + $0x38] sm:$0xff]  ;;  %v255_v28 = vld [vmem:[#allocation5 + $0x330] sm:$0xff] }
  0xcf   :  { %985 = vmatprep.subr.bf16.mxu0 %v3940_v20  ;;  %1027 = vmatpush1.bf16.msra.mxu1 %v3933_v42  ;;  %v183_v20 = vld [vmem:[#allocation5 + $0xf0] sm:$0xff]  ;;  %v3858_v23 = vcombine.high %v156_v16, %v160_v18 }
  0xd0   :  { %1028 = vmatprep.subr.bf16.mxu1 %v3942_v44  ;;  %v3880_v26 = vcombine.high %v179_v19, %v183_v20  ;;  %v3879_v31 = vcombine.low %v179_v19, %v183_v20  ;;  %v180_v44 = vld [vmem:[#allocation5 + $0xd8] sm:$0xff]  ;;  %v247_v19 = vld [vmem:[#allocation5 + $0x2f0] sm:$0xff] }
  0xd1   :  { %v3881_v53 = vcombine.low %v180_v44, %v184_v45 }
  0xd2   :  { %986 = vmatpush1.bf16.msra.mxu0 %v3939_v27  ;;  %v168_v27 = vld [vmem:[#allocation5 + $0x78] sm:$0xff] }
  0xd3   :  { %987 = vmatprep.subr.bf16.mxu0 %v3948_v30  ;;  %1029 = vmatpush1.bf16.msra.mxu1 %v3941_v50  ;;  %v3857_v30 = vcombine.low %v156_v16, %v160_v18  ;;  %v3866_v32 = vcombine.high %v164_v25, %v168_v27  ;;  %v211_v50 = vld [vmem:[#allocation5 + $0x1d0] sm:$0xff]  ;;  %v224_v16 = vld [vmem:[#allocation5 + $0x238] sm:$0xff] }
  0xd4   :  { %1030 = vmatprep.subr.bf16.mxu1 %v3950_v52  ;;  %v3904_v52 = vcombine.high %v203_v40, %v207_v41  ;;  %v243_v18 = vld [vmem:[#allocation5 + $0x2d0] sm:$0xff]  ;;  %v244_v40 = vld [vmem:[#allocation5 + $0x2d8] sm:$0xff] }
  0xd5   :  { %v248_v41 = vld [vmem:[#allocation5 + $0x2f8] sm:$0xff] }
  0xd6   :  { %988 = vmatpush1.bf16.msra.mxu0 %v3947_v35  ;;  %v176_v35 = vld [vmem:[#allocation5 + $0xb8] sm:$0xff] }
  0xd7   :  { %989 = vmatprep.subr.bf16.mxu0 %v3956_v38  ;;  %1031 = vmatpush1.bf16.msra.mxu1 %v3949_v60  ;;  %v3865_v38 = vcombine.low %v164_v25, %v168_v27  ;;  %v3874_v42 = vcombine.high %v172_v33, %v176_v35  ;;  %v232_v25 = vld [vmem:[#allocation5 + $0x278] sm:$0xff]  ;;  %v251_v27 = vld [vmem:[#allocation5 + $0x310] sm:$0xff] }
  0xd8   :  { %1032 = vmatprep.subr.bf16.mxu1 %v3958_v62  ;;  %v204_v62 = vld [vmem:[#allocation5 + $0x198] sm:$0xff] }
  0xd9   :  { %v3906_v12 = vcombine.high %v204_v62, %v208_v63 }
  0xda   :  { %990 = vmatpush1.bf16.msra.mxu0 %v3955_v43  ;;  %v3896_v43 = vcombine.high %v195_v36, %v199_v37  ;;  %v263_v36 = vld [vmem:[#allocation5 + $0x370] sm:$0xff] }
  0xdb   :  { %991 = vmatprep.subr.bf16.mxu0 %v3964_v46  ;;  %1033 = vmatpush1.bf16.msra.mxu1 %v3957_v5  ;;  %v3873_v46 = vcombine.low %v172_v33, %v176_v35  ;;  %v3920_v5 = vcombine.high %v219_v57, %v223_v58  ;;  %v240_v33 = vld [vmem:[#allocation5 + $0x2b8] sm:$0xff]  ;;  %v259_v35 = vld [vmem:[#allocation5 + $0x350] sm:$0xff] }
  0xdc   :  { %1034 = vmatprep.subr.bf16.mxu1 %v3966_v6 }
  0xde   :  { %992 = vmatpush1.bf16.msra.mxu0 %v3963_v51  ;;  %v215_v51 = vld [vmem:[#allocation5 + $0x1f0] sm:$0xff] }
  0xdf   :  { %993 = vmatprep.subr.bf16.mxu0 %v3972_v54  ;;  %1035 = vmatpush1.bf16.msra.mxu1 %v3965_v13  ;;  %v196_v54 = vld [vmem:[#allocation5 + $0x158] sm:$0xff]  ;;  %v3912_v60 = vcombine.high %v211_v50, %v215_v51  ;;  %v3911_v0 = vcombine.low %v211_v50, %v215_v51  ;;  %v3959_v50 = vcombine.low %v259_v35, %v263_v36  ;;  %v275_v51 = vld [vmem:[#allocation5 + $0x3d0] sm:$0xff] }
  0xe0   :  { %1036 = vmatprep.subr.bf16.mxu1 %v3974_v14  ;;  %v3898_v3 = vcombine.high %v196_v54, %v200_v55  ;;  %v3897_v6 = vcombine.low %v196_v54, %v200_v55  ;;  %v3905_v14 = vcombine.low %v204_v62, %v208_v63  ;;  %v3945_v54 = vcombine.low %v244_v40, %v248_v41  ;;  %v260_v55 = vld [vmem:[#allocation5 + $0x358] sm:$0xff] }
  0xe1   :  { %v272_v62 = vld [vmem:[#allocation5 + $0x3b8] sm:$0xff] }
  0xe2   :  { %994 = vmatpush1.bf16.msra.mxu0 %v3971_v61  ;;  %v3889_v61 = vcombine.low %v188_v47, %v192_v48  ;;  %v252_v48 = vld [vmem:[#allocation5 + $0x318] sm:$0xff] }
  0xe3   :  { %1049 = vmatprep.subr.bf16.mxu0 %v3856_v1  ;;  %1037 = vmatpush1.bf16.msra.mxu1 %v3973_v21  ;;  %v227_v1 = vld [vmem:[#allocation5 + $0x250] sm:$0xff]  ;;  %v4389_v63 = vld [vmem:[#allocation8 + $0x4] ss:$16 sps:$4 sm:$0xff]  }
  0xe4   :  { %1092 = vmatprep.subr.bf16.mxu1 %v3858_v23  ;;  %v3928_v13 = vcombine.high %v227_v1, %v231_v2  ;;  %v228_v23 = vld [vmem:[#allocation5 + $0x258] sm:$0xff] }
  0xe5   :  { %996 = vmatmul.mubr.bf16.vlgmr.msra.gmra.mrb[0].mxu0 %v5335_v4  ;;  %v3930_v37 = vcombine.high %v228_v23, %v232_v25 }
  0xe6   :  { %1050 = vmatpush1.bf16.msra.mxu0 %v3855_v8  ;;  %1081 = vmatprep.mubr.bf16.mxu0 %v5331_v24  ;;  %v216_v8 = vld [vmem:[#allocation5 + $0x1f8] sm:$0xff] }
  0xe7   :  { %1051 = vmatprep.subr.bf16.mxu0 %v3864_v10  ;;  %1039 = vmatmul.mubr.bf16.vlgmr.msra.gmra.mrb[0].mxu1 %v5335_v4  ;;  %v235_v10 = vld [vmem:[#allocation5 + $0x290] sm:$0xff]  ;;  %v3914_v20 = vcombine.high %v212_v7, %v216_v8 }
  0xe8   :  { %1093 = vmatpush1.bf16.msra.mxu1 %v3857_v30  ;;  %1124 = vmatprep.mubr.bf16.mxu1 %v5331_v24  ;;  %v3882_v24 = vcombine.high %v180_v44, %v184_v45  ;;  %v3936_v21 = vcombine.high %v235_v10, %v239_v11  ;;  %v3944_v30 = vcombine.high %v243_v18, %v247_v19  ;;  %v271_v44 = vld [vmem:[#allocation5 + $0x3b0] sm:$0xff] }
  0xe9   :  { %1094 = vmatprep.subr.bf16.mxu1 %v3866_v32  ;;  %v236_v32 = vld [vmem:[#allocation5 + $0x298] sm:$0xff] }
  0xea   :  { %1052 = vmatpush1.bf16.msra.mxu0 %v3863_v15  ;;  %v220_v15 = vld [vmem:[#allocation5 + $0x218] sm:$0xff]  ;;  %v3938_v45 = vcombine.high %v236_v32, %v240_v33  ;;  %v3937_v47 = vcombine.low %v236_v32, %v240_v33  ;;  %v4414_v33 = vld [vmem:[#allocation8 + $0x88] ss:$16 sps:$4 sm:$0xff]  }
  0xeb   :  { %1053 = vmatprep.subr.bf16.mxu0 %v3872_v17  ;;  %v3927_v17 = vcombine.low %v227_v1, %v231_v2  ;;  %v3922_v29 = vcombine.high %v220_v15, %v224_v16  ;;  %v4387_v2 = vld [vmem:[#allocation8] ss:$16 sps:$4 sm:$0xff]  }
  0xec   :  { %1095 = vmatpush1.bf16.msra.mxu1 %v3865_v38  ;;  %v3952_v38 = vcombine.high %v251_v27, %v255_v28  ;;  %v4423_v32 = vld [vmem:[#allocation8 + $0xc0] ss:$16 sps:$4 sm:$0xff]  }
  0xed   :  { %1096 = vmatprep.subr.bf16.mxu1 %v3874_v42  ;;  %v3951_v42 = vcombine.low %v251_v27, %v255_v28  ;;  %v4410_v27 = vld [vmem:[#allocation8 + $0x6c] ss:$16 sps:$4 sm:$0xff]   ;;  %v4417_v28 = vld [vmem:[#allocation8 + $0xa0] ss:$16 sps:$4 sm:$0xff]  }
  0xee   :  { %1054 = vmatpush1.bf16.msra.mxu0 %v3871_v22  ;;  %v3913_v22 = vcombine.low %v212_v7, %v216_v8  ;;  %v4395_v7 = vld [vmem:[#allocation8 + $0x24] ss:$16 sps:$4 sm:$0xff]  }
  0xef   :  { %1055 = vmatprep.subr.bf16.mxu0 %v3880_v26  ;;  %v3935_v26 = vcombine.low %v235_v10, %v239_v11  ;;  %v4401_v11 = vld [vmem:[#allocation8 + $0x44] ss:$16 sps:$4 sm:$0xff]  }
  0xf0   :  { %1097 = vmatpush1.bf16.msra.mxu1 %v3873_v46  ;;  %v3960_v46 = vcombine.high %v259_v35, %v263_v36  ;;  %v4429_v35 = vld [vmem:[#allocation8 + $0xe0] ss:$16 sps:$4 sm:$0xff]   ;;  %v4437_v36 = vld [vmem:[#allocation8 + $0x104] ss:$16 sps:$4 sm:$0xff]  }
  0xf1   :  { %1098 = vmatprep.subr.bf16.mxu1 %v3882_v24  ;;  %v279_v24 = vld [vmem:[#allocation5 + $0x3f0] sm:$0xff] }
  0xf2   :  { %1056 = vmatpush1.bf16.msra.mxu0 %v3879_v31  ;;  %v3921_v31 = vcombine.low %v220_v15, %v224_v16  ;;  %v4407_v16 = vld [vmem:[#allocation8 + $0x64] ss:$16 sps:$4 sm:$0xff]  }
  0xf3   :  { %1057 = vmatprep.subr.bf16.mxu0 %v3888_v34  ;;  %v3943_v34 = vcombine.low %v243_v18, %v247_v19  ;;  %v4398_v18 = vld [vmem:[#allocation8 + $0x2c] ss:$16 sps:$4 sm:$0xff]   ;;  %v4405_v19 = vld [vmem:[#allocation8 + $0x60] ss:$16 sps:$4 sm:$0xff]  }
  0xf4   :  { %1099 = vmatpush1.bf16.msra.mxu1 %v3881_v53 }
  0xf5   :  { %1100 = vmatprep.subr.bf16.mxu1 %v3890_v59  ;;  %v3976_v59 = vcombine.high %v275_v51, %v279_v24 }
  0xf6   :  { %1058 = vmatpush1.bf16.msra.mxu0 %v3887_v39  ;;  %v3929_v39 = vcombine.low %v228_v23, %v232_v25  ;;  %v4411_v23 = vld [vmem:[#allocation8 + $0x80] ss:$16 sps:$4 sm:$0xff]   ;;  %v4419_v25 = vld [vmem:[#allocation8 + $0xa4] ss:$16 sps:$4 sm:$0xff]  }
  0xf7   :  { %1059 = vmatprep.subr.bf16.mxu0 %v3896_v43  ;;  %v267_v43 = vld [vmem:[#allocation5 + $0x390] sm:$0xff] }
  0xf8   :  { %1101 = vmatpush1.bf16.msra.mxu1 %v3889_v61  ;;  %v3968_v53 = vcombine.high %v267_v43, %v271_v44  ;;  %v3967_v57 = vcombine.low %v267_v43, %v271_v44  ;;  %v268_v61 = vld [vmem:[#allocation5 + $0x398] sm:$0xff] }
  0xf9   :  { %1102 = vmatprep.subr.bf16.mxu1 %v3898_v3  ;;  %v3970_v8 = vcombine.high %v268_v61, %v272_v62  ;;  %v3969_v10 = vcombine.low %v268_v61, %v272_v62  ;;  %v4441_v43 = vld [vmem:[#allocation8 + $0x120] ss:$16 sps:$4 sm:$0xff]   ;;  %v4449_v44 = vld [vmem:[#allocation8 + $0x144] ss:$16 sps:$4 sm:$0xff]   ;;  %v4464_v61 = vld [vmem:[#allocation8 + $0x18c] ss:$16 sps:$4 sm:$0xff]  }
  0xfa   :  { %1060 = vmatpush1.bf16.msra.mxu0 %v3895_v49  ;;  %v256_v49 = vld [vmem:[#allocation5 + $0x338] sm:$0xff] }
  0xfb   :  { %1061 = vmatprep.subr.bf16.mxu0 %v3904_v52  ;;  %v3946_v52 = vcombine.high %v244_v40, %v248_v41  ;;  %v3954_v58 = vcombine.high %v252_v48, %v256_v49  ;;  %v4443_v40 = vld [vmem:[#allocation8 + $0x124] ss:$16 sps:$4 sm:$0xff]   ;;  %v4426_v41 = vld [vmem:[#allocation8 + $0xc8] ss:$16 sps:$4 sm:$0xff]   ;;  %v4471_v62 = vld [vmem:[#allocation8 + $0x1c0] ss:$16 sps:$4 sm:$0xff]  }
  0xfc   :  { %1103 = vmatpush1.bf16.msra.mxu1 %v3897_v6  ;;  %v280_v6 = vld [vmem:[#allocation5 + $0x3f8] sm:$0xff] }
  0xfd   :  { %1104 = vmatprep.subr.bf16.mxu1 %v3906_v12 }
  0xfe   :  { %1062 = vmatpush1.bf16.msra.mxu0 %v3903_v56  ;;  %v264_v56 = vld [vmem:[#allocation5 + $0x378] sm:$0xff] }
  0xff   :  { %1063 = vmatprep.subr.bf16.mxu0 %v3912_v60  ;;  %v3953_v60 = vcombine.low %v252_v48, %v256_v49  ;;  %v3962_v1 = vcombine.high %v260_v55, %v264_v56  ;;  %v3961_v3 = vcombine.low %v260_v55, %v264_v56  ;;  %v4455_v48 = vld [vmem:[#allocation8 + $0x164] ss:$16 sps:$4 sm:$0xff]   ;;  %v4438_v49 = vld [vmem:[#allocation8 + $0x108] ss:$16 sps:$4 sm:$0xff]  }
 0x100   :  { %1105 = vmatpush1.bf16.msra.mxu1 %v3905_v14  ;;  %v4399_v14 = vld [vmem:[#allocation8 + $0x40] ss:$16 sps:$4 sm:$0xff]   ;;  %v4467_v55 = vld [vmem:[#allocation8 + $0x1a4] ss:$16 sps:$4 sm:$0xff]   ;;  %v4450_v56 = vld [vmem:[#allocation8 + $0x148] ss:$16 sps:$4 sm:$0xff]  }
 0x101   :  { %1106 = vmatprep.subr.bf16.mxu1 %v3914_v20  ;;  %v4413_v20 = vld [vmem:[#allocation8 + $0x84] ss:$16 sps:$4 sm:$0xff]  }
 0x102   :  { %1064 = vmatpush1.bf16.msra.mxu0 %v3911_v0  ;;  %v3975_v0 = vcombine.low %v275_v51, %v279_v24  ;;  %v4453_v51 = vld [vmem:[#allocation8 + $0x160] ss:$16 sps:$4 sm:$0xff]   ;;  %v4461_v24 = vld [vmem:[#allocation8 + $0x184] ss:$16 sps:$4 sm:$0xff]  }
 0x103   :  { %1065 = vmatprep.subr.bf16.mxu0 %v3920_v5  ;;  %v276_v5 = vld [vmem:[#allocation5 + $0x3d8] sm:$0xff] }
 0x104   :  { %1107 = vmatpush1.bf16.msra.mxu1 %v3913_v22  ;;  %v3978_v12 = vcombine.high %v276_v5, %v280_v6  ;;  %v3977_v15 = vcombine.low %v276_v5, %v280_v6  ;;  %v4404_v22 = vld [vmem:[#allocation8 + $0x4c] ss:$16 sps:$4 sm:$0xff]   ;;  %v4468_v5 = vld [vmem:[#allocation8 + $0x1a8] ss:$16 sps:$4 sm:$0xff]  }
 0x105   :  { %1108 = vmatprep.subr.bf16.mxu1 %v3922_v29  ;;  %v4425_v29 = vld [vmem:[#allocation8 + $0xc4] ss:$16 sps:$4 sm:$0xff]   ;;  %v4476_v6 = vld [vmem:[#allocation8 + $0x1cc] ss:$16 sps:$4 sm:$0xff]  }
 0x106   :  { %1066 = vmatpush1.bf16.msra.mxu0 %v3919_v9  ;;  %v4393_v9 = vld [vmem:[#allocation8 + $0x20] ss:$16 sps:$4 sm:$0xff]  }
 0x107   :  { %1067 = vmatprep.subr.bf16.mxu0 %v3928_v13  ;;  %v4392_v13 = vld [vmem:[#allocation8 + $0xc] ss:$16 sps:$4 sm:$0xff]  }
 0x108   :  { %1109 = vmatpush1.bf16.msra.mxu1 %v3921_v31  ;;  %v4416_v31 = vld [vmem:[#allocation8 + $0x8c] ss:$16 sps:$4 sm:$0xff]  }
 0x109   :  { %1110 = vmatprep.subr.bf16.mxu1 %v3930_v37  ;;  %v4420_v37 = vld [vmem:[#allocation8 + $0xa8] ss:$16 sps:$4 sm:$0xff]  }
 0x10a   :  { %1068 = vmatpush1.bf16.msra.mxu0 %v3927_v17  ;;  %v4390_v17 = vld [vmem:[#allocation8 + $0x8] ss:$16 sps:$4 sm:$0xff]  }
 0x10b   :  { %1069 = vmatprep.subr.bf16.mxu0 %v3936_v21  ;;  %v4396_v21 = vld [vmem:[#allocation8 + $0x28] ss:$16 sps:$4 sm:$0xff]  }
 0x10c   :  { %1111 = vmatpush1.bf16.msra.mxu1 %v3929_v39  ;;  %v4435_v39 = vld [vmem:[#allocation8 + $0x100] ss:$16 sps:$4 sm:$0xff]  }
 0x10d   :  { %1112 = vmatprep.subr.bf16.mxu1 %v3938_v45  ;;  %v4432_v45 = vld [vmem:[#allocation8 + $0xe8] ss:$16 sps:$4 sm:$0xff]  }
 0x10e   :  { %1070 = vmatpush1.bf16.msra.mxu0 %v3935_v26  ;;  %v4402_v26 = vld [vmem:[#allocation8 + $0x48] ss:$16 sps:$4 sm:$0xff]  }
 0x10f   :  { %1071 = vmatprep.subr.bf16.mxu0 %v3944_v30  ;;  %v4408_v30 = vld [vmem:[#allocation8 + $0x68] ss:$16 sps:$4 sm:$0xff]  }
 0x110   :  { %1113 = vmatpush1.bf16.msra.mxu1 %v3937_v47  ;;  %v4447_v47 = vld [vmem:[#allocation8 + $0x140] ss:$16 sps:$4 sm:$0xff]  }
 0x111   :  { %1114 = vmatprep.subr.bf16.mxu1 %v3946_v52  ;;  %v4444_v52 = vld [vmem:[#allocation8 + $0x128] ss:$16 sps:$4 sm:$0xff]  }
 0x112   :  { %1072 = vmatpush1.bf16.msra.mxu0 %v3943_v34  ;;  %v4422_v34 = vld [vmem:[#allocation8 + $0xac] ss:$16 sps:$4 sm:$0xff]  }
 0x113   :  { %1073 = vmatprep.subr.bf16.mxu0 %v3952_v38  ;;  %v4428_v38 = vld [vmem:[#allocation8 + $0xcc] ss:$16 sps:$4 sm:$0xff]  }
 0x114   :  { %1115 = vmatpush1.bf16.msra.mxu1 %v3945_v54  ;;  %v4459_v54 = vld [vmem:[#allocation8 + $0x180] ss:$16 sps:$4 sm:$0xff]  }
 0x115   :  { %1116 = vmatprep.subr.bf16.mxu1 %v3954_v58  ;;  %v4465_v58 = vld [vmem:[#allocation8 + $0x1a0] ss:$16 sps:$4 sm:$0xff]  }
 0x116   :  { %1074 = vmatpush1.bf16.msra.mxu0 %v3951_v42  ;;  %v4434_v42 = vld [vmem:[#allocation8 + $0xec] ss:$16 sps:$4 sm:$0xff]  }
 0x117   :  { %1075 = vmatprep.subr.bf16.mxu0 %v3960_v46  ;;  %v4440_v46 = vld [vmem:[#allocation8 + $0x10c] ss:$16 sps:$4 sm:$0xff]  }
 0x118   :  { %1117 = vmatpush1.bf16.msra.mxu1 %v3953_v60  ;;  %v4456_v60 = vld [vmem:[#allocation8 + $0x168] ss:$16 sps:$4 sm:$0xff]  }
 0x119   :  { %1118 = vmatprep.subr.bf16.mxu1 %v3962_v1  ;;  %v4470_v1 = vld [vmem:[#allocation8 + $0x1ac] ss:$16 sps:$4 sm:$0xff]  }
 0x11a   :  { %1076 = vmatpush1.bf16.msra.mxu0 %v3959_v50  ;;  %v4446_v50 = vld [vmem:[#allocation8 + $0x12c] ss:$16 sps:$4 sm:$0xff]  }
 0x11b   :  { %1077 = vmatprep.subr.bf16.mxu0 %v3968_v53  ;;  %v4452_v53 = vld [vmem:[#allocation8 + $0x14c] ss:$16 sps:$4 sm:$0xff]  }
 0x11c   :  { %1119 = vmatpush1.bf16.msra.mxu1 %v3961_v3  ;;  %v4485_v3 = vld [vmem:[#allocation8 + $0x204] ss:$16 sps:$4 sm:$0xff]  }
 0x11d   :  { %1120 = vmatprep.subr.bf16.mxu1 %v3970_v8  ;;  %v4482_v8 = vld [vmem:[#allocation8 + $0x1ec] ss:$16 sps:$4 sm:$0xff]  }
 0x11e   :  { %1078 = vmatpush1.bf16.msra.mxu0 %v3967_v57  ;;  %v4458_v57 = vld [vmem:[#allocation8 + $0x16c] ss:$16 sps:$4 sm:$0xff]  }
 0x11f   :  { %1079 = vmatprep.subr.bf16.mxu0 %v3976_v59  ;;  %v4473_v59 = vld [vmem:[#allocation8 + $0x1c4] ss:$16 sps:$4 sm:$0xff]  }
 0x120   :  { %1121 = vmatpush1.bf16.msra.mxu1 %v3969_v10  ;;  %v4488_v10 = vld [vmem:[#allocation8 + $0x20c] ss:$16 sps:$4 sm:$0xff]  }
 0x121   :  { %1122 = vmatprep.subr.bf16.mxu1 %v3978_v12 }
 0x122   :  { %1080 = vmatpush1.bf16.msra.mxu0 %v3975_v0  ;;  %v4462_v0 = vld [vmem:[#allocation8 + $0x188] ss:$16 sps:$4 sm:$0xff]  }
 0x123   :  { %2717 = vmatprep.subr.bf16.mxu0 %v4389_v63  ;;  %v4479_v63 = vld [vmem:[#allocation8 + $0x1e4] ss:$16 sps:$4 sm:$0xff]  }
 0x124   :  { %1123 = vmatpush1.bf16.msra.mxu1 %v3977_v15 }
 0x125   :  { %1082 = vmatmul.mubr.bf16.vlgmr.msra.gmra.mrb[4].mxu0 %v5335_v4  ;;  %2889 = vmatprep.subr.bf16.mxu1 %v4392_v13 }
 0x126   :  { %2718 = vmatpush1.bf16.msra.mxu0 %v4387_v2  ;;  %v4477_v2 = vld [vmem:[#allocation8 + $0x1e0] ss:$16 sps:$4 sm:$0xff]  }
 0x127   :  { %2719 = vmatprep.subr.bf16.mxu0 %v4395_v7  ;;  %1125 = vmatmul.mubr.bf16.vlgmr.msra.gmra.mrb[4].mxu1 %v5335_v4  ;;  %v4431_v4 = vld [vmem:[#allocation8 + $0xe4] ss:$16 sps:$4 sm:$0xff]   ;;  %v4474_v7 = vld [vmem:[#allocation8 + $0x1c8] ss:$16 sps:$4 sm:$0xff]  }
 0x128   :  { %2890 = vmatpush1.bf16.msra.mxu1 %v4390_v17 }
 0x129   :  { %2891 = vmatprep.subr.bf16.mxu1 %v4398_v18 }
 0x12a   :  { %2720 = vmatpush1.bf16.msra.mxu0 %v4393_v9  ;;  %v4480_v9 = vld [vmem:[#allocation8 + $0x1e8] ss:$16 sps:$4 sm:$0xff]  }
 0x12b   :  { %2721 = vmatprep.subr.bf16.mxu0 %v4401_v11  ;;  %v283_v11 = vlaneseq }
 0x12c   :  { %2892 = vmatpush1.bf16.msra.mxu1 %v4396_v21 }
 0x12d   :  { %2893 = vmatprep.subr.bf16.mxu1 %v4404_v22  ;;  %v5343_v12 = vshrl.u32 %v283_v11, 7  ;;  %v4522_v11 = vld [vmem:[#allocation8 + $0x2c8] ss:$16 sps:$4 sm:$0xff]  }
 0x12e   :  { %2722 = vmatpush1.bf16.msra.mxu0 %v4399_v14  ;;  %v5348_v14 = vld [vmem:[#allocation7] sm:$0xff] }
 0x12f   :  { %2723 = vmatprep.subr.bf16.mxu0 %v4407_v16  ;;  %v5346_v13 = vsub.s32 0, %v5343_v12  ;;  %v5351_v15 = vsub.s32 1, %v5343_v12 }
 0x130   :  { %2894 = vmatpush1.bf16.msra.mxu1 %v4402_v26 }
 0x131   :  { %2895 = vmatprep.subr.bf16.mxu1 %v4410_v27  ;;  %v286_v16 = vrot.slane %v5348_v14, %v5346_v13  ;;  %v290_v17 = vrot.slane %v5348_v14, %v5351_v15  ;;  %v293_v27 = vsub.s32 2, %v5343_v12 }
 0x132   :  { %2724 = vmatpush1.bf16.msra.mxu0 %v4405_v19 }
 0x133   :  { %2725 = vmatprep.subr.bf16.mxu0 %v4413_v20 }
 0x134   :  { %2896 = vmatpush1.bf16.msra.mxu1 %v4408_v30  ;;  %v297_v30 = vsub.s32 3, %v5343_v12 }
 0x135   :  { %2897 = vmatprep.subr.bf16.mxu1 %v4416_v31 }
 0x136   :  { %2726 = vmatpush1.bf16.msra.mxu0 %v4411_v23 }
 0x137   :  { %2727 = vmatprep.subr.bf16.mxu0 %v4419_v25 }
 0x138   :  { %2898 = vmatpush1.bf16.msra.mxu1 %v4414_v33 }
 0x139   :  { %2899 = vmatprep.subr.bf16.mxu1 %v4422_v34  ;;  %v4483_v34 = vld [vmem:[#allocation8 + $0x200] ss:$16 sps:$4 sm:$0xff]  }
 0x13a   :  { %2728 = vmatpush1.bf16.msra.mxu0 %v4417_v28 }
 0x13b   :  { %2729 = vmatprep.subr.bf16.mxu0 %v4425_v29 }
 0x13c   :  { %2900 = vmatpush1.bf16.msra.mxu1 %v4420_v37  ;;  %v4491_v37 = vld [vmem:[#allocation8 + $0x224] ss:$16 sps:$4 sm:$0xff]  }
 0x13d   :  { %2901 = vmatprep.subr.bf16.mxu1 %v4428_v38  ;;  %v4494_v38 = vld [vmem:[#allocation8 + $0x22c] ss:$16 sps:$4 sm:$0xff]  }
 0x13e   :  { %2730 = vmatpush1.bf16.msra.mxu0 %v4423_v32 }
 0x13f   :  { %2731 = vmatprep.subr.bf16.mxu0 %v4431_v4 }
 0x140   :  { %2902 = vmatpush1.bf16.msra.mxu1 %v4426_v41  ;;  %v4489_v41 = vld [vmem:[#allocation8 + $0x220] ss:$16 sps:$4 sm:$0xff]  }
 0x141   :  { %2903 = vmatprep.subr.bf16.mxu1 %v4434_v42  ;;  %v4492_v42 = vld [vmem:[#allocation8 + $0x228] ss:$16 sps:$4 sm:$0xff]  }
 0x142   :  { %2732 = vmatpush1.bf16.msra.mxu0 %v4429_v35  ;;  %v4486_v35 = vld [vmem:[#allocation8 + $0x208] ss:$16 sps:$4 sm:$0xff]  }
 0x143   :  { %2733 = vmatprep.subr.bf16.mxu0 %v4437_v36  ;;  %v294_v36 = vrot.slane %v5348_v14, %v293_v27 }
 0x144   :  { %2904 = vmatpush1.bf16.msra.mxu1 %v4432_v45  ;;  %v4497_v45 = vld [vmem:[#allocation8 + $0x244] ss:$16 sps:$4 sm:$0xff]  }
 0x145   :  { %2905 = vmatprep.subr.bf16.mxu1 %v4440_v46  ;;  %v4500_v46 = vld [vmem:[#allocation8 + $0x24c] ss:$16 sps:$4 sm:$0xff]  }
 0x146   :  { %2734 = vmatpush1.bf16.msra.mxu0 %v4435_v39  ;;  %v298_v39 = vrot.slane %v5348_v14, %v297_v30 }
 0x147   :  { %2735 = vmatprep.subr.bf16.mxu0 %v4443_v40 }
 0x148   :  { %2906 = vmatpush1.bf16.msra.mxu1 %v4438_v49 }
 0x149   :  { %2907 = vmatprep.subr.bf16.mxu1 %v4446_v50 }
 0x14a   :  { %2736 = vmatpush1.bf16.msra.mxu0 %v4441_v43 }
 0x14b   :  { %2737 = vmatprep.subr.bf16.mxu0 %v4449_v44 }
 0x14c   :  { %2908 = vmatpush1.bf16.msra.mxu1 %v4444_v52 }
 0x14d   :  { %2909 = vmatprep.subr.bf16.mxu1 %v4452_v53  ;;  %v4495_v53 = vld [vmem:[#allocation8 + $0x240] ss:$16 sps:$4 sm:$0xff]  }
 0x14e   :  { %2738 = vmatpush1.bf16.msra.mxu0 %v4447_v47 }
 0x14f   :  { %2739 = vmatprep.subr.bf16.mxu0 %v4455_v48 }
 0x150   :  { %2910 = vmatpush1.bf16.msra.mxu1 %v4450_v56  ;;  %v4503_v56 = vld [vmem:[#allocation8 + $0x264] ss:$16 sps:$4 sm:$0xff]  }
 0x151   :  { %2911 = vmatprep.subr.bf16.mxu1 %v4458_v57  ;;  %v4506_v57 = vld [vmem:[#allocation8 + $0x26c] ss:$16 sps:$4 sm:$0xff]  }
 0x152   :  { %2740 = vmatpush1.bf16.msra.mxu0 %v4453_v51 }
 0x153   :  { %2741 = vmatprep.subr.bf16.mxu0 %v4461_v24 }
 0x154   :  { %2912 = vmatpush1.bf16.msra.mxu1 %v4456_v60 }
 0x155   :  { %2913 = vmatprep.subr.bf16.mxu1 %v4464_v61  ;;  %v4501_v61 = vld [vmem:[#allocation8 + $0x260] ss:$16 sps:$4 sm:$0xff]  }
 0x156   :  { %2742 = vmatpush1.bf16.msra.mxu0 %v4459_v54  ;;  %v4498_v54 = vld [vmem:[#allocation8 + $0x248] ss:$16 sps:$4 sm:$0xff]  }
 0x157   :  { %2743 = vmatprep.subr.bf16.mxu0 %v4467_v55 }
 0x158   :  { %2914 = vmatpush1.bf16.msra.mxu1 %v4462_v0  ;;  %v4512_v0 = vld [vmem:[#allocation8 + $0x28c] ss:$16 sps:$4 sm:$0xff]  }
 0x159   :  { %2915 = vmatprep.subr.bf16.mxu1 %v4470_v1  ;;  %v4507_v1 = vld [vmem:[#allocation8 + $0x280] ss:$16 sps:$4 sm:$0xff]  }
 0x15a   :  { %2744 = vmatpush1.bf16.msra.mxu0 %v4465_v58 }
 0x15b   :  { %2745 = vmatprep.subr.bf16.mxu0 %v4473_v59 }
 0x15c   :  { %2916 = vmatpush1.bf16.msra.mxu1 %v4468_v5  ;;  %v4518_v5 = vld [vmem:[#allocation8 + $0x2ac] ss:$16 sps:$4 sm:$0xff]  }
 0x15d   :  { %2917 = vmatprep.subr.bf16.mxu1 %v4476_v6  ;;  %v4513_v6 = vld [vmem:[#allocation8 + $0x2a0] ss:$16 sps:$4 sm:$0xff]  }
 0x15e   :  { %2746 = vmatpush1.bf16.msra.mxu0 %v4471_v62  ;;  %v4504_v62 = vld [vmem:[#allocation8 + $0x268] ss:$16 sps:$4 sm:$0xff]  }
 0x15f   :  { %2747 = vmatprep.subr.bf16.mxu0 %v4479_v63  ;;  %v4509_v63 = vld [vmem:[#allocation8 + $0x284] ss:$16 sps:$4 sm:$0xff]  }
 0x160   :  { %2918 = vmatpush1.bf16.msra.mxu1 %v4474_v7  ;;  %v4516_v7 = vld [vmem:[#allocation8 + $0x2a8] ss:$16 sps:$4 sm:$0xff]  }
 0x161   :  { %2919 = vmatprep.subr.bf16.mxu1 %v4482_v8  ;;  %v4521_v8 = vld [vmem:[#allocation8 + $0x2c4] ss:$16 sps:$4 sm:$0xff]  }
 0x162   :  { %2748 = vmatpush1.bf16.msra.mxu0 %v4477_v2  ;;  %v4510_v2 = vld [vmem:[#allocation8 + $0x288] ss:$16 sps:$4 sm:$0xff]  }
 0x163   :  { %2760 = vmatprep.subr.bf16.mxu0 %v4485_v3  ;;  %v4515_v3 = vld [vmem:[#allocation8 + $0x2a4] ss:$16 sps:$4 sm:$0xff]  }
 0x164   :  { %2920 = vmatpush1.bf16.msra.mxu1 %v4480_v9  ;;  %v4524_v9 = vld [vmem:[#allocation8 + $0x2cc] ss:$16 sps:$4 sm:$0xff]  }
 0x165   :  { %2932 = vmatprep.subr.bf16.mxu1 %v4488_v10  ;;  %v4519_v10 = vld [vmem:[#allocation8 + $0x2c0] ss:$16 sps:$4 sm:$0xff]  }
 0x1b8   :  { %v997_v18 = vpop.f32.mrb[0].mxu0 }
 0x1b9   :  { %v998_v19 = vadd.f32 %v997_v18, %v286_v16  ;;  %v999_v20 = vpop.f32.mrb[1].mxu0  ;;  %v4525_v18 = vld [vmem:[#allocation8 + $0x2e0] ss:$16 sps:$4 sm:$0xff]  }
 0x1ba   :  { %v1000_v21 = vadd.f32 %v999_v20, %v290_v17  ;;  %v1001_v22 = vpop.f32.mrb[2].mxu0  ;;  %v1040_v40 = vpop.f32.mrb[0].mxu1  ;;  %v4533_v20 = vld [vmem:[#allocation8 + $0x304] ss:$16 sps:$4 sm:$0xff]  }
 0x1bb   :  { %v1002_v23 = vadd.f32 %v1001_v22, %v286_v16  ;;  %v1003_v25 = vpop.f32.mrb[3].mxu0  ;;  %v1135_v28 = vmax.f32 %v998_v19, 0.0  ;;  %v1041_v43 = vadd.f32 %v1040_v40, %v294_v36  ;;  %v1042_v44 = vpop.f32.mrb[1].mxu1  ;;  %v4527_v16 = vld [vmem:[#allocation8 + $0x2e4] ss:$16 sps:$4 sm:$0xff]  }
 0x1bc   :  { %v1004_v26 = vadd.f32 %v1003_v25, %v290_v17  ;;  %v1136_v31 = vmax.f32 %v1000_v21, 0.0  ;;  %v1043_v47 = vadd.f32 %v1042_v44, %v298_v39  ;;  %v1044_v48 = vpop.f32.mrb[2].mxu1  ;;  %v4530_v17 = vld [vmem:[#allocation8 + $0x2ec] ss:$16 sps:$4 sm:$0xff]   ;;  %v4528_v19 = vld [vmem:[#allocation8 + $0x2e8] ss:$16 sps:$4 sm:$0xff]  }
 0x1bd   :  { %v1143_v29 = vmax.f32 %v1002_v23, 0.0  ;;  %v1137_v49 = vmax.f32 %v1041_v43, 0.0  ;;  %v1045_v50 = vadd.f32 %v1044_v48, %v294_v36  ;;  %v1046_v51 = vpop.f32.mrb[3].mxu1  ;;  %v4536_v21 = vld [vmem:[#allocation8 + $0x30c] ss:$16 sps:$4 sm:$0xff]   ;;  %v301_v44 = vsub.s32 4, %v5343_v12 }
 0x1be   :  { %v1144_v32 = vmax.f32 %v1004_v26, 0.0  ;;  %v1138_v24 = vmax.f32 %v1043_v47, 0.0  ;;  %v1047_v52 = vadd.f32 %v1046_v51, %v298_v39  ;;  %v4531_v22 = vld [vmem:[#allocation8 + $0x300] ss:$16 sps:$4 sm:$0xff]   ;;  %v4534_v23 = vld [vmem:[#allocation8 + $0x308] ss:$16 sps:$4 sm:$0xff]  }
 0x1bf   :  { %v1151_v4 = vpack.c.bf16 %v1143_v29, %v1135_v28  ;;  %v1145_v55 = vmax.f32 %v1045_v50, 0.0  ;;  %v4539_v25 = vld [vmem:[#allocation8 + $0x324] ss:$16 sps:$4 sm:$0xff]   ;;  %v4542_v26 = vld [vmem:[#allocation8 + $0x32c] ss:$16 sps:$4 sm:$0xff]   ;;  %v302_v50 = vrot.slane %v5348_v14, %v301_v44 }
 0x1c0   :  { %v1152_v33 = vpack.c.bf16 %v1144_v32, %v1136_v31  ;;  %v1146_v58 = vmax.f32 %v1047_v52, 0.0  ;;  %v4537_v28 = vld [vmem:[#allocation8 + $0x320] ss:$16 sps:$4 sm:$0xff]   ;;  %v4540_v29 = vld [vmem:[#allocation8 + $0x328] ss:$16 sps:$4 sm:$0xff]  }
 0x1c1   :  { %v5365_v59 = vpack.c.bf16 %v1145_v55, %v1137_v49  ;;  %v4545_v31 = vld [vmem:[#allocation8 + $0x344] ss:$16 sps:$4 sm:$0xff]   ;;  %v4548_v32 = vld [vmem:[#allocation8 + $0x34c] ss:$16 sps:$4 sm:$0xff]   ;;  %v4549_v36 = vld [vmem:[#allocation8 + $0x360] ss:$16 sps:$4 sm:$0xff]  }
 0x1c2   :  { %2749 = vmatprep.mubr.bf16.mxu0 %v1152_v33  ;;  %2921 = vmatprep.mubr.bf16.mxu1 %v1152_v33  ;;  %v1154_v60 = vpack.c.bf16 %v1146_v58, %v1138_v24  ;;  %v4546_v33 = vld [vmem:[#allocation8 + $0x348] ss:$16 sps:$4 sm:$0xff]   ;;  %v4560_v39 = vld [vmem:[#allocation8 + $0x38c] ss:$16 sps:$4 sm:$0xff]   ;;  %v4555_v40 = vld [vmem:[#allocation8 + $0x380] ss:$16 sps:$4 sm:$0xff]  }
 0x1c3   :  { %2750 = vmatmul.mubr.bf16.vlgmr.msra.gmra.mrb[8].mxu0 %v1151_v4  ;;  %2922 = vmatmul.mubr.bf16.vlgmr.msra.gmra.mrb[8].mxu1 %v1151_v4  ;;  %v4543_v4 = vld [vmem:[#allocation8 + $0x340] ss:$16 sps:$4 sm:$0xff]   ;;  %v4566_v43 = vld [vmem:[#allocation8 + $0x3ac] ss:$16 sps:$4 sm:$0xff]   ;;  %v4564_v47 = vld [vmem:[#allocation8 + $0x3a8] ss:$16 sps:$4 sm:$0xff]  }
 0x1c4   :  { %2761 = vmatpush1.bf16.msra.mxu0 %v4483_v34  ;;  %2933 = vmatpush1.bf16.msra.mxu1 %v4486_v35  ;;  %v4551_v34 = vld [vmem:[#allocation8 + $0x364] ss:$16 sps:$4 sm:$0xff]   ;;  %v4554_v35 = vld [vmem:[#allocation8 + $0x36c] ss:$16 sps:$4 sm:$0xff]   ;;  %v4567_v24 = vld [vmem:[#allocation8 + $0x3c0] ss:$16 sps:$4 sm:$0xff]  }
 0x1c5   :  { %2762 = vmatprep.subr.bf16.mxu0 %v4491_v37  ;;  %2934 = vmatprep.subr.bf16.mxu1 %v4494_v38  ;;  %v4552_v37 = vld [vmem:[#allocation8 + $0x368] ss:$16 sps:$4 sm:$0xff]   ;;  %v4557_v38 = vld [vmem:[#allocation8 + $0x384] ss:$16 sps:$4 sm:$0xff]   ;;  %v4572_v49 = vld [vmem:[#allocation8 + $0x3cc] ss:$16 sps:$4 sm:$0xff]  }
 0x1c6   :  { %2792 = vmatprep.mubr.bf16.mxu0 %v1154_v60  ;;  %2964 = vmatprep.mubr.bf16.mxu1 %v1154_v60  ;;  %v4569_v48 = vld [vmem:[#allocation8 + $0x3c4] ss:$16 sps:$4 sm:$0xff]   ;;  %v4570_v52 = vld [vmem:[#allocation8 + $0x3c8] ss:$16 sps:$4 sm:$0xff]   ;;  %v4578_v55 = vld [vmem:[#allocation8 + $0x3ec] ss:$16 sps:$4 sm:$0xff]  }
 0x1c8   :  { %2763 = vmatpush1.bf16.msra.mxu0 %v4489_v41  ;;  %2935 = vmatpush1.bf16.msra.mxu1 %v4492_v42  ;;  %v4558_v41 = vld [vmem:[#allocation8 + $0x388] ss:$16 sps:$4 sm:$0xff]   ;;  %v4563_v42 = vld [vmem:[#allocation8 + $0x3a4] ss:$16 sps:$4 sm:$0xff]  }
 0x1c9   :  { %2764 = vmatprep.subr.bf16.mxu0 %v4497_v45  ;;  %2936 = vmatprep.subr.bf16.mxu1 %v4500_v46  ;;  %v305_v45 = vsub.s32 5, %v5343_v12  ;;  %v4561_v46 = vld [vmem:[#allocation8 + $0x3a0] ss:$16 sps:$4 sm:$0xff]  }
 0x1cb   :  { %v306_v51 = vrot.slane %v5348_v14, %v305_v45  ;;  %v4597_v45 = vld [vmem:[#allocation8 + $0x460] ss:$16 sps:$4 sm:$0xff]  }
 0x1cc   :  { %2765 = vmatpush1.bf16.msra.mxu0 %v4495_v53  ;;  %2937 = vmatpush1.bf16.msra.mxu1 %v4498_v54  ;;  %v4575_v54 = vld [vmem:[#allocation8 + $0x3e4] ss:$16 sps:$4 sm:$0xff]  }
 0x1cd   :  { %2766 = vmatprep.subr.bf16.mxu0 %v4503_v56  ;;  %2938 = vmatprep.subr.bf16.mxu1 %v4506_v57 }
 0x1d0   :  { %2767 = vmatpush1.bf16.msra.mxu0 %v4501_v61  ;;  %2939 = vmatpush1.bf16.msra.mxu1 %v4504_v62 }
 0x1d1   :  { %2768 = vmatprep.subr.bf16.mxu0 %v4509_v63  ;;  %2940 = vmatprep.subr.bf16.mxu1 %v4512_v0  ;;  %v4573_v0 = vld [vmem:[#allocation8 + $0x3e0] ss:$16 sps:$4 sm:$0xff]  }
 0x1d4   :  { %2769 = vmatpush1.bf16.msra.mxu0 %v4507_v1  ;;  %2941 = vmatpush1.bf16.msra.mxu1 %v4510_v2  ;;  %v4576_v1 = vld [vmem:[#allocation8 + $0x3e8] ss:$16 sps:$4 sm:$0xff]  }
 0x1d5   :  { %2770 = vmatprep.subr.bf16.mxu0 %v4515_v3  ;;  %2942 = vmatprep.subr.bf16.mxu1 %v4518_v5  ;;  %v309_v5 = vsub.s32 6, %v5343_v12 }
 0x1d8   :  { %2771 = vmatpush1.bf16.msra.mxu0 %v4513_v6  ;;  %2943 = vmatpush1.bf16.msra.mxu1 %v4516_v7  ;;  %v4581_v6 = vld [vmem:[#allocation8 + $0x404] ss:$16 sps:$4 sm:$0xff]   ;;  %v4584_v7 = vld [vmem:[#allocation8 + $0x40c] ss:$16 sps:$4 sm:$0xff]  }
 0x1d9   :  { %2772 = vmatprep.subr.bf16.mxu0 %v4521_v8  ;;  %2944 = vmatprep.subr.bf16.mxu1 %v4524_v9  ;;  %v313_v9 = vsub.s32 7, %v5343_v12 }
 0x1dc   :  { %2773 = vmatpush1.bf16.msra.mxu0 %v4519_v10  ;;  %2945 = vmatpush1.bf16.msra.mxu1 %v4522_v11 }
 0x1dd   :  { %2774 = vmatprep.subr.bf16.mxu0 %v4527_v16  ;;  %2946 = vmatprep.subr.bf16.mxu1 %v4530_v17  ;;  %v4579_v16 = vld [vmem:[#allocation8 + $0x400] ss:$16 sps:$4 sm:$0xff]   ;;  %v4582_v17 = vld [vmem:[#allocation8 + $0x408] ss:$16 sps:$4 sm:$0xff]  }
 0x1e0   :  { %2775 = vmatpush1.bf16.msra.mxu0 %v4525_v18  ;;  %2947 = vmatpush1.bf16.msra.mxu1 %v4528_v19  ;;  %v310_v19 = vrot.slane %v5348_v14, %v309_v5  ;;  %v4638_v5 = vld [vmem:[#allocation8 + $0x52c] ss:$16 sps:$4 sm:$0xff]  }
 0x1e1   :  { %2776 = vmatprep.subr.bf16.mxu0 %v4533_v20  ;;  %2948 = vmatprep.subr.bf16.mxu1 %v4536_v21  ;;  %v4587_v20 = vld [vmem:[#allocation8 + $0x424] ss:$16 sps:$4 sm:$0xff]   ;;  %v4590_v21 = vld [vmem:[#allocation8 + $0x42c] ss:$16 sps:$4 sm:$0xff]  }
 0x1e4   :  { %2777 = vmatpush1.bf16.msra.mxu0 %v4531_v22  ;;  %2949 = vmatpush1.bf16.msra.mxu1 %v4534_v23  ;;  %v314_v22 = vrot.slane %v5348_v14, %v313_v9  ;;  %v4644_v9 = vld [vmem:[#allocation8 + $0x54c] ss:$16 sps:$4 sm:$0xff]  }
 0x1e5   :  { %2778 = vmatprep.subr.bf16.mxu0 %v4539_v25  ;;  %2950 = vmatprep.subr.bf16.mxu1 %v4542_v26  ;;  %v4585_v25 = vld [vmem:[#allocation8 + $0x420] ss:$16 sps:$4 sm:$0xff]   ;;  %v4588_v26 = vld [vmem:[#allocation8 + $0x428] ss:$16 sps:$4 sm:$0xff]  }
 0x1e8   :  { %2779 = vmatpush1.bf16.msra.mxu0 %v4537_v28  ;;  %2951 = vmatpush1.bf16.msra.mxu1 %v4540_v29 }
 0x1e9   :  { %2780 = vmatprep.subr.bf16.mxu0 %v4545_v31  ;;  %2952 = vmatprep.subr.bf16.mxu1 %v4548_v32  ;;  %v4593_v31 = vld [vmem:[#allocation8 + $0x444] ss:$16 sps:$4 sm:$0xff]   ;;  %v4596_v32 = vld [vmem:[#allocation8 + $0x44c] ss:$16 sps:$4 sm:$0xff]  }
 0x1ec   :  { %2781 = vmatpush1.bf16.msra.mxu0 %v4543_v4  ;;  %2953 = vmatpush1.bf16.msra.mxu1 %v4546_v33 }
 0x1ed   :  { %2782 = vmatprep.subr.bf16.mxu0 %v4551_v34  ;;  %2954 = vmatprep.subr.bf16.mxu1 %v4554_v35 }
 0x1f0   :  { %2783 = vmatpush1.bf16.msra.mxu0 %v4549_v36  ;;  %2955 = vmatpush1.bf16.msra.mxu1 %v4552_v37  ;;  %v4591_v37 = vld [vmem:[#allocation8 + $0x440] ss:$16 sps:$4 sm:$0xff]  }
 0x1f1   :  { %2784 = vmatprep.subr.bf16.mxu0 %v4557_v38  ;;  %2956 = vmatprep.subr.bf16.mxu1 %v4560_v39  ;;  %v4594_v38 = vld [vmem:[#allocation8 + $0x448] ss:$16 sps:$4 sm:$0xff]  }
 0x1f4   :  { %2785 = vmatpush1.bf16.msra.mxu0 %v4555_v40  ;;  %2957 = vmatpush1.bf16.msra.mxu1 %v4558_v41  ;;  %v4599_v40 = vld [vmem:[#allocation8 + $0x464] ss:$16 sps:$4 sm:$0xff]   ;;  %v4602_v41 = vld [vmem:[#allocation8 + $0x46c] ss:$16 sps:$4 sm:$0xff]  }
 0x1f5   :  { %2786 = vmatprep.subr.bf16.mxu0 %v4563_v42  ;;  %2958 = vmatprep.subr.bf16.mxu1 %v4566_v43 }
 0x1f8   :  { %2787 = vmatpush1.bf16.msra.mxu0 %v4561_v46  ;;  %2959 = vmatpush1.bf16.msra.mxu1 %v4564_v47  ;;  %v1083_v53 = vpop.f32.mrb[4].mxu0  ;;  %v4600_v46 = vld [vmem:[#allocation8 + $0x468] ss:$16 sps:$4 sm:$0xff]   ;;  %v4605_v47 = vld [vmem:[#allocation8 + $0x484] ss:$16 sps:$4 sm:$0xff]  }
 0x1f9   :  { %2788 = vmatprep.subr.bf16.mxu0 %v4569_v48  ;;  %2960 = vmatprep.subr.bf16.mxu1 %v4572_v49  ;;  %v1084_v56 = vadd.f32 %v1083_v53, %v302_v50  ;;  %v1085_v57 = vpop.f32.mrb[5].mxu0  ;;  %v4608_v48 = vld [vmem:[#allocation8 + $0x48c] ss:$16 sps:$4 sm:$0xff]   ;;  %v4603_v49 = vld [vmem:[#allocation8 + $0x480] ss:$16 sps:$4 sm:$0xff]  }
 0x1fa   :  { %v1086_v58 = vadd.f32 %v1085_v57, %v306_v51  ;;  %v1087_v60 = vpop.f32.mrb[6].mxu0  ;;  %v1126_v23 = vpop.f32.mrb[4].mxu1  ;;  %v4612_v53 = vld [vmem:[#allocation8 + $0x4a8] ss:$16 sps:$4 sm:$0xff]  }
 0x1fb   :  { %v1139_v61 = vmax.f32 %v1084_v56, 0.0  ;;  %v1088_v62 = vadd.f32 %v1087_v60, %v302_v50  ;;  %v1089_v63 = vpop.f32.mrb[7].mxu0  ;;  %v1127_v28 = vadd.f32 %v1126_v23, %v310_v19  ;;  %v1128_v29 = vpop.f32.mrb[5].mxu1  ;;  %v4606_v50 = vld [vmem:[#allocation8 + $0x488] ss:$16 sps:$4 sm:$0xff]  }
 0x1fc   :  { %2789 = vmatpush1.bf16.msra.mxu0 %v4567_v24  ;;  %2961 = vmatpush1.bf16.msra.mxu1 %v4570_v52  ;;  %v1140_v2 = vmax.f32 %v1086_v58, 0.0  ;;  %v1090_v3 = vadd.f32 %v1089_v63, %v306_v51  ;;  %v1129_v4 = vadd.f32 %v1128_v29, %v314_v22  ;;  %v1130_v33 = vpop.f32.mrb[6].mxu1  ;;  %v4611_v51 = vld [vmem:[#allocation8 + $0x4a4] ss:$16 sps:$4 sm:$0xff]   ;;  %v4614_v24 = vld [vmem:[#allocation8 + $0x4ac] ss:$16 sps:$4 sm:$0xff]  }
 0x1fd   :  { %2790 = vmatprep.subr.bf16.mxu0 %v4575_v54  ;;  %2962 = vmatprep.subr.bf16.mxu1 %v4578_v55  ;;  %v1147_v8 = vmax.f32 %v1088_v62, 0.0  ;;  %v1141_v14 = vmax.f32 %v1127_v28, 0.0  ;;  %v1131_v34 = vadd.f32 %v1130_v33, %v310_v19  ;;  %v1132_v35 = vpop.f32.mrb[7].mxu1  ;;  %v4609_v52 = vld [vmem:[#allocation8 + $0x4a0] ss:$16 sps:$4 sm:$0xff]  }
 0x1fe   :  { %v1148_v10 = vmax.f32 %v1090_v3, 0.0  ;;  %v1142_v36 = vmax.f32 %v1129_v4, 0.0  ;;  %v4617_v54 = vld [vmem:[#allocation8 + $0x4c4] ss:$16 sps:$4 sm:$0xff]   ;;  %v4620_v55 = vld [vmem:[#allocation8 + $0x4cc] ss:$16 sps:$4 sm:$0xff]  }
 0x1ff   :  { %v5373_v11 = vpack.c.bf16 %v1147_v8, %v1139_v61  ;;  %v1149_v39 = vmax.f32 %v1131_v34, 0.0  ;;  %v4615_v56 = vld [vmem:[#allocation8 + $0x4c0] ss:$16 sps:$4 sm:$0xff]   ;;  %v4618_v57 = vld [vmem:[#allocation8 + $0x4c8] ss:$16 sps:$4 sm:$0xff]  }
 0x200   :  { %2791 = vmatpush1.bf16.msra.mxu0 %v4573_v0  ;;  %2963 = vmatpush1.bf16.msra.mxu1 %v4576_v1  ;;  %v1156_v18 = vpack.c.bf16 %v1148_v10, %v1140_v2  ;;  %v4623_v58 = vld [vmem:[#allocation8 + $0x4e4] ss:$16 sps:$4 sm:$0xff]   ;;  %v4626_v60 = vld [vmem:[#allocation8 + $0x4ec] ss:$16 sps:$4 sm:$0xff]   ;;  %v4621_v61 = vld [vmem:[#allocation8 + $0x4e0] ss:$16 sps:$4 sm:$0xff]  }
 0x201   :  { %2803 = vmatprep.subr.bf16.mxu0 %v4581_v6  ;;  %2975 = vmatprep.subr.bf16.mxu1 %v4584_v7  ;;  %v5379_v43 = vpack.c.bf16 %v1149_v39, %v1141_v14  ;;  %v4624_v62 = vld [vmem:[#allocation8 + $0x4e8] ss:$16 sps:$4 sm:$0xff]   ;;  %v4629_v63 = vld [vmem:[#allocation8 + $0x504] ss:$16 sps:$4 sm:$0xff]   ;;  %v4632_v0 = vld [vmem:[#allocation8 + $0x50c] ss:$16 sps:$4 sm:$0xff]  }
 0x202   :  { %v4627_v1 = vld [vmem:[#allocation8 + $0x500] ss:$16 sps:$4 sm:$0xff]   ;;  %v4630_v2 = vld [vmem:[#allocation8 + $0x508] ss:$16 sps:$4 sm:$0xff]   ;;  %v4635_v3 = vld [vmem:[#allocation8 + $0x524] ss:$16 sps:$4 sm:$0xff]  }
 0x203   :  { %2793 = vmatmul.mubr.bf16.vlgmr.msra.gmra.mrb[8].mxu0 %v5365_v59  ;;  %2965 = vmatmul.mubr.bf16.vlgmr.msra.gmra.mrb[8].mxu1 %v5365_v59  ;;  %v1133_v59 = vadd.f32 %v1132_v35, %v314_v22  ;;  %v4633_v6 = vld [vmem:[#allocation8 + $0x520] ss:$16 sps:$4 sm:$0xff]   ;;  %v4636_v7 = vld [vmem:[#allocation8 + $0x528] ss:$16 sps:$4 sm:$0xff]   ;;  %v4641_v8 = vld [vmem:[#allocation8 + $0x544] ss:$16 sps:$4 sm:$0xff]  }
 0x204   :  { %2804 = vmatpush1.bf16.msra.mxu0 %v4579_v16  ;;  %2976 = vmatpush1.bf16.msra.mxu1 %v4582_v17  ;;  %v4639_v10 = vld [vmem:[#allocation8 + $0x540] ss:$16 sps:$4 sm:$0xff]   ;;  %v4642_v16 = vld [vmem:[#allocation8 + $0x548] ss:$16 sps:$4 sm:$0xff]   ;;  %v4647_v17 = vld [vmem:[#allocation8 + $0x564] ss:$16 sps:$4 sm:$0xff]  }
 0x205   :  { %2805 = vmatprep.subr.bf16.mxu0 %v4587_v20  ;;  %2977 = vmatprep.subr.bf16.mxu1 %v4590_v21  ;;  %v1150_v42 = vmax.f32 %v1133_v59, 0.0  ;;  %v4645_v19 = vld [vmem:[#allocation8 + $0x560] ss:$16 sps:$4 sm:$0xff]   ;;  %v4648_v20 = vld [vmem:[#allocation8 + $0x568] ss:$16 sps:$4 sm:$0xff]  }
 0x206   :  { %2835 = vmatprep.mubr.bf16.mxu0 %v1156_v18  ;;  %3007 = vmatprep.mubr.bf16.mxu1 %v1156_v18  ;;  %v4650_v18 = vld [vmem:[#allocation8 + $0x56c] ss:$16 sps:$4 sm:$0xff]   ;;  %v4653_v21 = vld [vmem:[#allocation8 + $0x584] ss:$16 sps:$4 sm:$0xff]   ;;  %v4651_v23 = vld [vmem:[#allocation8 + $0x580] ss:$16 sps:$4 sm:$0xff]  }
 0x207   :  { %v5381_v44 = vpack.c.bf16 %v1150_v42, %v1142_v36  ;;  %v4656_v22 = vld [vmem:[#allocation8 + $0x58c] ss:$16 sps:$4 sm:$0xff]   ;;  %v4657_v29 = vld [vmem:[#allocation8 + $0x5a0] ss:$16 sps:$4 sm:$0xff]   ;;  %v4666_v14 = vld [vmem:[#allocation8 + $0x5c8] ss:$16 sps:$4 sm:$0xff]  }
 0x208   :  { %2806 = vmatpush1.bf16.msra.mxu0 %v4585_v25  ;;  %2978 = vmatpush1.bf16.msra.mxu1 %v4588_v26  ;;  %v4654_v25 = vld [vmem:[#allocation8 + $0x588] ss:$16 sps:$4 sm:$0xff]   ;;  %v4659_v26 = vld [vmem:[#allocation8 + $0x5a4] ss:$16 sps:$4 sm:$0xff]   ;;  %v4662_v28 = vld [vmem:[#allocation8 + $0x5ac] ss:$16 sps:$4 sm:$0xff]  }
 0x209   :  { %2807 = vmatprep.subr.bf16.mxu0 %v4593_v31  ;;  %2979 = vmatprep.subr.bf16.mxu1 %v4596_v32  ;;  %v4660_v31 = vld [vmem:[#allocation8 + $0x5a8] ss:$16 sps:$4 sm:$0xff]   ;;  %v4665_v32 = vld [vmem:[#allocation8 + $0x5c4] ss:$16 sps:$4 sm:$0xff]   ;;  %v4668_v4 = vld [vmem:[#allocation8 + $0x5cc] ss:$16 sps:$4 sm:$0xff]  }
 0x20a   :  { %v4663_v33 = vld [vmem:[#allocation8 + $0x5c0] ss:$16 sps:$4 sm:$0xff]   ;;  %v4671_v34 = vld [vmem:[#allocation8 + $0x5e4] ss:$16 sps:$4 sm:$0xff]   ;;  %v4674_v35 = vld [vmem:[#allocation8 + $0x5ec] ss:$16 sps:$4 sm:$0xff]  }
 0x20b   :  { %v4669_v36 = vld [vmem:[#allocation8 + $0x5e0] ss:$16 sps:$4 sm:$0xff]   ;;  %v4672_v59 = vld [vmem:[#allocation8 + $0x5e8] ss:$16 sps:$4 sm:$0xff]   ;;  %v4686_v42 = vld [vmem:[#allocation8 + $0x62c] ss:$16 sps:$4 sm:$0xff]  }
 0x20c   :  { %2808 = vmatpush1.bf16.msra.mxu0 %v4591_v37  ;;  %2980 = vmatpush1.bf16.msra.mxu1 %v4594_v38  ;;  %v4677_v37 = vld [vmem:[#allocation8 + $0x604] ss:$16 sps:$4 sm:$0xff]   ;;  %v4680_v38 = vld [vmem:[#allocation8 + $0x60c] ss:$16 sps:$4 sm:$0xff]   ;;  %v4675_v39 = vld [vmem:[#allocation8 + $0x600] ss:$16 sps:$4 sm:$0xff]  }
 0x20d   :  { %2809 = vmatprep.subr.bf16.mxu0 %v4599_v40  ;;  %2981 = vmatprep.subr.bf16.mxu1 %v4602_v41  ;;  %v4678_v40 = vld [vmem:[#allocation8 + $0x608] ss:$16 sps:$4 sm:$0xff]   ;;  %v4683_v41 = vld [vmem:[#allocation8 + $0x624] ss:$16 sps:$4 sm:$0xff]  }
 0x210   :  { %2810 = vmatpush1.bf16.msra.mxu0 %v4597_v45  ;;  %2982 = vmatpush1.bf16.msra.mxu1 %v4600_v46  ;;  %v4681_v45 = vld [vmem:[#allocation8 + $0x620] ss:$16 sps:$4 sm:$0xff]   ;;  %v4684_v46 = vld [vmem:[#allocation8 + $0x628] ss:$16 sps:$4 sm:$0xff]  }
 0x211   :  { %2811 = vmatprep.subr.bf16.mxu0 %v4605_v47  ;;  %2983 = vmatprep.subr.bf16.mxu1 %v4608_v48  ;;  %v4689_v47 = vld [vmem:[#allocation8 + $0x644] ss:$16 sps:$4 sm:$0xff]   ;;  %v4692_v48 = vld [vmem:[#allocation8 + $0x64c] ss:$16 sps:$4 sm:$0xff]  }
 0x214   :  { %2812 = vmatpush1.bf16.msra.mxu0 %v4603_v49  ;;  %2984 = vmatpush1.bf16.msra.mxu1 %v4606_v50  ;;  %v4687_v49 = vld [vmem:[#allocation8 + $0x640] ss:$16 sps:$4 sm:$0xff]   ;;  %v4690_v50 = vld [vmem:[#allocation8 + $0x648] ss:$16 sps:$4 sm:$0xff]  }
 0x215   :  { %2813 = vmatprep.subr.bf16.mxu0 %v4611_v51  ;;  %2985 = vmatprep.subr.bf16.mxu1 %v4614_v24  ;;  %v4695_v51 = vld [vmem:[#allocation8 + $0x664] ss:$16 sps:$4 sm:$0xff]   ;;  %v4693_v24 = vld [vmem:[#allocation8 + $0x660] ss:$16 sps:$4 sm:$0xff]  }
 0x218   :  { %2814 = vmatpush1.bf16.msra.mxu0 %v4609_v52  ;;  %2986 = vmatpush1.bf16.msra.mxu1 %v4612_v53  ;;  %v4696_v52 = vld [vmem:[#allocation8 + $0x668] ss:$16 sps:$4 sm:$0xff]   ;;  %v4701_v53 = vld [vmem:[#allocation8 + $0x684] ss:$16 sps:$4 sm:$0xff]  }
 0x219   :  { %2815 = vmatprep.subr.bf16.mxu0 %v4617_v54  ;;  %2987 = vmatprep.subr.bf16.mxu1 %v4620_v55  ;;  %v4704_v54 = vld [vmem:[#allocation8 + $0x68c] ss:$16 sps:$4 sm:$0xff]   ;;  %v4699_v55 = vld [vmem:[#allocation8 + $0x680] ss:$16 sps:$4 sm:$0xff]  }
 0x21c   :  { %2816 = vmatpush1.bf16.msra.mxu0 %v4615_v56  ;;  %2988 = vmatpush1.bf16.msra.mxu1 %v4618_v57  ;;  %v4707_v56 = vld [vmem:[#allocation8 + $0x6a4] ss:$16 sps:$4 sm:$0xff]   ;;  %v4710_v57 = vld [vmem:[#allocation8 + $0x6ac] ss:$16 sps:$4 sm:$0xff]  }
 0x21d   :  { %2817 = vmatprep.subr.bf16.mxu0 %v4623_v58  ;;  %2989 = vmatprep.subr.bf16.mxu1 %v4626_v60  ;;  %v4705_v58 = vld [vmem:[#allocation8 + $0x6a0] ss:$16 sps:$4 sm:$0xff]   ;;  %v4708_v60 = vld [vmem:[#allocation8 + $0x6a8] ss:$16 sps:$4 sm:$0xff]  }
 0x220   :  { %2818 = vmatpush1.bf16.msra.mxu0 %v4621_v61  ;;  %2990 = vmatpush1.bf16.msra.mxu1 %v4624_v62  ;;  %v4713_v61 = vld [vmem:[#allocation8 + $0x6c4] ss:$16 sps:$4 sm:$0xff]   ;;  %v4716_v62 = vld [vmem:[#allocation8 + $0x6cc] ss:$16 sps:$4 sm:$0xff]  }
 0x221   :  { %2819 = vmatprep.subr.bf16.mxu0 %v4629_v63  ;;  %2991 = vmatprep.subr.bf16.mxu1 %v4632_v0  ;;  %v4711_v63 = vld [vmem:[#allocation8 + $0x6c0] ss:$16 sps:$4 sm:$0xff]   ;;  %v4714_v0 = vld [vmem:[#allocation8 + $0x6c8] ss:$16 sps:$4 sm:$0xff]  }
 0x224   :  { %2820 = vmatpush1.bf16.msra.mxu0 %v4627_v1  ;;  %2992 = vmatpush1.bf16.msra.mxu1 %v4630_v2  ;;  %v4719_v1 = vld [vmem:[#allocation8 + $0x6e4] ss:$16 sps:$4 sm:$0xff]   ;;  %v4722_v2 = vld [vmem:[#allocation8 + $0x6ec] ss:$16 sps:$4 sm:$0xff]  }
 0x225   :  { %2821 = vmatprep.subr.bf16.mxu0 %v4635_v3  ;;  %2993 = vmatprep.subr.bf16.mxu1 %v4638_v5  ;;  %v4717_v3 = vld [vmem:[#allocation8 + $0x6e0] ss:$16 sps:$4 sm:$0xff]   ;;  %v4720_v5 = vld [vmem:[#allocation8 + $0x6e8] ss:$16 sps:$4 sm:$0xff]  }
 0x228   :  { %2822 = vmatpush1.bf16.msra.mxu0 %v4633_v6  ;;  %2994 = vmatpush1.bf16.msra.mxu1 %v4636_v7  ;;  %v4725_v6 = vld [vmem:[#allocation8 + $0x704] ss:$16 sps:$4 sm:$0xff]   ;;  %v4728_v7 = vld [vmem:[#allocation8 + $0x70c] ss:$16 sps:$4 sm:$0xff]  }
 0x229   :  { %2823 = vmatprep.subr.bf16.mxu0 %v4641_v8  ;;  %2995 = vmatprep.subr.bf16.mxu1 %v4644_v9  ;;  %v4723_v8 = vld [vmem:[#allocation8 + $0x700] ss:$16 sps:$4 sm:$0xff]   ;;  %v4726_v9 = vld [vmem:[#allocation8 + $0x708] ss:$16 sps:$4 sm:$0xff]  }
 0x22c   :  { %2824 = vmatpush1.bf16.msra.mxu0 %v4639_v10  ;;  %2996 = vmatpush1.bf16.msra.mxu1 %v4642_v16  ;;  %v4731_v10 = vld [vmem:[#allocation8 + $0x724] ss:$16 sps:$4 sm:$0xff]   ;;  %v4734_v16 = vld [vmem:[#allocation8 + $0x72c] ss:$16 sps:$4 sm:$0xff]  }
 0x22d   :  { %2825 = vmatprep.subr.bf16.mxu0 %v4647_v17  ;;  %2997 = vmatprep.subr.bf16.mxu1 %v4650_v18  ;;  %v4729_v17 = vld [vmem:[#allocation8 + $0x720] ss:$16 sps:$4 sm:$0xff]   ;;  %v4732_v18 = vld [vmem:[#allocation8 + $0x728] ss:$16 sps:$4 sm:$0xff]  }
 0x230   :  { %2826 = vmatpush1.bf16.msra.mxu0 %v4645_v19  ;;  %2998 = vmatpush1.bf16.msra.mxu1 %v4648_v20  ;;  %v4737_v19 = vld [vmem:[#allocation8 + $0x744] ss:$16 sps:$4 sm:$0xff]   ;;  %v4740_v20 = vld [vmem:[#allocation8 + $0x74c] ss:$16 sps:$4 sm:$0xff]  }
 0x231   :  { %2827 = vmatprep.subr.bf16.mxu0 %v4653_v21  ;;  %2999 = vmatprep.subr.bf16.mxu1 %v4656_v22  ;;  %v4735_v21 = vld [vmem:[#allocation8 + $0x740] ss:$16 sps:$4 sm:$0xff]   ;;  %v4738_v22 = vld [vmem:[#allocation8 + $0x748] ss:$16 sps:$4 sm:$0xff]  }
 0x234   :  { %2828 = vmatpush1.bf16.msra.mxu0 %v4651_v23  ;;  %3000 = vmatpush1.bf16.msra.mxu1 %v4654_v25  ;;  %v4743_v23 = vld [vmem:[#allocation8 + $0x764] ss:$16 sps:$4 sm:$0xff]   ;;  %v4746_v25 = vld [vmem:[#allocation8 + $0x76c] ss:$16 sps:$4 sm:$0xff]  }
 0x235   :  { %2829 = vmatprep.subr.bf16.mxu0 %v4659_v26  ;;  %3001 = vmatprep.subr.bf16.mxu1 %v4662_v28  ;;  %v4741_v26 = vld [vmem:[#allocation8 + $0x760] ss:$16 sps:$4 sm:$0xff]   ;;  %v4744_v28 = vld [vmem:[#allocation8 + $0x768] ss:$16 sps:$4 sm:$0xff]  }
 0x238   :  { %2830 = vmatpush1.bf16.msra.mxu0 %v4657_v29  ;;  %3002 = vmatpush1.bf16.msra.mxu1 %v4660_v31  ;;  %v4749_v29 = vld [vmem:[#allocation8 + $0x784] ss:$16 sps:$4 sm:$0xff]   ;;  %v4752_v31 = vld [vmem:[#allocation8 + $0x78c] ss:$16 sps:$4 sm:$0xff]  }
 0x239   :  { %2831 = vmatprep.subr.bf16.mxu0 %v4665_v32  ;;  %3003 = vmatprep.subr.bf16.mxu1 %v4668_v4  ;;  %v4747_v32 = vld [vmem:[#allocation8 + $0x780] ss:$16 sps:$4 sm:$0xff]   ;;  %v4750_v4 = vld [vmem:[#allocation8 + $0x788] ss:$16 sps:$4 sm:$0xff]  }
 0x23c   :  { %2832 = vmatpush1.bf16.msra.mxu0 %v4663_v33  ;;  %3004 = vmatpush1.bf16.msra.mxu1 %v4666_v14  ;;  %v4755_v33 = vld [vmem:[#allocation8 + $0x7a4] ss:$16 sps:$4 sm:$0xff]   ;;  %v4758_v14 = vld [vmem:[#allocation8 + $0x7ac] ss:$16 sps:$4 sm:$0xff]  }
 0x23d   :  { %2833 = vmatprep.subr.bf16.mxu0 %v4671_v34  ;;  %3005 = vmatprep.subr.bf16.mxu1 %v4674_v35  ;;  %v4753_v34 = vld [vmem:[#allocation8 + $0x7a0] ss:$16 sps:$4 sm:$0xff]   ;;  %v4756_v35 = vld [vmem:[#allocation8 + $0x7a8] ss:$16 sps:$4 sm:$0xff]  }
 0x240   :  { %2834 = vmatpush1.bf16.msra.mxu0 %v4669_v36  ;;  %3006 = vmatpush1.bf16.msra.mxu1 %v4672_v59  ;;  %v4761_v36 = vld [vmem:[#allocation8 + $0x7c4] ss:$16 sps:$4 sm:$0xff]   ;;  %v4764_v59 = vld [vmem:[#allocation8 + $0x7cc] ss:$16 sps:$4 sm:$0xff]  }
 0x241   :  { %2846 = vmatprep.subr.bf16.mxu0 %v4677_v37  ;;  %3018 = vmatprep.subr.bf16.mxu1 %v4680_v38  ;;  %v4759_v37 = vld [vmem:[#allocation8 + $0x7c0] ss:$16 sps:$4 sm:$0xff]   ;;  %v4762_v38 = vld [vmem:[#allocation8 + $0x7c8] ss:$16 sps:$4 sm:$0xff]  }
 0x243   :  { %2836 = vmatmul.mubr.bf16.vlgmr.msra.gmra.mrb[8].mxu0 %v5373_v11  ;;  %3008 = vmatmul.mubr.bf16.vlgmr.msra.gmra.mrb[8].mxu1 %v5373_v11  ;;  %v4698_v11 = vld [vmem:[#allocation8 + $0x66c] ss:$16 sps:$4 sm:$0xff]  }
 0x244   :  { %2847 = vmatpush1.bf16.msra.mxu0 %v4675_v39  ;;  %3019 = vmatpush1.bf16.msra.mxu1 %v4678_v40  ;;  %v4767_v39 = vld [vmem:[#allocation8 + $0x7e4] ss:$16 sps:$4 sm:$0xff]   ;;  %v4770_v40 = vld [vmem:[#allocation8 + $0x7ec] ss:$16 sps:$4 sm:$0xff]  }
 0x245   :  { %2848 = vmatprep.subr.bf16.mxu0 %v4683_v41  ;;  %3020 = vmatprep.subr.bf16.mxu1 %v4686_v42  ;;  %v4765_v41 = vld [vmem:[#allocation8 + $0x7e0] ss:$16 sps:$4 sm:$0xff]   ;;  %v4768_v42 = vld [vmem:[#allocation8 + $0x7e8] ss:$16 sps:$4 sm:$0xff]  }
 0x246   :  { %2878 = vmatprep.mubr.bf16.mxu0 %v5381_v44  ;;  %3050 = vmatprep.mubr.bf16.mxu1 %v5381_v44  ;;  %v4702_v44 = vld [vmem:[#allocation8 + $0x688] ss:$16 sps:$4 sm:$0xff]  }
 0x248   :  { %2849 = vmatpush1.bf16.msra.mxu0 %v4681_v45  ;;  %3021 = vmatpush1.bf16.msra.mxu1 %v4684_v46  ;;  %v4773_v45 = vld [vmem:[#allocation11 + $0x4] ss:$8 sps:$4 sm:$0xff]   ;;  %v4771_v46 = vld [vmem:[#allocation11] ss:$8 sps:$4 sm:$0xff]  }
 0x249   :  { %2850 = vmatprep.subr.bf16.mxu0 %v4689_v47  ;;  %3022 = vmatprep.subr.bf16.mxu1 %v4692_v48  ;;  %v4776_v47 = vld [vmem:[#allocation11 + $0x14] ss:$8 sps:$4 sm:$0xff]   ;;  %v4774_v48 = vld [vmem:[#allocation11 + $0x10] ss:$8 sps:$4 sm:$0xff]  }
 0x24c   :  { %2851 = vmatpush1.bf16.msra.mxu0 %v4687_v49  ;;  %3023 = vmatpush1.bf16.msra.mxu1 %v4690_v50  ;;  %v4779_v49 = vld [vmem:[#allocation11 + $0x24] ss:$8 sps:$4 sm:$0xff]   ;;  %v4777_v50 = vld [vmem:[#allocation11 + $0x20] ss:$8 sps:$4 sm:$0xff]  }
 0x24d   :  { %2852 = vmatprep.subr.bf16.mxu0 %v4695_v51  ;;  %3024 = vmatprep.subr.bf16.mxu1 %v4698_v11  ;;  %v4782_v51 = vld [vmem:[#allocation11 + $0x34] ss:$8 sps:$4 sm:$0xff]   ;;  %v4780_v11 = vld [vmem:[#allocation11 + $0x30] ss:$8 sps:$4 sm:$0xff]  }
 0x250   :  { %2853 = vmatpush1.bf16.msra.mxu0 %v4693_v24  ;;  %3025 = vmatpush1.bf16.msra.mxu1 %v4696_v52  ;;  %v4785_v24 = vld [vmem:[#allocation11 + $0x44] ss:$8 sps:$4 sm:$0xff]   ;;  %v4783_v52 = vld [vmem:[#allocation11 + $0x40] ss:$8 sps:$4 sm:$0xff]  }
 0x251   :  { %2854 = vmatprep.subr.bf16.mxu0 %v4701_v53  ;;  %3026 = vmatprep.subr.bf16.mxu1 %v4704_v54  ;;  %v4788_v53 = vld [vmem:[#allocation11 + $0x54] ss:$8 sps:$4 sm:$0xff]   ;;  %v4786_v54 = vld [vmem:[#allocation11 + $0x50] ss:$8 sps:$4 sm:$0xff]  }
 0x254   :  { %2855 = vmatpush1.bf16.msra.mxu0 %v4699_v55  ;;  %3027 = vmatpush1.bf16.msra.mxu1 %v4702_v44  ;;  %v4789_v55 = vld [vmem:[#allocation11 + $0x60] ss:$8 sps:$4 sm:$0xff]   ;;  %v4794_v44 = vld [vmem:[#allocation11 + $0x74] ss:$8 sps:$4 sm:$0xff]  }
 0x255   :  { %2856 = vmatprep.subr.bf16.mxu0 %v4707_v56  ;;  %3028 = vmatprep.subr.bf16.mxu1 %v4710_v57  ;;  %v4792_v56 = vld [vmem:[#allocation11 + $0x70] ss:$8 sps:$4 sm:$0xff]   ;;  %v4797_v57 = vld [vmem:[#allocation11 + $0x84] ss:$8 sps:$4 sm:$0xff]  }
 0x258   :  { %2857 = vmatpush1.bf16.msra.mxu0 %v4705_v58  ;;  %3029 = vmatpush1.bf16.msra.mxu1 %v4708_v60  ;;  %v4795_v58 = vld [vmem:[#allocation11 + $0x80] ss:$8 sps:$4 sm:$0xff]   ;;  %v4800_v60 = vld [vmem:[#allocation11 + $0x94] ss:$8 sps:$4 sm:$0xff]  }
 0x259   :  { %2858 = vmatprep.subr.bf16.mxu0 %v4713_v61  ;;  %3030 = vmatprep.subr.bf16.mxu1 %v4716_v62  ;;  %v4798_v61 = vld [vmem:[#allocation11 + $0x90] ss:$8 sps:$4 sm:$0xff]   ;;  %v4803_v62 = vld [vmem:[#allocation11 + $0xa4] ss:$8 sps:$4 sm:$0xff]  }
 0x25c   :  { %2859 = vmatpush1.bf16.msra.mxu0 %v4711_v63  ;;  %3031 = vmatpush1.bf16.msra.mxu1 %v4714_v0  ;;  %v4801_v63 = vld [vmem:[#allocation11 + $0xa0] ss:$8 sps:$4 sm:$0xff]   ;;  %v4806_v0 = vld [vmem:[#allocation11 + $0xb4] ss:$8 sps:$4 sm:$0xff]  }
 0x25d   :  { %2860 = vmatprep.subr.bf16.mxu0 %v4719_v1  ;;  %3032 = vmatprep.subr.bf16.mxu1 %v4722_v2  ;;  %v4804_v1 = vld [vmem:[#allocation11 + $0xb0] ss:$8 sps:$4 sm:$0xff]   ;;  %v4809_v2 = vld [vmem:[#allocation11 + $0xc4] ss:$8 sps:$4 sm:$0xff]  }
 0x260   :  { %2861 = vmatpush1.bf16.msra.mxu0 %v4717_v3  ;;  %3033 = vmatpush1.bf16.msra.mxu1 %v4720_v5  ;;  %v4807_v3 = vld [vmem:[#allocation11 + $0xc0] ss:$8 sps:$4 sm:$0xff]   ;;  %v4812_v5 = vld [vmem:[#allocation11 + $0xd4] ss:$8 sps:$4 sm:$0xff]  }
 0x261   :  { %2862 = vmatprep.subr.bf16.mxu0 %v4725_v6  ;;  %3034 = vmatprep.subr.bf16.mxu1 %v4728_v7  ;;  %v4810_v6 = vld [vmem:[#allocation11 + $0xd0] ss:$8 sps:$4 sm:$0xff]   ;;  %v4815_v7 = vld [vmem:[#allocation11 + $0xe4] ss:$8 sps:$4 sm:$0xff]  }
 0x264   :  { %2863 = vmatpush1.bf16.msra.mxu0 %v4723_v8  ;;  %3035 = vmatpush1.bf16.msra.mxu1 %v4726_v9  ;;  %v4813_v8 = vld [vmem:[#allocation11 + $0xe0] ss:$8 sps:$4 sm:$0xff]   ;;  %v4818_v9 = vld [vmem:[#allocation11 + $0xf4] ss:$8 sps:$4 sm:$0xff]  }
 0x265   :  { %2864 = vmatprep.subr.bf16.mxu0 %v4731_v10  ;;  %3036 = vmatprep.subr.bf16.mxu1 %v4734_v16  ;;  %v4816_v10 = vld [vmem:[#allocation11 + $0xf0] ss:$8 sps:$4 sm:$0xff]   ;;  %v4821_v16 = vld [vmem:[#allocation11 + $0x104] ss:$8 sps:$4 sm:$0xff]  }
 0x268   :  { %2865 = vmatpush1.bf16.msra.mxu0 %v4729_v17  ;;  %3037 = vmatpush1.bf16.msra.mxu1 %v4732_v18  ;;  %v4867_v17 = vld [vmem:[#allocation14] ss:$8 sps:$4 sm:$0xff]   ;;  %v4869_v18 = vld [vmem:[#allocation14 + $0x4] ss:$8 sps:$4 sm:$0xff]  }
 0x269   :  { %2866 = vmatprep.subr.bf16.mxu0 %v4737_v19  ;;  %3038 = vmatprep.subr.bf16.mxu1 %v4740_v20  ;;  %v4872_v19 = vld [vmem:[#allocation14 + $0x14] ss:$8 sps:$4 sm:$0xff]   ;;  %v4870_v20 = vld [vmem:[#allocation14 + $0x10] ss:$8 sps:$4 sm:$0xff]  }
 0x26c   :  { %2867 = vmatpush1.bf16.msra.mxu0 %v4735_v21  ;;  %3039 = vmatpush1.bf16.msra.mxu1 %v4738_v22  ;;  %v4875_v21 = vld [vmem:[#allocation14 + $0x24] ss:$8 sps:$4 sm:$0xff]   ;;  %v4873_v22 = vld [vmem:[#allocation14 + $0x20] ss:$8 sps:$4 sm:$0xff]  }
 0x26d   :  { %2868 = vmatprep.subr.bf16.mxu0 %v4743_v23  ;;  %3040 = vmatprep.subr.bf16.mxu1 %v4746_v25  ;;  %v4878_v23 = vld [vmem:[#allocation14 + $0x34] ss:$8 sps:$4 sm:$0xff]   ;;  %v4876_v25 = vld [vmem:[#allocation14 + $0x30] ss:$8 sps:$4 sm:$0xff]  }
 0x270   :  { %2869 = vmatpush1.bf16.msra.mxu0 %v4741_v26  ;;  %3041 = vmatpush1.bf16.msra.mxu1 %v4744_v28  ;;  %v4881_v26 = vld [vmem:[#allocation14 + $0x44] ss:$8 sps:$4 sm:$0xff]   ;;  %v4879_v28 = vld [vmem:[#allocation14 + $0x40] ss:$8 sps:$4 sm:$0xff]  }
 0x271   :  { %2870 = vmatprep.subr.bf16.mxu0 %v4749_v29  ;;  %3042 = vmatprep.subr.bf16.mxu1 %v4752_v31  ;;  %v4884_v29 = vld [vmem:[#allocation14 + $0x54] ss:$8 sps:$4 sm:$0xff]   ;;  %v4882_v31 = vld [vmem:[#allocation14 + $0x50] ss:$8 sps:$4 sm:$0xff]  }
 0x274   :  { %2871 = vmatpush1.bf16.msra.mxu0 %v4747_v32  ;;  %3043 = vmatpush1.bf16.msra.mxu1 %v4750_v4  ;;  %v4887_v32 = vld [vmem:[#allocation14 + $0x64] ss:$8 sps:$4 sm:$0xff]   ;;  %v4885_v4 = vld [vmem:[#allocation14 + $0x60] ss:$8 sps:$4 sm:$0xff]  }
 0x275   :  { %2872 = vmatprep.subr.bf16.mxu0 %v4755_v33  ;;  %3044 = vmatprep.subr.bf16.mxu1 %v4758_v14  ;;  %v4890_v33 = vld [vmem:[#allocation14 + $0x74] ss:$8 sps:$4 sm:$0xff]   ;;  %v4888_v14 = vld [vmem:[#allocation14 + $0x70] ss:$8 sps:$4 sm:$0xff]  }
 0x278   :  { %2873 = vmatpush1.bf16.msra.mxu0 %v4753_v34  ;;  %3045 = vmatpush1.bf16.msra.mxu1 %v4756_v35  ;;  %v4893_v34 = vld [vmem:[#allocation14 + $0x84] ss:$8 sps:$4 sm:$0xff]   ;;  %v4891_v35 = vld [vmem:[#allocation14 + $0x80] ss:$8 sps:$4 sm:$0xff]  }
 0x279   :  { %2874 = vmatprep.subr.bf16.mxu0 %v4761_v36  ;;  %3046 = vmatprep.subr.bf16.mxu1 %v4764_v59  ;;  %v4896_v36 = vld [vmem:[#allocation14 + $0x94] ss:$8 sps:$4 sm:$0xff]   ;;  %v4894_v59 = vld [vmem:[#allocation14 + $0x90] ss:$8 sps:$4 sm:$0xff]  }
 0x27c   :  { %2875 = vmatpush1.bf16.msra.mxu0 %v4759_v37  ;;  %3047 = vmatpush1.bf16.msra.mxu1 %v4762_v38  ;;  %v4899_v37 = vld [vmem:[#allocation14 + $0xa4] ss:$8 sps:$4 sm:$0xff]   ;;  %v4897_v38 = vld [vmem:[#allocation14 + $0xa0] ss:$8 sps:$4 sm:$0xff]  }
 0x27d   :  { %2876 = vmatprep.subr.bf16.mxu0 %v4767_v39  ;;  %3048 = vmatprep.subr.bf16.mxu1 %v4770_v40  ;;  %v4902_v39 = vld [vmem:[#allocation14 + $0xb4] ss:$8 sps:$4 sm:$0xff]   ;;  %v4900_v40 = vld [vmem:[#allocation14 + $0xb0] ss:$8 sps:$4 sm:$0xff]  }
 0x280   :  { %2877 = vmatpush1.bf16.msra.mxu0 %v4765_v41  ;;  %3049 = vmatpush1.bf16.msra.mxu1 %v4768_v42  ;;  %v4905_v41 = vld [vmem:[#allocation14 + $0xc4] ss:$8 sps:$4 sm:$0xff]   ;;  %v1415_v42 = vld [vmem:[#allocation10] sm:$0xf] }
 0x281   :  { %3469 = vmatprep.subr.bf16.mxu0 %v4773_v45  ;;  %3765 = vmatprep.subr.bf16.mxu1 %v4869_v18  ;;  %v4903_v45 = vld [vmem:[#allocation14 + $0xc0] ss:$8 sps:$4 sm:$0xff]   ;;  %v4822_v18 = vld [vmem:[#allocation11 + $0x110] ss:$8 sps:$4 sm:$0xff]  }
 0x283   :  { %2879 = vmatmul.mubr.bf16.vlgmr.msra.gmra.mrb[8].mxu0 %v5379_v43  ;;  %3051 = vmatmul.mubr.bf16.vlgmr.msra.gmra.mrb[8].mxu1 %v5379_v43  ;;  %v4791_v43 = vld [vmem:[#allocation11 + $0x64] ss:$8 sps:$4 sm:$0xff]  }
 0x284   :  { %3470 = vmatpush1.bf16.msra.mxu0 %v4771_v46  ;;  %3766 = vmatpush1.bf16.msra.mxu1 %v4867_v17  ;;  %v4908_v46 = vld [vmem:[#allocation14 + $0xd4] ss:$8 sps:$4 sm:$0xff]  }
 0x285   :  { %3471 = vmatprep.subr.bf16.mxu0 %v4776_v47  ;;  %3767 = vmatprep.subr.bf16.mxu1 %v4872_v19  ;;  %v1420_v47 = vrot.slane %v1415_v42, %v5346_v13  ;;  %v4824_v17 = vld [vmem:[#allocation11 + $0x114] ss:$8 sps:$4 sm:$0xff]   ;;  %v4827_v19 = vld [vmem:[#allocation11 + $0x124] ss:$8 sps:$4 sm:$0xff]  }
 0x288   :  { %3472 = vmatpush1.bf16.msra.mxu0 %v4774_v48  ;;  %3768 = vmatpush1.bf16.msra.mxu1 %v4870_v20  ;;  %v1428_v48 = vrot.slane %v1415_v42, %v293_v27  ;;  %v4825_v20 = vld [vmem:[#allocation11 + $0x120] ss:$8 sps:$4 sm:$0xff]  }
 0x289   :  { %3473 = vmatprep.subr.bf16.mxu0 %v4779_v49  ;;  %3769 = vmatprep.subr.bf16.mxu1 %v4875_v21  ;;  %v1424_v49 = vrot.slane %v1415_v42, %v5351_v15  ;;  %v4830_v21 = vld [vmem:[#allocation11 + $0x134] ss:$8 sps:$4 sm:$0xff]  }
 0x28c   :  { %3474 = vmatpush1.bf16.msra.mxu0 %v4777_v50  ;;  %3770 = vmatpush1.bf16.msra.mxu1 %v4873_v22  ;;  %v1432_v50 = vrot.slane %v1415_v42, %v297_v30  ;;  %v4828_v22 = vld [vmem:[#allocation11 + $0x130] ss:$8 sps:$4 sm:$0xff]  }
 0x28d   :  { %3475 = vmatprep.subr.bf16.mxu0 %v4782_v51  ;;  %3771 = vmatprep.subr.bf16.mxu1 %v4878_v23  ;;  %v4906_v51 = vld [vmem:[#allocation14 + $0xd0] ss:$8 sps:$4 sm:$0xff]   ;;  %v4833_v23 = vld [vmem:[#allocation11 + $0x144] ss:$8 sps:$4 sm:$0xff]  }
 0x28e   :  { %v4858_v42 = vld [vmem:[#allocation11 + $0x1d0] ss:$8 sps:$4 sm:$0xff]  }
 0x290   :  { %3476 = vmatpush1.bf16.msra.mxu0 %v4780_v11  ;;  %3772 = vmatpush1.bf16.msra.mxu1 %v4876_v25  ;;  %v4831_v25 = vld [vmem:[#allocation11 + $0x140] ss:$8 sps:$4 sm:$0xff]  }
 0x291   :  { %3477 = vmatprep.subr.bf16.mxu0 %v4785_v24  ;;  %3773 = vmatprep.subr.bf16.mxu1 %v4881_v26  ;;  %v4836_v26 = vld [vmem:[#allocation11 + $0x154] ss:$8 sps:$4 sm:$0xff]  }
 0x294   :  { %3478 = vmatpush1.bf16.msra.mxu0 %v4783_v52  ;;  %3774 = vmatpush1.bf16.msra.mxu1 %v4879_v28  ;;  %v4834_v28 = vld [vmem:[#allocation11 + $0x150] ss:$8 sps:$4 sm:$0xff]  }
 0x295   :  { %3479 = vmatprep.subr.bf16.mxu0 %v4788_v53  ;;  %3775 = vmatprep.subr.bf16.mxu1 %v4884_v29  ;;  %v4839_v29 = vld [vmem:[#allocation11 + $0x164] ss:$8 sps:$4 sm:$0xff]  }
 0x298   :  { %3480 = vmatpush1.bf16.msra.mxu0 %v4786_v54  ;;  %3776 = vmatpush1.bf16.msra.mxu1 %v4882_v31  ;;  %v4837_v31 = vld [vmem:[#allocation11 + $0x160] ss:$8 sps:$4 sm:$0xff]  }
 0x299   :  { %3481 = vmatprep.subr.bf16.mxu0 %v4791_v43  ;;  %3777 = vmatprep.subr.bf16.mxu1 %v4887_v32  ;;  %v4842_v32 = vld [vmem:[#allocation11 + $0x174] ss:$8 sps:$4 sm:$0xff]  }
 0x29c   :  { %3482 = vmatpush1.bf16.msra.mxu0 %v4789_v55  ;;  %3778 = vmatpush1.bf16.msra.mxu1 %v4885_v4  ;;  %v4840_v4 = vld [vmem:[#allocation11 + $0x170] ss:$8 sps:$4 sm:$0xff]  }
 0x29d   :  { %3483 = vmatprep.subr.bf16.mxu0 %v4794_v44  ;;  %3779 = vmatprep.subr.bf16.mxu1 %v4890_v33  ;;  %v4845_v33 = vld [vmem:[#allocation11 + $0x184] ss:$8 sps:$4 sm:$0xff]  }
 0x2a0   :  { %3484 = vmatpush1.bf16.msra.mxu0 %v4792_v56  ;;  %3780 = vmatpush1.bf16.msra.mxu1 %v4888_v14  ;;  %v4843_v14 = vld [vmem:[#allocation11 + $0x180] ss:$8 sps:$4 sm:$0xff]  }
 0x2a1   :  { %3485 = vmatprep.subr.bf16.mxu0 %v4797_v57  ;;  %3781 = vmatprep.subr.bf16.mxu1 %v4893_v34  ;;  %v4848_v34 = vld [vmem:[#allocation11 + $0x194] ss:$8 sps:$4 sm:$0xff]  }
 0x2a4   :  { %3486 = vmatpush1.bf16.msra.mxu0 %v4795_v58  ;;  %3782 = vmatpush1.bf16.msra.mxu1 %v4891_v35  ;;  %v4846_v35 = vld [vmem:[#allocation11 + $0x190] ss:$8 sps:$4 sm:$0xff]  }
 0x2a5   :  { %3487 = vmatprep.subr.bf16.mxu0 %v4800_v60  ;;  %3783 = vmatprep.subr.bf16.mxu1 %v4896_v36  ;;  %v4851_v36 = vld [vmem:[#allocation11 + $0x1a4] ss:$8 sps:$4 sm:$0xff]  }
 0x2a8   :  { %3488 = vmatpush1.bf16.msra.mxu0 %v4798_v61  ;;  %3784 = vmatpush1.bf16.msra.mxu1 %v4894_v59  ;;  %v4849_v59 = vld [vmem:[#allocation11 + $0x1a0] ss:$8 sps:$4 sm:$0xff]  }
 0x2a9   :  { %3489 = vmatprep.subr.bf16.mxu0 %v4803_v62  ;;  %3785 = vmatprep.subr.bf16.mxu1 %v4899_v37  ;;  %v4854_v37 = vld [vmem:[#allocation11 + $0x1b4] ss:$8 sps:$4 sm:$0xff]  }
 0x2ac   :  { %3490 = vmatpush1.bf16.msra.mxu0 %v4801_v63  ;;  %3786 = vmatpush1.bf16.msra.mxu1 %v4897_v38  ;;  %v4852_v38 = vld [vmem:[#allocation11 + $0x1b0] ss:$8 sps:$4 sm:$0xff]  }
 0x2ad   :  { %3491 = vmatprep.subr.bf16.mxu0 %v4806_v0  ;;  %3787 = vmatprep.subr.bf16.mxu1 %v4902_v39  ;;  %v4857_v39 = vld [vmem:[#allocation11 + $0x1c4] ss:$8 sps:$4 sm:$0xff]  }
 0x2b0   :  { %3492 = vmatpush1.bf16.msra.mxu0 %v4804_v1  ;;  %3788 = vmatpush1.bf16.msra.mxu1 %v4900_v40  ;;  %v4855_v40 = vld [vmem:[#allocation11 + $0x1c0] ss:$8 sps:$4 sm:$0xff]  }
 0x2b1   :  { %3493 = vmatprep.subr.bf16.mxu0 %v4809_v2  ;;  %3789 = vmatprep.subr.bf16.mxu1 %v4905_v41  ;;  %v4860_v41 = vld [vmem:[#allocation11 + $0x1d4] ss:$8 sps:$4 sm:$0xff]  }
 0x2b4   :  { %3494 = vmatpush1.bf16.msra.mxu0 %v4807_v3  ;;  %3790 = vmatpush1.bf16.msra.mxu1 %v4903_v45  ;;  %v4863_v45 = vld [vmem:[#allocation11 + $0x1e4] ss:$8 sps:$4 sm:$0xff]  }
 0x2b5   :  { %3495 = vmatprep.subr.bf16.mxu0 %v4812_v5  ;;  %3791 = vmatprep.subr.bf16.mxu1 %v4908_v46  ;;  %v4861_v46 = vld [vmem:[#allocation11 + $0x1e0] ss:$8 sps:$4 sm:$0xff]  }
 0x2b8   :  { %3496 = vmatpush1.bf16.msra.mxu0 %v4810_v6  ;;  %3792 = vmatpush1.bf16.msra.mxu1 %v4906_v51  ;;  %v4914_v51 = vld [vmem:[#allocation14 + $0xf4] ss:$8 sps:$4 sm:$0xff]  }
 0x2b9   :  { %3497 = vmatprep.subr.bf16.mxu0 %v4815_v7 }
 0x2bc   :  { %3498 = vmatpush1.bf16.msra.mxu0 %v4813_v8 }
 0x2bd   :  { %3499 = vmatprep.subr.bf16.mxu0 %v4818_v9 }
 0x2c0   :  { %3500 = vmatpush1.bf16.msra.mxu0 %v4816_v10 }
 0x2c1   :  { %3512 = vmatprep.subr.bf16.mxu0 %v4821_v16  ;;  %v4819_v16 = vld [vmem:[#allocation11 + $0x100] ss:$8 sps:$4 sm:$0xff]  }
 0x356   :  { %v2880_v11 = vpop.f32.mrb[8].mxu0  ;;  %v3052_v24 = vpop.f32.mrb[8].mxu1 }
 0x357   :  { %v4331_v52 = vadd.f32 %v2880_v11, %v1420_v47  ;;  %v4335_v53 = vadd.f32 %v3052_v24, %v1428_v48  ;;  %v2882_v54 = vpop.f32.mrb[9].mxu0  ;;  %v3054_v43 = vpop.f32.mrb[9].mxu1  ;;  %v4912_v11 = vld [vmem:[#allocation14 + $0xf0] ss:$8 sps:$4 sm:$0xff]   ;;  %v3137_v24 = vld [vmem:[#allocation13] sm:$0x3] }
 0x358   :  { %v4332_v55 = vadd.f32 %v2882_v54, %v1424_v49  ;;  %v4336_v44 = vadd.f32 %v3054_v43, %v1432_v50  ;;  %v2884_v56 = vpop.f32.mrb[10].mxu0  ;;  %v3056_v57 = vpop.f32.mrb[10].mxu1 }
 0x359   :  { %v4333_v27 = vadd.f32 %v2884_v56, %v1420_v47  ;;  %v4337_v58 = vadd.f32 %v3056_v57, %v1428_v48  ;;  %v2886_v60 = vpop.f32.mrb[11].mxu0  ;;  %v3058_v61 = vpop.f32.mrb[11].mxu1  ;;  %v3061_v62 = vmax.f32 %v4331_v52, 0.0  ;;  %v3063_v63 = vmax.f32 %v4335_v53, 0.0  ;;  %v4866_v47 = vld [vmem:[#allocation11 + $0x1f4] ss:$8 sps:$4 sm:$0xff]  }
 0x35a   :  { %v4334_v12 = vadd.f32 %v2886_v60, %v1424_v49  ;;  %v4338_v30 = vadd.f32 %v3058_v61, %v1432_v50  ;;  %v3062_v2 = vmax.f32 %v4332_v55, 0.0  ;;  %v3064_v3 = vmax.f32 %v4336_v44, 0.0  ;;  %v4864_v48 = vld [vmem:[#allocation11 + $0x1f0] ss:$8 sps:$4 sm:$0xff]   ;;  %v4909_v50 = vld [vmem:[#allocation14 + $0xe0] ss:$8 sps:$4 sm:$0xff]  }
 0x35b   :  { %v3065_v0 = vmax.f32 %v4333_v27, 0.0  ;;  %v3067_v1 = vmax.f32 %v4337_v58, 0.0  ;;  %v4911_v49 = vld [vmem:[#allocation14 + $0xe4] ss:$8 sps:$4 sm:$0xff]   ;;  %v3142_v52 = vrot.slane %v3137_v24, %v5346_v13  ;;  %v3146_v53 = vrot.slane %v3137_v24, %v5351_v15 }
 0x35c   :  { %v3066_v5 = vmax.f32 %v4334_v12, 0.0  ;;  %v3068_v6 = vmax.f32 %v4338_v30, 0.0  ;;  %3793 = vmatprep.subr.bf16.mxu1 %v4911_v49 }
 0x35d   :  { %v3069_v7 = vpack.c.bf16 %v3065_v0, %v3061_v62  ;;  %v5395_v8 = vpack.c.bf16 %v3067_v1, %v3063_v63  ;;  %3794 = vmatpush1.bf16.msra.mxu1 %v4909_v50  ;;  %v3593_v0 = vld [vmem:[#allocation16] sm:$0x3] }
 0x35e   :  { %v3070_v9 = vpack.c.bf16 %v3066_v5, %v3062_v2  ;;  %v3072_v10 = vpack.c.bf16 %v3068_v6, %v3064_v3  ;;  %3795 = vmatprep.subr.bf16.mxu1 %v4914_v51  ;;  %v3598_v1 = vrot.slane %v3593_v0, %v5346_v13  ;;  %v3602_v2 = vrot.slane %v3593_v0, %v5351_v15 }
 0x360   :  { %3501 = vmatprep.mubr.bf16.mxu0 %v3070_v9 }
 0x361   :  { %3502 = vmatmul.mubr.bf16.vlgmr.msra.gmra.mrb[12].mxu0 %v3069_v7  ;;  %3796 = vmatpush1.bf16.msra.mxu1 %v4912_v11 }
 0x362   :  { %3513 = vmatpush1.bf16.msra.mxu0 %v4819_v16  ;;  %3544 = vmatprep.mubr.bf16.mxu0 %v3072_v10 }
 0x363   :  { %3514 = vmatprep.subr.bf16.mxu0 %v4824_v17 }
 0x366   :  { %3515 = vmatpush1.bf16.msra.mxu0 %v4822_v18 }
 0x367   :  { %3516 = vmatprep.subr.bf16.mxu0 %v4827_v19 }
 0x36a   :  { %3517 = vmatpush1.bf16.msra.mxu0 %v4825_v20 }
 0x36b   :  { %3518 = vmatprep.subr.bf16.mxu0 %v4830_v21 }
 0x36e   :  { %3519 = vmatpush1.bf16.msra.mxu0 %v4828_v22 }
 0x36f   :  { %3520 = vmatprep.subr.bf16.mxu0 %v4833_v23 }
 0x372   :  { %3521 = vmatpush1.bf16.msra.mxu0 %v4831_v25 }
 0x373   :  { %3522 = vmatprep.subr.bf16.mxu0 %v4836_v26 }
 0x376   :  { %3523 = vmatpush1.bf16.msra.mxu0 %v4834_v28 }
 0x377   :  { %3524 = vmatprep.subr.bf16.mxu0 %v4839_v29 }
 0x37a   :  { %3525 = vmatpush1.bf16.msra.mxu0 %v4837_v31 }
 0x37b   :  { %3526 = vmatprep.subr.bf16.mxu0 %v4842_v32 }
 0x37e   :  { %3527 = vmatpush1.bf16.msra.mxu0 %v4840_v4 }
 0x37f   :  { %3528 = vmatprep.subr.bf16.mxu0 %v4845_v33 }
 0x382   :  { %3529 = vmatpush1.bf16.msra.mxu0 %v4843_v14 }
 0x383   :  { %3530 = vmatprep.subr.bf16.mxu0 %v4848_v34 }
 0x386   :  { %3531 = vmatpush1.bf16.msra.mxu0 %v4846_v35 }
 0x387   :  { %3532 = vmatprep.subr.bf16.mxu0 %v4851_v36 }
 0x38a   :  { %3533 = vmatpush1.bf16.msra.mxu0 %v4849_v59 }
 0x38b   :  { %3534 = vmatprep.subr.bf16.mxu0 %v4854_v37 }
 0x38e   :  { %3535 = vmatpush1.bf16.msra.mxu0 %v4852_v38 }
 0x38f   :  { %3536 = vmatprep.subr.bf16.mxu0 %v4857_v39 }
 0x392   :  { %3537 = vmatpush1.bf16.msra.mxu0 %v4855_v40 }
 0x393   :  { %3538 = vmatprep.subr.bf16.mxu0 %v4860_v41 }
 0x396   :  { %3539 = vmatpush1.bf16.msra.mxu0 %v4858_v42 }
 0x397   :  { %3540 = vmatprep.subr.bf16.mxu0 %v4863_v45 }
 0x39a   :  { %3541 = vmatpush1.bf16.msra.mxu0 %v4861_v46 }
 0x39b   :  { %3542 = vmatprep.subr.bf16.mxu0 %v4866_v47 }
 0x39e   :  { %3543 = vmatpush1.bf16.msra.mxu0 %v4864_v48 }
 0x3a1   :  { %3545 = vmatmul.mubr.bf16.vlgmr.msra.gmra.mrb[12].mxu0 %v5395_v8 }
 0x474   :  { %v3546_v54 = vpop.f32.mrb[12].mxu0 }
 0x475   :  { %v4339_v43 = vadd.f32 %v3546_v54, %v3142_v52  ;;  %v3548_v55 = vpop.f32.mrb[13].mxu0 }
 0x476   :  { %v4340_v44 = vadd.f32 %v3548_v55, %v3146_v53  ;;  %v3550_v56 = vpop.f32.mrb[14].mxu0 }
 0x477   :  { %v4341_v57 = vadd.f32 %v3550_v56, %v3142_v52  ;;  %v3552_v27 = vpop.f32.mrb[15].mxu0  ;;  %v3555_v60 = vmax.f32 %v4339_v43, 0.0 }
 0x478   :  { %v4342_v58 = vadd.f32 %v3552_v27, %v3146_v53  ;;  %v3556_v12 = vmax.f32 %v4340_v44, 0.0 }
 0x479   :  { %v3557_v61 = vmax.f32 %v4341_v57, 0.0 }
 0x47a   :  { %v3558_v30 = vmax.f32 %v4342_v58, 0.0 }
 0x47b   :  { %v3559_v62 = vpack.c.bf16 %v3557_v61, %v3555_v60 }
 0x47c   :  { %v3560_v63 = vpack.c.bf16 %v3558_v30, %v3556_v12 }
 0x47e   :  { %3797 = vmatprep.mubr.bf16.mxu1 %v3560_v63 }
 0x47f   :  { %3798 = vmatmul.mubr.bf16.vlgmr.msra.gmra.mrb[12].mxu1 %v3559_v62 }
 0x552   :  { %v3799_v3 = vpop.f32.mrb[12].mxu1 }
 0x553   :  { %v3800_v5 = vadd.f32 %v3799_v3, %v3598_v1  ;;  %v3801_v6 = vpop.f32.mrb[13].mxu1 }
 0x554   :  { %v3802_v7 = vadd.f32 %v3801_v6, %v3602_v2  ;;  %v3803_v8 = vpop.f32.mrb[14].mxu1 }
 0x555   :  { %v3804_v9 = vadd.f32 %v3803_v8, %v3598_v1  ;;  %v3805_v10 = vpop.f32.mrb[15].mxu1  ;;  %v3808_v16 = vmul.f32 %v3800_v5, %v3800_v5 }
 0x556   :  { %v3806_v17 = vadd.f32 %v3805_v10, %v3602_v2  ;;  %v3809_v18 = vmul.f32 %v3802_v7, %v3802_v7 }
 0x557   :  { %v3810_v19 = vmul.f32 %v3804_v9, %v3804_v9 }
 0x558   :  { %v3811_v20 = vmul.f32 %v3806_v17, %v3806_v17  ;;  %v3812_v21 = vadd.f32 %v3809_v18, %v3808_v16 }
 0x55a   :  { %3813 = vadd.xlane.f32.xlu0 %v3812_v21  ;;  %v3815_v22 = vadd.f32 %v3811_v20, %v3810_v19 }
 0x55e   :  { %3816 = vadd.xlane.f32.xlu0 %v3815_v22 }
 0x5e7   :  { %v3814_v23 = vpop.xlane.xlu0 %3813 }
 0x5e8   :  { %v3818_v13 = vmax.f32 %v3814_v23, 1e-24 }
 0x5ea   :  { %4915 = vrsqrt.f32 %v3818_v13 }
 0x5eb   :  { %v3817_v15 = vpop.xlane.xlu0 %3816 }
 0x5ec   :  { %v3819_v25 = vmax.f32 %v3817_v15, 1e-24 }
 0x5ee   :  { %4917 = vrsqrt.f32 %v3819_v25 }
 0x5f4   :  { %v4916_v26 = vpop.eup %4915 }
 0x5f5   :  { %v3822_v28 = vmul.f32 %v4916_v26, %v3800_v5  ;;  %v3823_v29 = vmul.f32 %v4916_v26, %v3802_v7 }
 0x5f7   :  { %3826 = vst [vmem:[#allocation17] sm:$0xff] %v3822_v28  ;;  %3827 = vst [vmem:[#allocation17 + $0x8] sm:$0xff] %v3823_v29 }
 0x5f8   :  { %v4918_v31 = vpop.eup %4917 }
 0x5f9   :  { %v3824_v32 = vmul.f32 %v4918_v31, %v3804_v9  ;;  %v3825_v4 = vmul.f32 %v4918_v31, %v3806_v17 }
 0x5fb   :  { %3828 = vst [vmem:[#allocation17 + $0x10] sm:$0xff] %v3824_v32  ;;  %3829 = vst [vmem:[#allocation17 + $0x18] sm:$0xff] %v3825_v4 }
 0x5fc   :  { %5128 = shalt.err (!%p5125_p6)
}
 0x5fd   :  { %s5129_s24 = scalar_lea.hbm %s5426_s9, 512 }
 0x5fe   :  { %p5130_p7 = scmp.ne.s32.totalorder %s5426_s9, %s5129_s24  ;;  %p5133_p8 = scmp.lt.u32.totalorder %s5129_s24, %s5426_s9 }
 0x600   :  { %p5135_p9 = pnand %p5133_p8, %p5130_p7 }
 0x602   :  { %5138 = shalt.err (!%p5135_p9)
}
 0x603   :  { %3841 = dma.vmem_to_hbm [thread:$0]  %s3836_s11, 512, %s5426_s9, [#allocation4], %s5156_s10, %s5156_s10, %s5157_s14  }
 0x604   :  { %5149 = dma.done.wait [#allocation4], 512  }
 0x605   :  { %5150 = vsyncadd [#allocation4], 4294966784 }
 0x606   :  { %3845 = vsyncpa [#allocation3], 1 }
 0x607   :  { %3846 = vsyncpa [#allocation6], 1 }
 0x608   :  { %3847 = vsyncpa [#allocation9], 1 }
 0x609   :  { %3848 = vsyncpa [#allocation12], 1 }
 0x60a   :  { %3849 = vsyncpa [#allocation15], 1 }
 0x60b   :  { %3850 = vsyncpa [#allocation4], 1 }

// kernel: tpu_custom_call.1
= control target key start
LH: loop header
LB: loop body
LE: loop exit
PB: predicated region body
PF: predicated region fallthrough
CT: control target
= control target key end

     0   :  { %14 = vsyncpa [#allocation3], 0  ;;  %s5417_s0 = inlined_call_operand.hbm [shape: f32[16,256], index: 0, kind: input, shape index: {}]   ;;  %s5418_s1 = inlined_call_operand.hbm [shape: bf16[256,1024], index: 1, kind: input, shape index: {}]   ;;  %s5419_s2 = inlined_call_operand.hbm [shape: f32[1,1024], index: 2, kind: input, shape index: {}]   ;;  %s5420_s3 = inlined_call_operand.hbm [shape: bf16[1024,512], index: 3, kind: input, shape index: {}]   ;;  %s5421_s4 = inlined_call_operand.hbm [shape: f32[1,512], index: 4, kind: input, shape index: {}]   ;;  %s5422_s5 = inlined_call_operand.hbm [shape: bf16[512,256], index: 5, kind: input, shape index: {}]   ;;  %s5423_s6 = inlined_call_operand.hbm [shape: f32[1,256], index: 6, kind: input, shape index: {}]   ;;  %s5424_s7 = inlined_call_operand.hbm [shape: bf16[256,256], index: 7, kind: input, shape index: {}]   ;;  %s5425_s8 = inlined_call_operand.hbm [shape: f32[1,256], index: 8, kind: input, shape index: {}]   ;;  %s5426_s9 = inlined_call_operand.hbm [shape: f32[16,256], index: 9, kind: output, shape index: {}]  }
   0x1   :  { %15 = vsyncpa [#allocation6], 0 }
   0x2   :  { %16 = vsyncpa [#allocation9], 0 }
   0x3   :  { %17 = vsyncpa [#allocation12], 0 }
   0x4   :  { %18 = vsyncpa [#allocation15], 0 }
   0x5   :  { %19 = vsyncpa [#allocation4], 0  ;;  %s5151_s30 = smov [#allocation5]   ;;  %s4919_s13 = scalar_lea.hbm %s5418_s1, 16384 }
   0x6   :  { %s37_s10 = sshll.u32 %s5151_s30, 4  ;;  %p4920_p0 = scmp.ne.s32.totalorder %s5418_s1, %s4919_s13  ;;  %s38_s10 = int_to_ptr.vmem [resolvable:$true] %s37_s10 }
   0x7   :  { %p4923_p1 = scmp.lt.u32.totalorder %s4919_s13, %s5418_s1 }
   0x9   :  { %p4925_p2 = pnand %p4923_p1, %p4920_p0 }
   0xb   :  { %4928 = shalt.err (!%p4925_p2)
}
   0xc   :  { %s4929_s18 = scalar_lea.vmem %s38_s10, 16384  ;;  %p4934_p4 = scmp.lt.s32.totalorder %s38_s10, %s38_s10 }
   0xd   :  { %p4930_p3 = scmp.ne.s32.totalorder %s38_s10, %s4929_s18  ;;  %p4935_p5 = scmp.lt.s32.totalorder %s4929_s18, %s4929_s18 }
   0xf   :  { %p4936_p6 = por %p4935_p5, %p4934_p4 }
  0x11   :  { %p4937_p7 = pnand %p4936_p6, %p4930_p3 }
  0x13   :  { %4940 = shalt.err (!%p4937_p7)
}
  0x14   :  { %s5152_s19 = smov 512   ;;  %s5153_s20 = smov 32  }
  0x15   :  { %43 = dma.hbm_to_vmem [thread:$0]  %s5418_s1, 16384, %s38_s10, [#allocation6], %s5152_s19, %s5152_s19, %s5153_s20  }
  0x16   :  { %s5154_s23 = smov [#allocation8]   ;;  %s5155_s25 = smov [#allocation11]  }
  0x17   :  { %s59_s24 = sshll.u32 %s5154_s23, 4  ;;  %s81_s26 = sshll.u32 %s5155_s25, 4  ;;  %s60_s24 = int_to_ptr.vmem [resolvable:$true] %s59_s24  ;;  %s82_s26 = int_to_ptr.vmem [resolvable:$true] %s81_s26 }
  0x18   :  { %s4941_s29 = scalar_lea.hbm %s5420_s3, 32768 }
  0x19   :  { %p4942_p8 = scmp.ne.s32.totalorder %s5420_s3, %s4941_s29  ;;  %p4945_p9 = scmp.lt.u32.totalorder %s4941_s29, %s5420_s3 }
  0x1b   :  { %p4947_p10 = pnand %p4945_p9, %p4942_p8 }
  0x1d   :  { %4950 = shalt.err (!%p4947_p10)
}
  0x1e   :  { %s4951_s1 = scalar_lea.vmem %s60_s24, 32768  ;;  %p4956_p12 = scmp.lt.s32.totalorder %s60_s24, %s60_s24 }
  0x1f   :  { %p4952_p11 = scmp.ne.s32.totalorder %s60_s24, %s4951_s1  ;;  %p4957_p13 = scmp.lt.s32.totalorder %s4951_s1, %s4951_s1 }
  0x21   :  { %p4958_p0 = por %p4957_p13, %p4956_p12 }
  0x23   :  { %p4959_p1 = pnand %p4958_p0, %p4952_p11 }
  0x25   :  { %4962 = shalt.err (!%p4959_p1)
}
  0x26   :  { %s5156_s10 = smov 256   ;;  %s5157_s14 = smov 16  }
  0x27   :  { %65 = dma.hbm_to_vmem [thread:$0]  %s5420_s3, 32768, %s60_s24, [#allocation9], %s5156_s10, %s5156_s10, %s5157_s14  }
  0x28   :  { %s4963_s19 = scalar_lea.hbm %s5422_s5, 8192 }
  0x29   :  { %p4964_p2 = scmp.ne.s32.totalorder %s5422_s5, %s4963_s19  ;;  %p4967_p3 = scmp.lt.u32.totalorder %s4963_s19, %s5422_s5 }
  0x2b   :  { %p4969_p4 = pnand %p4967_p3, %p4964_p2 }
  0x2d   :  { %4972 = shalt.err (!%p4969_p4)
}
  0x2e   :  { %s4973_s25 = scalar_lea.vmem %s82_s26, 8192  ;;  %p4978_p6 = scmp.lt.s32.totalorder %s82_s26, %s82_s26 }
  0x2f   :  { %p4974_p5 = scmp.ne.s32.totalorder %s82_s26, %s4973_s25  ;;  %p4979_p7 = scmp.lt.s32.totalorder %s4973_s25, %s4973_s25 }
  0x31   :  { %p4980_p8 = por %p4979_p7, %p4978_p6 }
  0x33   :  { %p4981_p9 = pnand %p4980_p8, %p4974_p5 }
  0x35   :  { %4984 = shalt.err (!%p4981_p9)
}
  0x36   :  { %s5158_s3 = smov 128   ;;  %s5159_s24 = smov 8  }
  0x37   :  { %87 = dma.hbm_to_vmem [thread:$0]  %s5422_s5, 8192, %s82_s26, [#allocation12], %s5158_s3, %s5158_s3, %s5159_s24  }
  0x38   :  { %s5160_s29 = smov [#allocation14]   ;;  %s5161_s11 = smov [#allocation2]  }
  0x39   :  { %s103_s30 = sshll.u32 %s5160_s29, 4  ;;  %s25_s12 = sshll.u32 %s5161_s11, 4  ;;  %s104_s30 = int_to_ptr.vmem [resolvable:$true] %s103_s30  ;;  %s26_s12 = int_to_ptr.vmem [resolvable:$true] %s25_s12 }
  0x3a   :  { %s4985_s15 = scalar_lea.hbm %s5424_s7, 4096 }
  0x3b   :  { %p4986_p10 = scmp.ne.s32.totalorder %s5424_s7, %s4985_s15  ;;  %p4989_p11 = scmp.lt.u32.totalorder %s4985_s15, %s5424_s7 }
  0x3d   :  { %p4991_p12 = pnand %p4989_p11, %p4986_p10 }
  0x3f   :  { %4994 = shalt.err (!%p4991_p12)
}
  0x40   :  { %s4995_s5 = scalar_lea.vmem %s104_s30, 4096  ;;  %p5000_p0 = scmp.lt.s32.totalorder %s104_s30, %s104_s30 }
  0x41   :  { %p4996_p13 = scmp.ne.s32.totalorder %s104_s30, %s4995_s5  ;;  %p5001_p1 = scmp.lt.s32.totalorder %s4995_s5, %s4995_s5 }
  0x43   :  { %p5002_p2 = por %p5001_p1, %p5000_p0 }
  0x45   :  { %p5003_p3 = pnand %p5002_p2, %p4996_p13 }
  0x47   :  { %5006 = shalt.err (!%p5003_p3)
}
  0x48   :  { %109 = dma.hbm_to_vmem [thread:$0]  %s5424_s7, 4096, %s104_s30, [#allocation15], %s5158_s3, %s5158_s3, %s5159_s24  }
  0x49   :  { %s5007_s23 = scalar_lea.hbm %s5417_s0, 512 }
  0x4a   :  { %p5008_p4 = scmp.ne.s32.totalorder %s5417_s0, %s5007_s23  ;;  %p5011_p5 = scmp.lt.u32.totalorder %s5007_s23, %s5417_s0 }
  0x4c   :  { %p5013_p6 = pnand %p5011_p5, %p5008_p4 }
  0x4e   :  { %5016 = shalt.err (!%p5013_p6)
}
  0x4f   :  { %s5017_s11 = scalar_lea.vmem %s26_s12, 512  ;;  %p5022_p8 = scmp.lt.s32.totalorder %s26_s12, %s26_s12 }
  0x50   :  { %p5018_p7 = scmp.ne.s32.totalorder %s26_s12, %s5017_s11  ;;  %p5023_p9 = scmp.lt.s32.totalorder %s5017_s11, %s5017_s11 }
  0x52   :  { %p5024_p10 = por %p5023_p9, %p5022_p8 }
  0x54   :  { %p5025_p11 = pnand %p5024_p10, %p5018_p7 }
  0x56   :  { %5028 = shalt.err (!%p5025_p11)
}
  0x57   :  { %31 = dma.hbm_to_vmem [thread:$0]  %s5417_s0, 512, %s26_s12, [#allocation3], %s5156_s10, %s5156_s10, %s5157_s14  }
  0x58   :  { %s5162_s24 = smov [#allocation7]   ;;  %s5163_s13 = smov [#allocation10]  }
  0x59   :  { %s50_s30 = sshll.u32 %s5162_s24, 4  ;;  %s72_s1 = sshll.u32 %s5163_s13, 4  ;;  %s51_s30 = int_to_ptr.vmem [resolvable:$true] %s50_s30  ;;  %s73_s1 = int_to_ptr.vmem [resolvable:$true] %s72_s1 }
  0x5a   :  { %s5029_s17 = scalar_lea.hbm %s5419_s2, 128 }
  0x5b   :  { %p5030_p12 = scmp.ne.s32.totalorder %s5419_s2, %s5029_s17  ;;  %p5033_p13 = scmp.lt.u32.totalorder %s5029_s17, %s5419_s2 }
  0x5d   :  { %p5035_p0 = pnand %p5033_p13, %p5030_p12 }
  0x5f   :  { %5038 = shalt.err (!%p5035_p0)
}
  0x60   :  { %s5039_s0 = scalar_lea.vmem %s51_s30, 128  ;;  %p5044_p2 = scmp.lt.s32.totalorder %s51_s30, %s51_s30 }
  0x61   :  { %p5040_p1 = scmp.ne.s32.totalorder %s51_s30, %s5039_s0  ;;  %p5045_p3 = scmp.lt.s32.totalorder %s5039_s0, %s5039_s0 }
  0x63   :  { %p5046_p4 = por %p5045_p3, %p5044_p2 }
  0x65   :  { %p5047_p5 = pnand %p5046_p4, %p5040_p1 }
  0x67   :  { %5050 = shalt.err (!%p5047_p5)
}
  0x68   :  { %53 = dma.hbm_to_vmem [thread:$0]  %s5419_s2, 128, %s51_s30, [#allocation6]  }
  0x69   :  { %s5051_s23 = scalar_lea.hbm %s5421_s4, 64 }
  0x6a   :  { %p5052_p6 = scmp.ne.s32.totalorder %s5421_s4, %s5051_s23  ;;  %p5055_p7 = scmp.lt.u32.totalorder %s5051_s23, %s5421_s4 }
  0x6c   :  { %p5057_p8 = pnand %p5055_p7, %p5052_p6 }
  0x6e   :  { %5060 = shalt.err (!%p5057_p8)
}
  0x6f   :  { %s5061_s11 = scalar_lea.vmem %s73_s1, 64  ;;  %p5066_p10 = scmp.lt.s32.totalorder %s73_s1, %s73_s1 }
  0x70   :  { %p5062_p9 = scmp.ne.s32.totalorder %s73_s1, %s5061_s11  ;;  %p5067_p11 = scmp.lt.s32.totalorder %s5061_s11, %s5061_s11 }
  0x72   :  { %p5068_p12 = por %p5067_p11, %p5066_p10 }
  0x74   :  { %p5069_p13 = pnand %p5068_p12, %p5062_p9 }
  0x76   :  { %5072 = shalt.err (!%p5069_p13)
}
  0x77   :  { %75 = dma.hbm_to_vmem [thread:$0]  %s5421_s4, 64, %s73_s1, [#allocation9]  }
  0x78   :  { %s5164_s3 = smov [#allocation13]   ;;  %s5165_s30 = smov [#allocation16]  }
  0x79   :  { %s94_s24 = sshll.u32 %s5164_s3, 4  ;;  %s116_s13 = sshll.u32 %s5165_s30, 4  ;;  %s95_s24 = int_to_ptr.vmem [resolvable:$true] %s94_s24  ;;  %s117_s13 = int_to_ptr.vmem [resolvable:$true] %s116_s13 }
  0x7a   :  { %s5073_s17 = scalar_lea.hbm %s5423_s6, 32 }
  0x7b   :  { %p5074_p0 = scmp.ne.s32.totalorder %s5423_s6, %s5073_s17  ;;  %p5077_p1 = scmp.lt.u32.totalorder %s5073_s17, %s5423_s6 }
  0x7d   :  { %p5079_p2 = pnand %p5077_p1, %p5074_p0 }
  0x7f   :  { %5082 = shalt.err (!%p5079_p2)
}
  0x80   :  { %s5083_s4 = scalar_lea.vmem %s95_s24, 32  ;;  %p5088_p4 = scmp.lt.s32.totalorder %s95_s24, %s95_s24 }
  0x81   :  { %p5084_p3 = scmp.ne.s32.totalorder %s95_s24, %s5083_s4  ;;  %p5089_p5 = scmp.lt.s32.totalorder %s5083_s4, %s5083_s4 }
  0x83   :  { %p5090_p6 = por %p5089_p5, %p5088_p4 }
  0x85   :  { %p5091_p7 = pnand %p5090_p6, %p5084_p3 }
  0x87   :  { %5094 = shalt.err (!%p5091_p7)
}
  0x88   :  { %97 = dma.hbm_to_vmem [thread:$0]  %s5423_s6, 32, %s95_s24, [#allocation12]  }
  0x89   :  { %s5095_s21 = scalar_lea.hbm %s5425_s8, 32 }
  0x8a   :  { %p5096_p8 = scmp.ne.s32.totalorder %s5425_s8, %s5095_s21  ;;  %p5099_p9 = scmp.lt.u32.totalorder %s5095_s21, %s5425_s8 }
  0x8c   :  { %p5101_p10 = pnand %p5099_p9, %p5096_p8 }
  0x8e   :  { %5104 = shalt.err (!%p5101_p10)
}
  0x8f   :  { %s5105_s28 = scalar_lea.vmem %s117_s13, 32  ;;  %p5110_p12 = scmp.lt.s32.totalorder %s117_s13, %s117_s13 }
  0x90   :  { %p5106_p11 = scmp.ne.s32.totalorder %s117_s13, %s5105_s28  ;;  %p5111_p13 = scmp.lt.s32.totalorder %s5105_s28, %s5105_s28 }
  0x92   :  { %p5112_p0 = por %p5111_p13, %p5110_p12 }
  0x94   :  { %p5113_p1 = pnand %p5112_p0, %p5106_p11 }
  0x96   :  { %5116 = shalt.err (!%p5113_p1)
}
  0x97   :  { %119 = dma.hbm_to_vmem [thread:$0]  %s5425_s8, 32, %s117_s13, [#allocation15]  }
  0x98   :  { %5139 = dma.done.wait [#allocation3], 512  }
  0x99   :  { %5140 = vsyncadd [#allocation3], 4294966784 }
  0x9a   :  { %5141 = dma.done.wait [#allocation6], 16512  }
  0x9b   :  { %5142 = vsyncadd [#allocation6], 4294950784 }
  0x9c   :  { %5143 = dma.done.wait [#allocation9], 32832  }
  0x9d   :  { %5144 = vsyncadd [#allocation9], 4294934464 }
  0x9e   :  { %5145 = dma.done.wait [#allocation12], 8224  }
  0x9f   :  { %5146 = vsyncadd [#allocation12], 4294959072 }
  0xa0   :  { %5147 = dma.done.wait [#allocation15], 4128  }
  0xa1   :  { %5148 = vsyncadd [#allocation15], 4294963168  ;;  %v153_v0 = vld [vmem:[#allocation5] sm:$0xff]  ;;  %v154_v17 = vld [vmem:[#allocation5 + $0x8] sm:$0xff]  ;;  %s5166_s8 = smov [#allocation17]  }
  0xa2   :  { %v157_v1 = vld [vmem:[#allocation5 + $0x20] sm:$0xff]  ;;  %v158_v18 = vld [vmem:[#allocation5 + $0x28] sm:$0xff]  ;;  %v150_v20 = vld [vmem:[#allocation2 + $0x18] sm:$0xff]  ;;  %s3835_s11 = sshll.u32 %s5166_s8, 4  ;;  %s3836_s11 = int_to_ptr.vmem [resolvable:$true] %s3835_s11 }
  0xa3   :  { %v161_v2 = vld [vmem:[#allocation5 + $0x40] sm:$0xff]  ;;  %v3852_v3 = vcombine.high %v153_v0, %v157_v1  ;;  %v3851_v4 = vcombine.low %v153_v0, %v157_v1  ;;  %v148_v19 = vld [vmem:[#allocation2 + $0x8] sm:$0xff]  ;;  %v3854_v22 = vcombine.high %v154_v17, %v158_v18  ;;  %v3853_v23 = vcombine.low %v154_v17, %v158_v18  ;;  %s5117_s2 = scalar_lea.vmem %s3836_s11, 512  ;;  %p5122_p3 = scmp.lt.s32.totalorder %s3836_s11, %s3836_s11 }
  0xa4   :  { %v165_v5 = vld [vmem:[#allocation5 + $0x60] sm:$0xff]  ;;  %v5331_v24 = vpack.c.bf16 %v150_v20, %v148_v19  ;;  %v162_v25 = vld [vmem:[#allocation5 + $0x48] sm:$0xff]  ;;  %p5118_p2 = scmp.ne.s32.totalorder %s3836_s11, %s5117_s2  ;;  %p5123_p4 = scmp.lt.s32.totalorder %s5117_s2, %s5117_s2 }
  0xa5   :  { %v3860_v6 = vcombine.high %v161_v2, %v165_v5  ;;  %v169_v7 = vld [vmem:[#allocation5 + $0x80] sm:$0xff]  ;;  %963 = vmatprep.subr.bf16.mxu0 %v3852_v3  ;;  %v3859_v9 = vcombine.low %v161_v2, %v165_v5  ;;  %v166_v27 = vld [vmem:[#allocation5 + $0x68] sm:$0xff]  ;;  %1006 = vmatprep.subr.bf16.mxu1 %v3854_v22 }
  0xa6   :  { %v173_v8 = vld [vmem:[#allocation5 + $0xa0] sm:$0xff]  ;;  %964 = vmatpush1.bf16.msra.mxu0 %v3851_v4  ;;  %v170_v28 = vld [vmem:[#allocation5 + $0x88] sm:$0xff]  ;;  %995 = vmatprep.mubr.bf16.mxu0 %v5331_v24  ;;  %v3862_v32 = vcombine.high %v162_v25, %v166_v27  ;;  %v3861_v33 = vcombine.low %v162_v25, %v166_v27  ;;  %p5124_p5 = por %p5123_p4, %p5122_p3 }
  0xa7   :  { %965 = vmatprep.subr.bf16.mxu0 %v3860_v6  ;;  %v3868_v10 = vcombine.high %v169_v7, %v173_v8  ;;  %v177_v11 = vld [vmem:[#allocation5 + $0xc0] sm:$0xff]  ;;  %v3867_v13 = vcombine.low %v169_v7, %v173_v8  ;;  %v174_v29 = vld [vmem:[#allocation5 + $0xa8] sm:$0xff]  ;;  %1007 = vmatpush1.bf16.msra.mxu1 %v3853_v23 }
  0xa8   :  { %v181_v12 = vld [vmem:[#allocation5 + $0xe0] sm:$0xff]  ;;  %1038 = vmatprep.mubr.bf16.mxu1 %v5331_v24  ;;  %1008 = vmatprep.subr.bf16.mxu1 %v3862_v32  ;;  %v3870_v35 = vcombine.high %v170_v28, %v174_v29  ;;  %v178_v37 = vld [vmem:[#allocation5 + $0xc8] sm:$0xff]  ;;  %v3869_v41 = vcombine.low %v170_v28, %v174_v29  ;;  %p5125_p6 = pnand %p5124_p5, %p5118_p2 }
  0xa9   :  { %v3876_v14 = vcombine.high %v177_v11, %v181_v12  ;;  %v185_v15 = vld [vmem:[#allocation5 + $0x100] sm:$0xff]  ;;  %v3875_v21 = vcombine.low %v177_v11, %v181_v12  ;;  %v182_v38 = vld [vmem:[#allocation5 + $0xe8] sm:$0xff] }
  0xaa   :  { %966 = vmatpush1.bf16.msra.mxu0 %v3859_v9  ;;  %v189_v16 = vld [vmem:[#allocation5 + $0x120] sm:$0xff]  ;;  %v3878_v43 = vcombine.high %v178_v37, %v182_v38  ;;  %v186_v45 = vld [vmem:[#allocation5 + $0x108] sm:$0xff]  ;;  %v3877_v49 = vcombine.low %v178_v37, %v182_v38 }
  0xab   :  { %967 = vmatprep.subr.bf16.mxu0 %v3868_v10  ;;  %v3884_v26 = vcombine.high %v185_v15, %v189_v16  ;;  %v193_v30 = vld [vmem:[#allocation5 + $0x140] sm:$0xff]  ;;  %v3883_v34 = vcombine.low %v185_v15, %v189_v16  ;;  %1009 = vmatpush1.bf16.msra.mxu1 %v3861_v33  ;;  %v190_v46 = vld [vmem:[#allocation5 + $0x128] sm:$0xff] }
  0xac   :  { %v197_v31 = vld [vmem:[#allocation5 + $0x160] sm:$0xff]  ;;  %1010 = vmatprep.subr.bf16.mxu1 %v3870_v35  ;;  %v3886_v51 = vcombine.high %v186_v45, %v190_v46  ;;  %v194_v53 = vld [vmem:[#allocation5 + $0x148] sm:$0xff]  ;;  %v3885_v57 = vcombine.low %v186_v45, %v190_v46 }
  0xad   :  { %v3892_v36 = vcombine.high %v193_v30, %v197_v31  ;;  %v201_v39 = vld [vmem:[#allocation5 + $0x180] sm:$0xff]  ;;  %v3891_v42 = vcombine.low %v193_v30, %v197_v31  ;;  %v198_v54 = vld [vmem:[#allocation5 + $0x168] sm:$0xff] }
  0xae   :  { %968 = vmatpush1.bf16.msra.mxu0 %v3867_v13  ;;  %v205_v40 = vld [vmem:[#allocation5 + $0x1a0] sm:$0xff]  ;;  %v3894_v59 = vcombine.high %v194_v53, %v198_v54  ;;  %v202_v61 = vld [vmem:[#allocation5 + $0x188] sm:$0xff]  ;;  %v3893_v1 = vcombine.low %v194_v53, %v198_v54 }
  0xaf   :  { %969 = vmatprep.subr.bf16.mxu0 %v3876_v14  ;;  %v3900_v44 = vcombine.high %v201_v39, %v205_v40  ;;  %v209_v47 = vld [vmem:[#allocation5 + $0x1c0] sm:$0xff]  ;;  %1011 = vmatpush1.bf16.msra.mxu1 %v3869_v41  ;;  %v3899_v50 = vcombine.low %v201_v39, %v205_v40  ;;  %v206_v62 = vld [vmem:[#allocation5 + $0x1a8] sm:$0xff] }
  0xb0   :  { %v213_v48 = vld [vmem:[#allocation5 + $0x1e0] sm:$0xff]  ;;  %1012 = vmatprep.subr.bf16.mxu1 %v3878_v43  ;;  %v3902_v3 = vcombine.high %v202_v61, %v206_v62  ;;  %v210_v5 = vld [vmem:[#allocation5 + $0x1c8] sm:$0xff]  ;;  %v3901_v9 = vcombine.low %v202_v61, %v206_v62 }
  0xb1   :  { %v3908_v52 = vcombine.high %v209_v47, %v213_v48  ;;  %v217_v55 = vld [vmem:[#allocation5 + $0x200] sm:$0xff]  ;;  %v3907_v58 = vcombine.low %v209_v47, %v213_v48  ;;  %v214_v6 = vld [vmem:[#allocation5 + $0x1e8] sm:$0xff] }
  0xb2   :  { %970 = vmatpush1.bf16.msra.mxu0 %v3875_v21  ;;  %v221_v56 = vld [vmem:[#allocation5 + $0x220] sm:$0xff]  ;;  %v3910_v11 = vcombine.high %v210_v5, %v214_v6  ;;  %v218_v13 = vld [vmem:[#allocation5 + $0x208] sm:$0xff]  ;;  %v3909_v17 = vcombine.low %v210_v5, %v214_v6 }
  0xb3   :  { %971 = vmatprep.subr.bf16.mxu0 %v3884_v26  ;;  %1013 = vmatpush1.bf16.msra.mxu1 %v3877_v49  ;;  %v3916_v60 = vcombine.high %v217_v55, %v221_v56  ;;  %v225_v63 = vld [vmem:[#allocation5 + $0x240] sm:$0xff]  ;;  %v3915_v2 = vcombine.low %v217_v55, %v221_v56  ;;  %v222_v14 = vld [vmem:[#allocation5 + $0x228] sm:$0xff]  ;;  %v155_v56 = vld [vmem:[#allocation5 + $0x10] sm:$0xff] }
  0xb4   :  { %1014 = vmatprep.subr.bf16.mxu1 %v3886_v51  ;;  %v229_v0 = vld [vmem:[#allocation5 + $0x260] sm:$0xff]  ;;  %v3918_v19 = vcombine.high %v218_v13, %v222_v14  ;;  %v226_v21 = vld [vmem:[#allocation5 + $0x248] sm:$0xff]  ;;  %v3917_v26 = vcombine.low %v218_v13, %v222_v14 }
  0xb5   :  { %v3924_v4 = vcombine.high %v225_v63, %v229_v0  ;;  %v233_v7 = vld [vmem:[#allocation5 + $0x280] sm:$0xff]  ;;  %v3923_v10 = vcombine.low %v225_v63, %v229_v0  ;;  %v230_v22 = vld [vmem:[#allocation5 + $0x268] sm:$0xff] }
  0xb6   :  { %972 = vmatpush1.bf16.msra.mxu0 %v3883_v34  ;;  %v237_v8 = vld [vmem:[#allocation5 + $0x2a0] sm:$0xff]  ;;  %v3926_v28 = vcombine.high %v226_v21, %v230_v22  ;;  %v234_v29 = vld [vmem:[#allocation5 + $0x288] sm:$0xff]  ;;  %v3925_v34 = vcombine.low %v226_v21, %v230_v22 }
  0xb7   :  { %973 = vmatprep.subr.bf16.mxu0 %v3892_v36  ;;  %1015 = vmatpush1.bf16.msra.mxu1 %v3885_v57  ;;  %v3932_v12 = vcombine.high %v233_v7, %v237_v8  ;;  %v241_v15 = vld [vmem:[#allocation5 + $0x2c0] sm:$0xff]  ;;  %v3931_v18 = vcombine.low %v233_v7, %v237_v8  ;;  %v238_v31 = vld [vmem:[#allocation5 + $0x2a8] sm:$0xff]  ;;  %v159_v57 = vld [vmem:[#allocation5 + $0x30] sm:$0xff] }
  0xb8   :  { %1016 = vmatprep.subr.bf16.mxu1 %v3894_v59  ;;  %v245_v16 = vld [vmem:[#allocation5 + $0x2e0] sm:$0xff]  ;;  %v3934_v36 = vcombine.high %v234_v29, %v238_v31  ;;  %v242_v37 = vld [vmem:[#allocation5 + $0x2c8] sm:$0xff]  ;;  %v149_v59 = vld [vmem:[#allocation2 + $0x10] sm:$0xff]  ;;  %v3855_v8 = vcombine.low %v155_v56, %v159_v57 }
  0xb9   :  { %v3940_v20 = vcombine.high %v241_v15, %v245_v16  ;;  %v249_v23 = vld [vmem:[#allocation5 + $0x300] sm:$0xff]  ;;  %v3939_v27 = vcombine.low %v241_v15, %v245_v16  ;;  %v246_v39 = vld [vmem:[#allocation5 + $0x2e8] sm:$0xff]  ;;  %v156_v16 = vld [vmem:[#allocation5 + $0x18] sm:$0xff] }
  0xba   :  { %974 = vmatpush1.bf16.msra.mxu0 %v3891_v42  ;;  %v253_v25 = vld [vmem:[#allocation5 + $0x320] sm:$0xff]  ;;  %v3933_v42 = vcombine.low %v234_v29, %v238_v31  ;;  %v250_v45 = vld [vmem:[#allocation5 + $0x308] sm:$0xff]  ;;  %v191_v29 = vld [vmem:[#allocation5 + $0x130] sm:$0xff] }
  0xbb   :  { %975 = vmatprep.subr.bf16.mxu0 %v3900_v44  ;;  %1017 = vmatpush1.bf16.msra.mxu1 %v3893_v1  ;;  %v3948_v30 = vcombine.high %v249_v23, %v253_v25  ;;  %v257_v32 = vld [vmem:[#allocation5 + $0x340] sm:$0xff]  ;;  %v3947_v35 = vcombine.low %v249_v23, %v253_v25  ;;  %v3942_v44 = vcombine.high %v242_v37, %v246_v39  ;;  %v254_v47 = vld [vmem:[#allocation5 + $0x328] sm:$0xff]  ;;  %v164_v25 = vld [vmem:[#allocation5 + $0x58] sm:$0xff] }
  0xbc   :  { %1018 = vmatprep.subr.bf16.mxu1 %v3902_v3  ;;  %v261_v33 = vld [vmem:[#allocation5 + $0x360] sm:$0xff]  ;;  %v258_v53 = vld [vmem:[#allocation5 + $0x348] sm:$0xff]  ;;  %v3856_v1 = vcombine.high %v155_v56, %v159_v57  ;;  %v167_v3 = vld [vmem:[#allocation5 + $0x70] sm:$0xff] }
  0xbd   :  { %v3956_v38 = vcombine.high %v257_v32, %v261_v33  ;;  %v265_v40 = vld [vmem:[#allocation5 + $0x380] sm:$0xff]  ;;  %v3955_v43 = vcombine.low %v257_v32, %v261_v33  ;;  %v262_v55 = vld [vmem:[#allocation5 + $0x368] sm:$0xff]  ;;  %v172_v33 = vld [vmem:[#allocation5 + $0x98] sm:$0xff] }
  0xbe   :  { %976 = vmatpush1.bf16.msra.mxu0 %v3899_v50  ;;  %v269_v41 = vld [vmem:[#allocation5 + $0x3a0] sm:$0xff]  ;;  %v3941_v50 = vcombine.low %v242_v37, %v246_v39  ;;  %v3958_v62 = vcombine.high %v258_v53, %v262_v55  ;;  %v266_v63 = vld [vmem:[#allocation5 + $0x388] sm:$0xff]  ;;  %v3957_v5 = vcombine.low %v258_v53, %v262_v55  ;;  %v199_v37 = vld [vmem:[#allocation5 + $0x170] sm:$0xff] }
  0xbf   :  { %977 = vmatprep.subr.bf16.mxu0 %v3908_v52  ;;  %1019 = vmatpush1.bf16.msra.mxu1 %v3901_v9  ;;  %v3964_v46 = vcombine.high %v265_v40, %v269_v41  ;;  %v273_v48 = vld [vmem:[#allocation5 + $0x3c0] sm:$0xff]  ;;  %v3963_v51 = vcombine.low %v265_v40, %v269_v41  ;;  %v3950_v52 = vcombine.high %v250_v45, %v254_v47  ;;  %v270_v0 = vld [vmem:[#allocation5 + $0x3a8] sm:$0xff]  ;;  %v203_v40 = vld [vmem:[#allocation5 + $0x190] sm:$0xff] }
  0xc0   :  { %1020 = vmatprep.subr.bf16.mxu1 %v3910_v11  ;;  %v277_v49 = vld [vmem:[#allocation5 + $0x3e0] sm:$0xff]  ;;  %v3966_v6 = vcombine.high %v266_v63, %v270_v0  ;;  %v274_v7 = vld [vmem:[#allocation5 + $0x3c8] sm:$0xff]  ;;  %v171_v11 = vld [vmem:[#allocation5 + $0x90] sm:$0xff]  ;;  %v3965_v13 = vcombine.low %v266_v63, %v270_v0 }
  0xc1   :  { %v3972_v54 = vcombine.high %v273_v48, %v277_v49  ;;  %v3971_v61 = vcombine.low %v273_v48, %v277_v49  ;;  %v278_v9 = vld [vmem:[#allocation5 + $0x3e8] sm:$0xff]  ;;  %v207_v41 = vld [vmem:[#allocation5 + $0x1b0] sm:$0xff]  ;;  %v192_v48 = vld [vmem:[#allocation5 + $0x138] sm:$0xff] }
  0xc2   :  { %978 = vmatpush1.bf16.msra.mxu0 %v3907_v58  ;;  %v147_v58 = vld [vmem:[#allocation2] sm:$0xff]  ;;  %v3974_v14 = vcombine.high %v274_v7, %v278_v9  ;;  %v3973_v21 = vcombine.low %v274_v7, %v278_v9  ;;  %v200_v55 = vld [vmem:[#allocation5 + $0x178] sm:$0xff]  ;;  %v3903_v56 = vcombine.low %v203_v40, %v207_v41  ;;  %v219_v57 = vld [vmem:[#allocation5 + $0x210] sm:$0xff] }
  0xc3   :  { %979 = vmatprep.subr.bf16.mxu0 %v3916_v60  ;;  %1021 = vmatpush1.bf16.msra.mxu1 %v3909_v17  ;;  %v3949_v60 = vcombine.low %v250_v45, %v254_v47  ;;  %v184_v45 = vld [vmem:[#allocation5 + $0xf8] sm:$0xff] }
  0xc4   :  { %1022 = vmatprep.subr.bf16.mxu1 %v3918_v19  ;;  %v179_v19 = vld [vmem:[#allocation5 + $0xd0] sm:$0xff]  ;;  %v188_v47 = vld [vmem:[#allocation5 + $0x118] sm:$0xff] }
  0xc5   :  { %v208_v63 = vld [vmem:[#allocation5 + $0x1b8] sm:$0xff] }
  0xc6   :  { %980 = vmatpush1.bf16.msra.mxu0 %v3915_v2  ;;  %v163_v2 = vld [vmem:[#allocation5 + $0x50] sm:$0xff]  ;;  %v212_v7 = vld [vmem:[#allocation5 + $0x1d8] sm:$0xff] }
  0xc7   :  { %981 = vmatprep.subr.bf16.mxu0 %v3924_v4  ;;  %1023 = vmatpush1.bf16.msra.mxu1 %v3917_v26  ;;  %v5335_v4 = vpack.c.bf16 %v149_v59, %v147_v58  ;;  %v3863_v15 = vcombine.low %v163_v2, %v167_v3  ;;  %v223_v58 = vld [vmem:[#allocation5 + $0x230] sm:$0xff]  ;;  %v3890_v59 = vcombine.high %v188_v47, %v192_v48 }
  0xc8   :  { %1024 = vmatprep.subr.bf16.mxu1 %v3926_v28  ;;  %v187_v28 = vld [vmem:[#allocation5 + $0x110] sm:$0xff]  ;;  %v3919_v9 = vcombine.low %v219_v57, %v223_v58 }
  0xc9   :  { %v3887_v39 = vcombine.low %v187_v28, %v191_v29 }
  0xca   :  { %982 = vmatpush1.bf16.msra.mxu0 %v3923_v10  ;;  %v3864_v10 = vcombine.high %v163_v2, %v167_v3  ;;  %v231_v2 = vld [vmem:[#allocation5 + $0x270] sm:$0xff] }
  0xcb   :  { %983 = vmatprep.subr.bf16.mxu0 %v3932_v12  ;;  %1025 = vmatpush1.bf16.msra.mxu1 %v3925_v34  ;;  %v175_v12 = vld [vmem:[#allocation5 + $0xb0] sm:$0xff]  ;;  %v3888_v34 = vcombine.high %v187_v28, %v191_v29 }
  0xcc   :  { %1026 = vmatprep.subr.bf16.mxu1 %v3934_v36  ;;  %v3872_v17 = vcombine.high %v171_v11, %v175_v12  ;;  %v3871_v22 = vcombine.low %v171_v11, %v175_v12  ;;  %v195_v36 = vld [vmem:[#allocation5 + $0x150] sm:$0xff] }
  0xcd   :  { %v3895_v49 = vcombine.low %v195_v36, %v199_v37  ;;  %v239_v11 = vld [vmem:[#allocation5 + $0x2b0] sm:$0xff] }
  0xce   :  { %984 = vmatpush1.bf16.msra.mxu0 %v3931_v18  ;;  %v160_v18 = vld [vmem:[#allocation5 + $0x38] sm:$0xff]  ;;  %v255_v28 = vld [vmem:[#allocation5 + $0x330] sm:$0xff] }
  0xcf   :  { %985 = vmatprep.subr.bf16.mxu0 %v3940_v20  ;;  %1027 = vmatpush1.bf16.msra.mxu1 %v3933_v42  ;;  %v183_v20 = vld [vmem:[#allocation5 + $0xf0] sm:$0xff]  ;;  %v3858_v23 = vcombine.high %v156_v16, %v160_v18 }
  0xd0   :  { %1028 = vmatprep.subr.bf16.mxu1 %v3942_v44  ;;  %v3880_v26 = vcombine.high %v179_v19, %v183_v20  ;;  %v3879_v31 = vcombine.low %v179_v19, %v183_v20  ;;  %v180_v44 = vld [vmem:[#allocation5 + $0xd8] sm:$0xff]  ;;  %v247_v19 = vld [vmem:[#allocation5 + $0x2f0] sm:$0xff] }
  0xd1   :  { %v3881_v53 = vcombine.low %v180_v44, %v184_v45 }
  0xd2   :  { %986 = vmatpush1.bf16.msra.mxu0 %v3939_v27  ;;  %v168_v27 = vld [vmem:[#allocation5 + $0x78] sm:$0xff] }
  0xd3   :  { %987 = vmatprep.subr.bf16.mxu0 %v3948_v30  ;;  %1029 = vmatpush1.bf16.msra.mxu1 %v3941_v50  ;;  %v3857_v30 = vcombine.low %v156_v16, %v160_v18  ;;  %v3866_v32 = vcombine.high %v164_v25, %v168_v27  ;;  %v211_v50 = vld [vmem:[#allocation5 + $0x1d0] sm:$0xff]  ;;  %v224_v16 = vld [vmem:[#allocation5 + $0x238] sm:$0xff] }
  0xd4   :  { %1030 = vmatprep.subr.bf16.mxu1 %v3950_v52  ;;  %v3904_v52 = vcombine.high %v203_v40, %v207_v41  ;;  %v243_v18 = vld [vmem:[#allocation5 + $0x2d0] sm:$0xff]  ;;  %v244_v40 = vld [vmem:[#allocation5 + $0x2d8] sm:$0xff] }
  0xd5   :  { %v248_v41 = vld [vmem:[#allocation5 + $0x2f8] sm:$0xff] }
  0xd6   :  { %988 = vmatpush1.bf16.msra.mxu0 %v3947_v35  ;;  %v176_v35 = vld [vmem:[#allocation5 + $0xb8] sm:$0xff] }
  0xd7   :  { %989 = vmatprep.subr.bf16.mxu0 %v3956_v38  ;;  %1031 = vmatpush1.bf16.msra.mxu1 %v3949_v60  ;;  %v3865_v38 = vcombine.low %v164_v25, %v168_v27  ;;  %v3874_v42 = vcombine.high %v172_v33, %v176_v35  ;;  %v232_v25 = vld [vmem:[#allocation5 + $0x278] sm:$0xff]  ;;  %v251_v27 = vld [vmem:[#allocation5 + $0x310] sm:$0xff] }
  0xd8   :  { %1032 = vmatprep.subr.bf16.mxu1 %v3958_v62  ;;  %v204_v62 = vld [vmem:[#allocation5 + $0x198] sm:$0xff] }
  0xd9   :  { %v3906_v12 = vcombine.high %v204_v62, %v208_v63 }
  0xda   :  { %990 = vmatpush1.bf16.msra.mxu0 %v3955_v43  ;;  %v3896_v43 = vcombine.high %v195_v36, %v199_v37  ;;  %v263_v36 = vld [vmem:[#allocation5 + $0x370] sm:$0xff] }
  0xdb   :  { %991 = vmatprep.subr.bf16.mxu0 %v3964_v46  ;;  %1033 = vmatpush1.bf16.msra.mxu1 %v3957_v5  ;;  %v3873_v46 = vcombine.low %v172_v33, %v176_v35  ;;  %v3920_v5 = vcombine.high %v219_v57, %v223_v58  ;;  %v240_v33 = vld [vmem:[#allocation5 + $0x2b8] sm:$0xff]  ;;  %v259_v35 = vld [vmem:[#allocation5 + $0x350] sm:$0xff] }
  0xdc   :  { %1034 = vmatprep.subr.bf16.mxu1 %v3966_v6 }
  0xde   :  { %992 = vmatpush1.bf16.msra.mxu0 %v3963_v51  ;;  %v215_v51 = vld [vmem:[#allocation5 + $0x1f0] sm:$0xff] }
  0xdf   :  { %993 = vmatprep.subr.bf16.mxu0 %v3972_v54  ;;  %1035 = vmatpush1.bf16.msra.mxu1 %v3965_v13  ;;  %v196_v54 = vld [vmem:[#allocation5 + $0x158] sm:$0xff]  ;;  %v3912_v60 = vcombine.high %v211_v50, %v215_v51  ;;  %v3911_v0 = vcombine.low %v211_v50, %v215_v51  ;;  %v3959_v50 = vcombine.low %v259_v35, %v263_v36  ;;  %v275_v51 = vld [vmem:[#allocation5 + $0x3d0] sm:$0xff] }
  0xe0   :  { %1036 = vmatprep.subr.bf16.mxu1 %v3974_v14  ;;  %v3898_v3 = vcombine.high %v196_v54, %v200_v55  ;;  %v3897_v6 = vcombine.low %v196_v54, %v200_v55  ;;  %v3905_v14 = vcombine.low %v204_v62, %v208_v63  ;;  %v3945_v54 = vcombine.low %v244_v40, %v248_v41  ;;  %v260_v55 = vld [vmem:[#allocation5 + $0x358] sm:$0xff] }
  0xe1   :  { %v272_v62 = vld [vmem:[#allocation5 + $0x3b8] sm:$0xff] }
  0xe2   :  { %994 = vmatpush1.bf16.msra.mxu0 %v3971_v61  ;;  %v3889_v61 = vcombine.low %v188_v47, %v192_v48  ;;  %v252_v48 = vld [vmem:[#allocation5 + $0x318] sm:$0xff] }
  0xe3   :  { %1049 = vmatprep.subr.bf16.mxu0 %v3856_v1  ;;  %1037 = vmatpush1.bf16.msra.mxu1 %v3973_v21  ;;  %v227_v1 = vld [vmem:[#allocation5 + $0x250] sm:$0xff]  ;;  %v4389_v63 = vld [vmem:[#allocation8 + $0x4] ss:$16 sps:$4 sm:$0xff]  }
  0xe4   :  { %1092 = vmatprep.subr.bf16.mxu1 %v3858_v23  ;;  %v3928_v13 = vcombine.high %v227_v1, %v231_v2  ;;  %v228_v23 = vld [vmem:[#allocation5 + $0x258] sm:$0xff] }
  0xe5   :  { %996 = vmatmul.mubr.bf16.vlgmr.msra.gmra.mrb[0].mxu0 %v5335_v4  ;;  %v3930_v37 = vcombine.high %v228_v23, %v232_v25 }
  0xe6   :  { %1050 = vmatpush1.bf16.msra.mxu0 %v3855_v8  ;;  %1081 = vmatprep.mubr.bf16.mxu0 %v5331_v24  ;;  %v216_v8 = vld [vmem:[#allocation5 + $0x1f8] sm:$0xff] }
  0xe7   :  { %1051 = vmatprep.subr.bf16.mxu0 %v3864_v10  ;;  %1039 = vmatmul.mubr.bf16.vlgmr.msra.gmra.mrb[0].mxu1 %v5335_v4  ;;  %v235_v10 = vld [vmem:[#allocation5 + $0x290] sm:$0xff]  ;;  %v3914_v20 = vcombine.high %v212_v7, %v216_v8 }
  0xe8   :  { %1093 = vmatpush1.bf16.msra.mxu1 %v3857_v30  ;;  %1124 = vmatprep.mubr.bf16.mxu1 %v5331_v24  ;;  %v3882_v24 = vcombine.high %v180_v44, %v184_v45  ;;  %v3936_v21 = vcombine.high %v235_v10, %v239_v11  ;;  %v3944_v30 = vcombine.high %v243_v18, %v247_v19  ;;  %v271_v44 = vld [vmem:[#allocation5 + $0x3b0] sm:$0xff] }
  0xe9   :  { %1094 = vmatprep.subr.bf16.mxu1 %v3866_v32  ;;  %v236_v32 = vld [vmem:[#allocation5 + $0x298] sm:$0xff] }
  0xea   :  { %1052 = vmatpush1.bf16.msra.mxu0 %v3863_v15  ;;  %v220_v15 = vld [vmem:[#allocation5 + $0x218] sm:$0xff]  ;;  %v3938_v45 = vcombine.high %v236_v32, %v240_v33  ;;  %v3937_v47 = vcombine.low %v236_v32, %v240_v33  ;;  %v4414_v33 = vld [vmem:[#allocation8 + $0x88] ss:$16 sps:$4 sm:$0xff]  }
  0xeb   :  { %1053 = vmatprep.subr.bf16.mxu0 %v3872_v17  ;;  %v3927_v17 = vcombine.low %v227_v1, %v231_v2  ;;  %v3922_v29 = vcombine.high %v220_v15, %v224_v16  ;;  %v4387_v2 = vld [vmem:[#allocation8] ss:$16 sps:$4 sm:$0xff]  }
  0xec   :  { %1095 = vmatpush1.bf16.msra.mxu1 %v3865_v38  ;;  %v3952_v38 = vcombine.high %v251_v27, %v255_v28  ;;  %v4423_v32 = vld [vmem:[#allocation8 + $0xc0] ss:$16 sps:$4 sm:$0xff]  }
  0xed   :  { %1096 = vmatprep.subr.bf16.mxu1 %v3874_v42  ;;  %v3951_v42 = vcombine.low %v251_v27, %v255_v28  ;;  %v4410_v27 = vld [vmem:[#allocation8 + $0x6c] ss:$16 sps:$4 sm:$0xff]   ;;  %v4417_v28 = vld [vmem:[#allocation8 + $0xa0] ss:$16 sps:$4 sm:$0xff]  }
  0xee   :  { %1054 = vmatpush1.bf16.msra.mxu0 %v3871_v22  ;;  %v3913_v22 = vcombine.low %v212_v7, %v216_v8  ;;  %v4395_v7 = vld [vmem:[#allocation8 + $0x24] ss:$16 sps:$4 sm:$0xff]  }
  0xef   :  { %1055 = vmatprep.subr.bf16.mxu0 %v3880_v26  ;;  %v3935_v26 = vcombine.low %v235_v10, %v239_v11  ;;  %v4401_v11 = vld [vmem:[#allocation8 + $0x44] ss:$16 sps:$4 sm:$0xff]  }
  0xf0   :  { %1097 = vmatpush1.bf16.msra.mxu1 %v3873_v46  ;;  %v3960_v46 = vcombine.high %v259_v35, %v263_v36  ;;  %v4429_v35 = vld [vmem:[#allocation8 + $0xe0] ss:$16 sps:$4 sm:$0xff]   ;;  %v4437_v36 = vld [vmem:[#allocation8 + $0x104] ss:$16 sps:$4 sm:$0xff]  }
  0xf1   :  { %1098 = vmatprep.subr.bf16.mxu1 %v3882_v24  ;;  %v279_v24 = vld [vmem:[#allocation5 + $0x3f0] sm:$0xff] }
  0xf2   :  { %1056 = vmatpush1.bf16.msra.mxu0 %v3879_v31  ;;  %v3921_v31 = vcombine.low %v220_v15, %v224_v16  ;;  %v4407_v16 = vld [vmem:[#allocation8 + $0x64] ss:$16 sps:$4 sm:$0xff]  }
  0xf3   :  { %1057 = vmatprep.subr.bf16.mxu0 %v3888_v34  ;;  %v3943_v34 = vcombine.low %v243_v18, %v247_v19  ;;  %v4398_v18 = vld [vmem:[#allocation8 + $0x2c] ss:$16 sps:$4 sm:$0xff]   ;;  %v4405_v19 = vld [vmem:[#allocation8 + $0x60] ss:$16 sps:$4 sm:$0xff]  }
  0xf4   :  { %1099 = vmatpush1.bf16.msra.mxu1 %v3881_v53 }
  0xf5   :  { %1100 = vmatprep.subr.bf16.mxu1 %v3890_v59  ;;  %v3976_v59 = vcombine.high %v275_v51, %v279_v24 }
  0xf6   :  { %1058 = vmatpush1.bf16.msra.mxu0 %v3887_v39  ;;  %v3929_v39 = vcombine.low %v228_v23, %v232_v25  ;;  %v4411_v23 = vld [vmem:[#allocation8 + $0x80] ss:$16 sps:$4 sm:$0xff]   ;;  %v4419_v25 = vld [vmem:[#allocation8 + $0xa4] ss:$16 sps:$4 sm:$0xff]  }
  0xf7   :  { %1059 = vmatprep.subr.bf16.mxu0 %v3896_v43  ;;  %v267_v43 = vld [vmem:[#allocation5 + $0x390] sm:$0xff] }
  0xf8   :  { %1101 = vmatpush1.bf16.msra.mxu1 %v3889_v61  ;;  %v3968_v53 = vcombine.high %v267_v43, %v271_v44  ;;  %v3967_v57 = vcombine.low %v267_v43, %v271_v44  ;;  %v268_v61 = vld [vmem:[#allocation5 + $0x398] sm:$0xff] }
  0xf9   :  { %1102 = vmatprep.subr.bf16.mxu1 %v3898_v3  ;;  %v3970_v8 = vcombine.high %v268_v61, %v272_v62  ;;  %v3969_v10 = vcombine.low %v268_v61, %v272_v62  ;;  %v4441_v43 = vld [vmem:[#allocation8 + $0x120] ss:$16 sps:$4 sm:$0xff]   ;;  %v4449_v44 = vld [vmem:[#allocation8 + $0x144] ss:$16 sps:$4 sm:$0xff]   ;;  %v4464_v61 = vld [vmem:[#allocation8 + $0x18c] ss:$16 sps:$4 sm:$0xff]  }
  0xfa   :  { %1060 = vmatpush1.bf16.msra.mxu0 %v3895_v49  ;;  %v256_v49 = vld [vmem:[#allocation5 + $0x338] sm:$0xff] }
  0xfb   :  { %1061 = vmatprep.subr.bf16.mxu0 %v3904_v52  ;;  %v3946_v52 = vcombine.high %v244_v40, %v248_v41  ;;  %v3954_v58 = vcombine.high %v252_v48, %v256_v49  ;;  %v4443_v40 = vld [vmem:[#allocation8 + $0x124] ss:$16 sps:$4 sm:$0xff]   ;;  %v4426_v41 = vld [vmem:[#allocation8 + $0xc8] ss:$16 sps:$4 sm:$0xff]   ;;  %v4471_v62 = vld [vmem:[#allocation8 + $0x1c0] ss:$16 sps:$4 sm:$0xff]  }
  0xfc   :  { %1103 = vmatpush1.bf16.msra.mxu1 %v3897_v6  ;;  %v280_v6 = vld [vmem:[#allocation5 + $0x3f8] sm:$0xff] }
  0xfd   :  { %1104 = vmatprep.subr.bf16.mxu1 %v3906_v12 }
  0xfe   :  { %1062 = vmatpush1.bf16.msra.mxu0 %v3903_v56  ;;  %v264_v56 = vld [vmem:[#allocation5 + $0x378] sm:$0xff] }
  0xff   :  { %1063 = vmatprep.subr.bf16.mxu0 %v3912_v60  ;;  %v3953_v60 = vcombine.low %v252_v48, %v256_v49  ;;  %v3962_v1 = vcombine.high %v260_v55, %v264_v56  ;;  %v3961_v3 = vcombine.low %v260_v55, %v264_v56  ;;  %v4455_v48 = vld [vmem:[#allocation8 + $0x164] ss:$16 sps:$4 sm:$0xff]   ;;  %v4438_v49 = vld [vmem:[#allocation8 + $0x108] ss:$16 sps:$4 sm:$0xff]  }
 0x100   :  { %1105 = vmatpush1.bf16.msra.mxu1 %v3905_v14  ;;  %v4399_v14 = vld [vmem:[#allocation8 + $0x40] ss:$16 sps:$4 sm:$0xff]   ;;  %v4467_v55 = vld [vmem:[#allocation8 + $0x1a4] ss:$16 sps:$4 sm:$0xff]   ;;  %v4450_v56 = vld [vmem:[#allocation8 + $0x148] ss:$16 sps:$4 sm:$0xff]  }
 0x101   :  { %1106 = vmatprep.subr.bf16.mxu1 %v3914_v20  ;;  %v4413_v20 = vld [vmem:[#allocation8 + $0x84] ss:$16 sps:$4 sm:$0xff]  }
 0x102   :  { %1064 = vmatpush1.bf16.msra.mxu0 %v3911_v0  ;;  %v3975_v0 = vcombine.low %v275_v51, %v279_v24  ;;  %v4453_v51 = vld [vmem:[#allocation8 + $0x160] ss:$16 sps:$4 sm:$0xff]   ;;  %v4461_v24 = vld [vmem:[#allocation8 + $0x184] ss:$16 sps:$4 sm:$0xff]  }
 0x103   :  { %1065 = vmatprep.subr.bf16.mxu0 %v3920_v5  ;;  %v276_v5 = vld [vmem:[#allocation5 + $0x3d8] sm:$0xff] }
 0x104   :  { %1107 = vmatpush1.bf16.msra.mxu1 %v3913_v22  ;;  %v3978_v12 = vcombine.high %v276_v5, %v280_v6  ;;  %v3977_v15 = vcombine.low %v276_v5, %v280_v6  ;;  %v4404_v22 = vld [vmem:[#allocation8 + $0x4c] ss:$16 sps:$4 sm:$0xff]   ;;  %v4468_v5 = vld [vmem:[#allocation8 + $0x1a8] ss:$16 sps:$4 sm:$0xff]  }
 0x105   :  { %1108 = vmatprep.subr.bf16.mxu1 %v3922_v29  ;;  %v4425_v29 = vld [vmem:[#allocation8 + $0xc4] ss:$16 sps:$4 sm:$0xff]   ;;  %v4476_v6 = vld [vmem:[#allocation8 + $0x1cc] ss:$16 sps:$4 sm:$0xff]  }
 0x106   :  { %1066 = vmatpush1.bf16.msra.mxu0 %v3919_v9  ;;  %v4393_v9 = vld [vmem:[#allocation8 + $0x20] ss:$16 sps:$4 sm:$0xff]  }
 0x107   :  { %1067 = vmatprep.subr.bf16.mxu0 %v3928_v13  ;;  %v4392_v13 = vld [vmem:[#allocation8 + $0xc] ss:$16 sps:$4 sm:$0xff]  }
 0x108   :  { %1109 = vmatpush1.bf16.msra.mxu1 %v3921_v31  ;;  %v4416_v31 = vld [vmem:[#allocation8 + $0x8c] ss:$16 sps:$4 sm:$0xff]  }
 0x109   :  { %1110 = vmatprep.subr.bf16.mxu1 %v3930_v37  ;;  %v4420_v37 = vld [vmem:[#allocation8 + $0xa8] ss:$16 sps:$4 sm:$0xff]  }
 0x10a   :  { %1068 = vmatpush1.bf16.msra.mxu0 %v3927_v17  ;;  %v4390_v17 = vld [vmem:[#allocation8 + $0x8] ss:$16 sps:$4 sm:$0xff]  }
 0x10b   :  { %1069 = vmatprep.subr.bf16.mxu0 %v3936_v21  ;;  %v4396_v21 = vld [vmem:[#allocation8 + $0x28] ss:$16 sps:$4 sm:$0xff]  }
 0x10c   :  { %1111 = vmatpush1.bf16.msra.mxu1 %v3929_v39  ;;  %v4435_v39 = vld [vmem:[#allocation8 + $0x100] ss:$16 sps:$4 sm:$0xff]  }
 0x10d   :  { %1112 = vmatprep.subr.bf16.mxu1 %v3938_v45  ;;  %v4432_v45 = vld [vmem:[#allocation8 + $0xe8] ss:$16 sps:$4 sm:$0xff]  }
 0x10e   :  { %1070 = vmatpush1.bf16.msra.mxu0 %v3935_v26  ;;  %v4402_v26 = vld [vmem:[#allocation8 + $0x48] ss:$16 sps:$4 sm:$0xff]  }
 0x10f   :  { %1071 = vmatprep.subr.bf16.mxu0 %v3944_v30  ;;  %v4408_v30 = vld [vmem:[#allocation8 + $0x68] ss:$16 sps:$4 sm:$0xff]  }
 0x110   :  { %1113 = vmatpush1.bf16.msra.mxu1 %v3937_v47  ;;  %v4447_v47 = vld [vmem:[#allocation8 + $0x140] ss:$16 sps:$4 sm:$0xff]  }
 0x111   :  { %1114 = vmatprep.subr.bf16.mxu1 %v3946_v52  ;;  %v4444_v52 = vld [vmem:[#allocation8 + $0x128] ss:$16 sps:$4 sm:$0xff]  }
 0x112   :  { %1072 = vmatpush1.bf16.msra.mxu0 %v3943_v34  ;;  %v4422_v34 = vld [vmem:[#allocation8 + $0xac] ss:$16 sps:$4 sm:$0xff]  }
 0x113   :  { %1073 = vmatprep.subr.bf16.mxu0 %v3952_v38  ;;  %v4428_v38 = vld [vmem:[#allocation8 + $0xcc] ss:$16 sps:$4 sm:$0xff]  }
 0x114   :  { %1115 = vmatpush1.bf16.msra.mxu1 %v3945_v54  ;;  %v4459_v54 = vld [vmem:[#allocation8 + $0x180] ss:$16 sps:$4 sm:$0xff]  }
 0x115   :  { %1116 = vmatprep.subr.bf16.mxu1 %v3954_v58  ;;  %v4465_v58 = vld [vmem:[#allocation8 + $0x1a0] ss:$16 sps:$4 sm:$0xff]  }
 0x116   :  { %1074 = vmatpush1.bf16.msra.mxu0 %v3951_v42  ;;  %v4434_v42 = vld [vmem:[#allocation8 + $0xec] ss:$16 sps:$4 sm:$0xff]  }
 0x117   :  { %1075 = vmatprep.subr.bf16.mxu0 %v3960_v46  ;;  %v4440_v46 = vld [vmem:[#allocation8 + $0x10c] ss:$16 sps:$4 sm:$0xff]  }
 0x118   :  { %1117 = vmatpush1.bf16.msra.mxu1 %v3953_v60  ;;  %v4456_v60 = vld [vmem:[#allocation8 + $0x168] ss:$16 sps:$4 sm:$0xff]  }
 0x119   :  { %1118 = vmatprep.subr.bf16.mxu1 %v3962_v1  ;;  %v4470_v1 = vld [vmem:[#allocation8 + $0x1ac] ss:$16 sps:$4 sm:$0xff]  }
 0x11a   :  { %1076 = vmatpush1.bf16.msra.mxu0 %v3959_v50  ;;  %v4446_v50 = vld [vmem:[#allocation8 + $0x12c] ss:$16 sps:$4 sm:$0xff]  }
 0x11b   :  { %1077 = vmatprep.subr.bf16.mxu0 %v3968_v53  ;;  %v4452_v53 = vld [vmem:[#allocation8 + $0x14c] ss:$16 sps:$4 sm:$0xff]  }
 0x11c   :  { %1119 = vmatpush1.bf16.msra.mxu1 %v3961_v3  ;;  %v4485_v3 = vld [vmem:[#allocation8 + $0x204] ss:$16 sps:$4 sm:$0xff]  }
 0x11d   :  { %1120 = vmatprep.subr.bf16.mxu1 %v3970_v8  ;;  %v4482_v8 = vld [vmem:[#allocation8 + $0x1ec] ss:$16 sps:$4 sm:$0xff]  }
 0x11e   :  { %1078 = vmatpush1.bf16.msra.mxu0 %v3967_v57  ;;  %v4458_v57 = vld [vmem:[#allocation8 + $0x16c] ss:$16 sps:$4 sm:$0xff]  }
 0x11f   :  { %1079 = vmatprep.subr.bf16.mxu0 %v3976_v59  ;;  %v4473_v59 = vld [vmem:[#allocation8 + $0x1c4] ss:$16 sps:$4 sm:$0xff]  }
 0x120   :  { %1121 = vmatpush1.bf16.msra.mxu1 %v3969_v10  ;;  %v4488_v10 = vld [vmem:[#allocation8 + $0x20c] ss:$16 sps:$4 sm:$0xff]  }
 0x121   :  { %1122 = vmatprep.subr.bf16.mxu1 %v3978_v12 }
 0x122   :  { %1080 = vmatpush1.bf16.msra.mxu0 %v3975_v0  ;;  %v4462_v0 = vld [vmem:[#allocation8 + $0x188] ss:$16 sps:$4 sm:$0xff]  }
 0x123   :  { %2717 = vmatprep.subr.bf16.mxu0 %v4389_v63  ;;  %v4479_v63 = vld [vmem:[#allocation8 + $0x1e4] ss:$16 sps:$4 sm:$0xff]  }
 0x124   :  { %1123 = vmatpush1.bf16.msra.mxu1 %v3977_v15 }
 0x125   :  { %1082 = vmatmul.mubr.bf16.vlgmr.msra.gmra.mrb[4].mxu0 %v5335_v4  ;;  %2889 = vmatprep.subr.bf16.mxu1 %v4392_v13 }
 0x126   :  { %2718 = vmatpush1.bf16.msra.mxu0 %v4387_v2  ;;  %v4477_v2 = vld [vmem:[#allocation8 + $0x1e0] ss:$16 sps:$4 sm:$0xff]  }
 0x127   :  { %2719 = vmatprep.subr.bf16.mxu0 %v4395_v7  ;;  %1125 = vmatmul.mubr.bf16.vlgmr.msra.gmra.mrb[4].mxu1 %v5335_v4  ;;  %v4431_v4 = vld [vmem:[#allocation8 + $0xe4] ss:$16 sps:$4 sm:$0xff]   ;;  %v4474_v7 = vld [vmem:[#allocation8 + $0x1c8] ss:$16 sps:$4 sm:$0xff]  }
 0x128   :  { %2890 = vmatpush1.bf16.msra.mxu1 %v4390_v17 }
 0x129   :  { %2891 = vmatprep.subr.bf16.mxu1 %v4398_v18 }
 0x12a   :  { %2720 = vmatpush1.bf16.msra.mxu0 %v4393_v9  ;;  %v4480_v9 = vld [vmem:[#allocation8 + $0x1e8] ss:$16 sps:$4 sm:$0xff]  }
 0x12b   :  { %2721 = vmatprep.subr.bf16.mxu0 %v4401_v11  ;;  %v283_v11 = vlaneseq }
 0x12c   :  { %2892 = vmatpush1.bf16.msra.mxu1 %v4396_v21 }
 0x12d   :  { %2893 = vmatprep.subr.bf16.mxu1 %v4404_v22  ;;  %v5343_v12 = vshrl.u32 %v283_v11, 7  ;;  %v4522_v11 = vld [vmem:[#allocation8 + $0x2c8] ss:$16 sps:$4 sm:$0xff]  }
 0x12e   :  { %2722 = vmatpush1.bf16.msra.mxu0 %v4399_v14  ;;  %v5348_v14 = vld [vmem:[#allocation7] sm:$0xff] }
 0x12f   :  { %2723 = vmatprep.subr.bf16.mxu0 %v4407_v16  ;;  %v5346_v13 = vsub.s32 0, %v5343_v12  ;;  %v5351_v15 = vsub.s32 1, %v5343_v12 }
 0x130   :  { %2894 = vmatpush1.bf16.msra.mxu1 %v4402_v26 }
 0x131   :  { %2895 = vmatprep.subr.bf16.mxu1 %v4410_v27  ;;  %v286_v16 = vrot.slane %v5348_v14, %v5346_v13  ;;  %v290_v17 = vrot.slane %v5348_v14, %v5351_v15  ;;  %v293_v27 = vsub.s32 2, %v5343_v12 }
 0x132   :  { %2724 = vmatpush1.bf16.msra.mxu0 %v4405_v19 }
 0x133   :  { %2725 = vmatprep.subr.bf16.mxu0 %v4413_v20 }
 0x134   :  { %2896 = vmatpush1.bf16.msra.mxu1 %v4408_v30  ;;  %v297_v30 = vsub.s32 3, %v5343_v12 }
 0x135   :  { %2897 = vmatprep.subr.bf16.mxu1 %v4416_v31 }
 0x136   :  { %2726 = vmatpush1.bf16.msra.mxu0 %v4411_v23 }
 0x137   :  { %2727 = vmatprep.subr.bf16.mxu0 %v4419_v25 }
 0x138   :  { %2898 = vmatpush1.bf16.msra.mxu1 %v4414_v33 }
 0x139   :  { %2899 = vmatprep.subr.bf16.mxu1 %v4422_v34  ;;  %v4483_v34 = vld [vmem:[#allocation8 + $0x200] ss:$16 sps:$4 sm:$0xff]  }
 0x13a   :  { %2728 = vmatpush1.bf16.msra.mxu0 %v4417_v28 }
 0x13b   :  { %2729 = vmatprep.subr.bf16.mxu0 %v4425_v29 }
 0x13c   :  { %2900 = vmatpush1.bf16.msra.mxu1 %v4420_v37  ;;  %v4491_v37 = vld [vmem:[#allocation8 + $0x224] ss:$16 sps:$4 sm:$0xff]  }
 0x13d   :  { %2901 = vmatprep.subr.bf16.mxu1 %v4428_v38  ;;  %v4494_v38 = vld [vmem:[#allocation8 + $0x22c] ss:$16 sps:$4 sm:$0xff]  }
 0x13e   :  { %2730 = vmatpush1.bf16.msra.mxu0 %v4423_v32 }
 0x13f   :  { %2731 = vmatprep.subr.bf16.mxu0 %v4431_v4 }
 0x140   :  { %2902 = vmatpush1.bf16.msra.mxu1 %v4426_v41  ;;  %v4489_v41 = vld [vmem:[#allocation8 + $0x220] ss:$16 sps:$4 sm:$0xff]  }
 0x141   :  { %2903 = vmatprep.subr.bf16.mxu1 %v4434_v42  ;;  %v4492_v42 = vld [vmem:[#allocation8 + $0x228] ss:$16 sps:$4 sm:$0xff]  }
 0x142   :  { %2732 = vmatpush1.bf16.msra.mxu0 %v4429_v35  ;;  %v4486_v35 = vld [vmem:[#allocation8 + $0x208] ss:$16 sps:$4 sm:$0xff]  }
 0x143   :  { %2733 = vmatprep.subr.bf16.mxu0 %v4437_v36  ;;  %v294_v36 = vrot.slane %v5348_v14, %v293_v27 }
 0x144   :  { %2904 = vmatpush1.bf16.msra.mxu1 %v4432_v45  ;;  %v4497_v45 = vld [vmem:[#allocation8 + $0x244] ss:$16 sps:$4 sm:$0xff]  }
 0x145   :  { %2905 = vmatprep.subr.bf16.mxu1 %v4440_v46  ;;  %v4500_v46 = vld [vmem:[#allocation8 + $0x24c] ss:$16 sps:$4 sm:$0xff]  }
 0x146   :  { %2734 = vmatpush1.bf16.msra.mxu0 %v4435_v39  ;;  %v298_v39 = vrot.slane %v5348_v14, %v297_v30 }
 0x147   :  { %2735 = vmatprep.subr.bf16.mxu0 %v4443_v40 }
 0x148   :  { %2906 = vmatpush1.bf16.msra.mxu1 %v4438_v49 }
 0x149   :  { %2907 = vmatprep.subr.bf16.mxu1 %v4446_v50 }
 0x14a   :  { %2736 = vmatpush1.bf16.msra.mxu0 %v4441_v43 }
 0x14b   :  { %2737 = vmatprep.subr.bf16.mxu0 %v4449_v44 }
 0x14c   :  { %2908 = vmatpush1.bf16.msra.mxu1 %v4444_v52 }
 0x14d   :  { %2909 = vmatprep.subr.bf16.mxu1 %v4452_v53  ;;  %v4495_v53 = vld [vmem:[#allocation8 + $0x240] ss:$16 sps:$4 sm:$0xff]  }
 0x14e   :  { %2738 = vmatpush1.bf16.msra.mxu0 %v4447_v47 }
 0x14f   :  { %2739 = vmatprep.subr.bf16.mxu0 %v4455_v48 }
 0x150   :  { %2910 = vmatpush1.bf16.msra.mxu1 %v4450_v56  ;;  %v4503_v56 = vld [vmem:[#allocation8 + $0x264] ss:$16 sps:$4 sm:$0xff]  }
 0x151   :  { %2911 = vmatprep.subr.bf16.mxu1 %v4458_v57  ;;  %v4506_v57 = vld [vmem:[#allocation8 + $0x26c] ss:$16 sps:$4 sm:$0xff]  }
 0x152   :  { %2740 = vmatpush1.bf16.msra.mxu0 %v4453_v51 }
 0x153   :  { %2741 = vmatprep.subr.bf16.mxu0 %v4461_v24 }
 0x154   :  { %2912 = vmatpush1.bf16.msra.mxu1 %v4456_v60 }
 0x155   :  { %2913 = vmatprep.subr.bf16.mxu1 %v4464_v61  ;;  %v4501_v61 = vld [vmem:[#allocation8 + $0x260] ss:$16 sps:$4 sm:$0xff]  }
 0x156   :  { %2742 = vmatpush1.bf16.msra.mxu0 %v4459_v54  ;;  %v4498_v54 = vld [vmem:[#allocation8 + $0x248] ss:$16 sps:$4 sm:$0xff]  }
 0x157   :  { %2743 = vmatprep.subr.bf16.mxu0 %v4467_v55 }
 0x158   :  { %2914 = vmatpush1.bf16.msra.mxu1 %v4462_v0  ;;  %v4512_v0 = vld [vmem:[#allocation8 + $0x28c] ss:$16 sps:$4 sm:$0xff]  }
 0x159   :  { %2915 = vmatprep.subr.bf16.mxu1 %v4470_v1  ;;  %v4507_v1 = vld [vmem:[#allocation8 + $0x280] ss:$16 sps:$4 sm:$0xff]  }
 0x15a   :  { %2744 = vmatpush1.bf16.msra.mxu0 %v4465_v58 }
 0x15b   :  { %2745 = vmatprep.subr.bf16.mxu0 %v4473_v59 }
 0x15c   :  { %2916 = vmatpush1.bf16.msra.mxu1 %v4468_v5  ;;  %v4518_v5 = vld [vmem:[#allocation8 + $0x2ac] ss:$16 sps:$4 sm:$0xff]  }
 0x15d   :  { %2917 = vmatprep.subr.bf16.mxu1 %v4476_v6  ;;  %v4513_v6 = vld [vmem:[#allocation8 + $0x2a0] ss:$16 sps:$4 sm:$0xff]  }
 0x15e   :  { %2746 = vmatpush1.bf16.msra.mxu0 %v4471_v62  ;;  %v4504_v62 = vld [vmem:[#allocation8 + $0x268] ss:$16 sps:$4 sm:$0xff]  }
 0x15f   :  { %2747 = vmatprep.subr.bf16.mxu0 %v4479_v63  ;;  %v4509_v63 = vld [vmem:[#allocation8 + $0x284] ss:$16 sps:$4 sm:$0xff]  }
 0x160   :  { %2918 = vmatpush1.bf16.msra.mxu1 %v4474_v7  ;;  %v4516_v7 = vld [vmem:[#allocation8 + $0x2a8] ss:$16 sps:$4 sm:$0xff]  }
 0x161   :  { %2919 = vmatprep.subr.bf16.mxu1 %v4482_v8  ;;  %v4521_v8 = vld [vmem:[#allocation8 + $0x2c4] ss:$16 sps:$4 sm:$0xff]  }
 0x162   :  { %2748 = vmatpush1.bf16.msra.mxu0 %v4477_v2  ;;  %v4510_v2 = vld [vmem:[#allocation8 + $0x288] ss:$16 sps:$4 sm:$0xff]  }
 0x163   :  { %2760 = vmatprep.subr.bf16.mxu0 %v4485_v3  ;;  %v4515_v3 = vld [vmem:[#allocation8 + $0x2a4] ss:$16 sps:$4 sm:$0xff]  }
 0x164   :  { %2920 = vmatpush1.bf16.msra.mxu1 %v4480_v9  ;;  %v4524_v9 = vld [vmem:[#allocation8 + $0x2cc] ss:$16 sps:$4 sm:$0xff]  }
 0x165   :  { %2932 = vmatprep.subr.bf16.mxu1 %v4488_v10  ;;  %v4519_v10 = vld [vmem:[#allocation8 + $0x2c0] ss:$16 sps:$4 sm:$0xff]  }
 0x1b8   :  { %v997_v18 = vpop.f32.mrb[0].mxu0 }
 0x1b9   :  { %v998_v19 = vadd.f32 %v997_v18, %v286_v16  ;;  %v999_v20 = vpop.f32.mrb[1].mxu0  ;;  %v4525_v18 = vld [vmem:[#allocation8 + $0x2e0] ss:$16 sps:$4 sm:$0xff]  }
 0x1ba   :  { %v1000_v21 = vadd.f32 %v999_v20, %v290_v17  ;;  %v1001_v22 = vpop.f32.mrb[2].mxu0  ;;  %v1040_v40 = vpop.f32.mrb[0].mxu1  ;;  %v4533_v20 = vld [vmem:[#allocation8 + $0x304] ss:$16 sps:$4 sm:$0xff]  }
 0x1bb   :  { %v1002_v23 = vadd.f32 %v1001_v22, %v286_v16  ;;  %v1003_v25 = vpop.f32.mrb[3].mxu0  ;;  %v1135_v28 = vmax.f32 %v998_v19, 0.0  ;;  %v1041_v43 = vadd.f32 %v1040_v40, %v294_v36  ;;  %v1042_v44 = vpop.f32.mrb[1].mxu1  ;;  %v4527_v16 = vld [vmem:[#allocation8 + $0x2e4] ss:$16 sps:$4 sm:$0xff]  }
 0x1bc   :  { %v1004_v26 = vadd.f32 %v1003_v25, %v290_v17  ;;  %v1136_v31 = vmax.f32 %v1000_v21, 0.0  ;;  %v1043_v47 = vadd.f32 %v1042_v44, %v298_v39  ;;  %v1044_v48 = vpop.f32.mrb[2].mxu1  ;;  %v4530_v17 = vld [vmem:[#allocation8 + $0x2ec] ss:$16 sps:$4 sm:$0xff]   ;;  %v4528_v19 = vld [vmem:[#allocation8 + $0x2e8] ss:$16 sps:$4 sm:$0xff]  }
 0x1bd   :  { %v1143_v29 = vmax.f32 %v1002_v23, 0.0  ;;  %v1137_v49 = vmax.f32 %v1041_v43, 0.0  ;;  %v1045_v50 = vadd.f32 %v1044_v48, %v294_v36  ;;  %v1046_v51 = vpop.f32.mrb[3].mxu1  ;;  %v4536_v21 = vld [vmem:[#allocation8 + $0x30c] ss:$16 sps:$4 sm:$0xff]   ;;  %v301_v44 = vsub.s32 4, %v5343_v12 }
 0x1be   :  { %v1144_v32 = vmax.f32 %v1004_v26, 0.0  ;;  %v1138_v24 = vmax.f32 %v1043_v47, 0.0  ;;  %v1047_v52 = vadd.f32 %v1046_v51, %v298_v39  ;;  %v4531_v22 = vld [vmem:[#allocation8 + $0x300] ss:$16 sps:$4 sm:$0xff]   ;;  %v4534_v23 = vld [vmem:[#allocation8 + $0x308] ss:$16 sps:$4 sm:$0xff]  }
 0x1bf   :  { %v1151_v4 = vpack.c.bf16 %v1143_v29, %v1135_v28  ;;  %v1145_v55 = vmax.f32 %v1045_v50, 0.0  ;;  %v4539_v25 = vld [vmem:[#allocation8 + $0x324] ss:$16 sps:$4 sm:$0xff]   ;;  %v4542_v26 = vld [vmem:[#allocation8 + $0x32c] ss:$16 sps:$4 sm:$0xff]   ;;  %v302_v50 = vrot.slane %v5348_v14, %v301_v44 }
 0x1c0   :  { %v1152_v33 = vpack.c.bf16 %v1144_v32, %v1136_v31  ;;  %v1146_v58 = vmax.f32 %v1047_v52, 0.0  ;;  %v4537_v28 = vld [vmem:[#allocation8 + $0x320] ss:$16 sps:$4 sm:$0xff]   ;;  %v4540_v29 = vld [vmem:[#allocation8 + $0x328] ss:$16 sps:$4 sm:$0xff]  }
 0x1c1   :  { %v5365_v59 = vpack.c.bf16 %v1145_v55, %v1137_v49  ;;  %v4545_v31 = vld [vmem:[#allocation8 + $0x344] ss:$16 sps:$4 sm:$0xff]   ;;  %v4548_v32 = vld [vmem:[#allocation8 + $0x34c] ss:$16 sps:$4 sm:$0xff]   ;;  %v4549_v36 = vld [vmem:[#allocation8 + $0x360] ss:$16 sps:$4 sm:$0xff]  }
 0x1c2   :  { %2749 = vmatprep.mubr.bf16.mxu0 %v1152_v33  ;;  %2921 = vmatprep.mubr.bf16.mxu1 %v1152_v33  ;;  %v1154_v60 = vpack.c.bf16 %v1146_v58, %v1138_v24  ;;  %v4546_v33 = vld [vmem:[#allocation8 + $0x348] ss:$16 sps:$4 sm:$0xff]   ;;  %v4560_v39 = vld [vmem:[#allocation8 + $0x38c] ss:$16 sps:$4 sm:$0xff]   ;;  %v4555_v40 = vld [vmem:[#allocation8 + $0x380] ss:$16 sps:$4 sm:$0xff]  }
 0x1c3   :  { %2750 = vmatmul.mubr.bf16.vlgmr.msra.gmra.mrb[8].mxu0 %v1151_v4  ;;  %2922 = vmatmul.mubr.bf16.vlgmr.msra.gmra.mrb[8].mxu1 %v1151_v4  ;;  %v4543_v4 = vld [vmem:[#allocation8 + $0x340] ss:$16 sps:$4 sm:$0xff]   ;;  %v4566_v43 = vld [vmem:[#allocation8 + $0x3ac] ss:$16 sps:$4 sm:$0xff]   ;;  %v4564_v47 = vld [vmem:[#allocation8 + $0x3a8] ss:$16 sps:$4 sm:$0xff]  }
 0x1c4   :  { %2761 = vmatpush1.bf16.msra.mxu0 %v4483_v34  ;;  %2933 = vmatpush1.bf16.msra.mxu1 %v4486_v35  ;;  %v4551_v34 = vld [vmem:[#allocation8 + $0x364] ss:$16 sps:$4 sm:$0xff]   ;;  %v4554_v35 = vld [vmem:[#allocation8 + $0x36c] ss:$16 sps:$4 sm:$0xff]   ;;  %v4567_v24 = vld [vmem:[#allocation8 + $0x3c0] ss:$16 sps:$4 sm:$0xff]  }
 0x1c5   :  { %2762 = vmatprep.subr.bf16.mxu0 %v4491_v37  ;;  %2934 = vmatprep.subr.bf16.mxu1 %v4494_v38  ;;  %v4552_v37 = vld [vmem:[#allocation8 + $0x368] ss:$16 sps:$4 sm:$0xff]   ;;  %v4557_v38 = vld [vmem:[#allocation8 + $0x384] ss:$16 sps:$4 sm:$0xff]   ;;  %v4572_v49 = vld [vmem:[#allocation8 + $0x3cc] ss:$16 sps:$4 sm:$0xff]  }
 0x1c6   :  { %2792 = vmatprep.mubr.bf16.mxu0 %v1154_v60  ;;  %2964 = vmatprep.mubr.bf16.mxu1 %v1154_v60  ;;  %v4569_v48 = vld [vmem:[#allocation8 + $0x3c4] ss:$16 sps:$4 sm:$0xff]   ;;  %v4570_v52 = vld [vmem:[#allocation8 + $0x3c8] ss:$16 sps:$4 sm:$0xff]   ;;  %v4578_v55 = vld [vmem:[#allocation8 + $0x3ec] ss:$16 sps:$4 sm:$0xff]  }
 0x1c8   :  { %2763 = vmatpush1.bf16.msra.mxu0 %v4489_v41  ;;  %2935 = vmatpush1.bf16.msra.mxu1 %v4492_v42  ;;  %v4558_v41 = vld [vmem:[#allocation8 + $0x388] ss:$16 sps:$4 sm:$0xff]   ;;  %v4563_v42 = vld [vmem:[#allocation8 + $0x3a4] ss:$16 sps:$4 sm:$0xff]  }
 0x1c9   :  { %2764 = vmatprep.subr.bf16.mxu0 %v4497_v45  ;;  %2936 = vmatprep.subr.bf16.mxu1 %v4500_v46  ;;  %v305_v45 = vsub.s32 5, %v5343_v12  ;;  %v4561_v46 = vld [vmem:[#allocation8 + $0x3a0] ss:$16 sps:$4 sm:$0xff]  }
 0x1cb   :  { %v306_v51 = vrot.slane %v5348_v14, %v305_v45  ;;  %v4597_v45 = vld [vmem:[#allocation8 + $0x460] ss:$16 sps:$4 sm:$0xff]  }
 0x1cc   :  { %2765 = vmatpush1.bf16.msra.mxu0 %v4495_v53  ;;  %2937 = vmatpush1.bf16.msra.mxu1 %v4498_v54  ;;  %v4575_v54 = vld [vmem:[#allocation8 + $0x3e4] ss:$16 sps:$4 sm:$0xff]  }
 0x1cd   :  { %2766 = vmatprep.subr.bf16.mxu0 %v4503_v56  ;;  %2938 = vmatprep.subr.bf16.mxu1 %v4506_v57 }
 0x1d0   :  { %2767 = vmatpush1.bf16.msra.mxu0 %v4501_v61  ;;  %2939 = vmatpush1.bf16.msra.mxu1 %v4504_v62 }
 0x1d1   :  { %2768 = vmatprep.subr.bf16.mxu0 %v4509_v63  ;;  %2940 = vmatprep.subr.bf16.mxu1 %v4512_v0  ;;  %v4573_v0 = vld [vmem:[#allocation8 + $0x3e0] ss:$16 sps:$4 sm:$0xff]  }
 0x1d4   :  { %2769 = vmatpush1.bf16.msra.mxu0 %v4507_v1  ;;  %2941 = vmatpush1.bf16.msra.mxu1 %v4510_v2  ;;  %v4576_v1 = vld [vmem:[#allocation8 + $0x3e8] ss:$16 sps:$4 sm:$0xff]  }
 0x1d5   :  { %2770 = vmatprep.subr.bf16.mxu0 %v4515_v3  ;;  %2942 = vmatprep.subr.bf16.mxu1 %v4518_v5  ;;  %v309_v5 = vsub.s32 6, %v5343_v12 }
 0x1d8   :  { %2771 = vmatpush1.bf16.msra.mxu0 %v4513_v6  ;;  %2943 = vmatpush1.bf16.msra.mxu1 %v4516_v7  ;;  %v4581_v6 = vld [vmem:[#allocation8 + $0x404] ss:$16 sps:$4 sm:$0xff]   ;;  %v4584_v7 = vld [vmem:[#allocation8 + $0x40c] ss:$16 sps:$4 sm:$0xff]  }
 0x1d9   :  { %2772 = vmatprep.subr.bf16.mxu0 %v4521_v8  ;;  %2944 = vmatprep.subr.bf16.mxu1 %v4524_v9  ;;  %v313_v9 = vsub.s32 7, %v5343_v12 }
 0x1dc   :  { %2773 = vmatpush1.bf16.msra.mxu0 %v4519_v10  ;;  %2945 = vmatpush1.bf16.msra.mxu1 %v4522_v11 }
 0x1dd   :  { %2774 = vmatprep.subr.bf16.mxu0 %v4527_v16  ;;  %2946 = vmatprep.subr.bf16.mxu1 %v4530_v17  ;;  %v4579_v16 = vld [vmem:[#allocation8 + $0x400] ss:$16 sps:$4 sm:$0xff]   ;;  %v4582_v17 = vld [vmem:[#allocation8 + $0x408] ss:$16 sps:$4 sm:$0xff]  }
 0x1e0   :  { %2775 = vmatpush1.bf16.msra.mxu0 %v4525_v18  ;;  %2947 = vmatpush1.bf16.msra.mxu1 %v4528_v19  ;;  %v310_v19 = vrot.slane %v5348_v14, %v309_v5  ;;  %v4638_v5 = vld [vmem:[#allocation8 + $0x52c] ss:$16 sps:$4 sm:$0xff]  }
 0x1e1   :  { %2776 = vmatprep.subr.bf16.mxu0 %v4533_v20  ;;  %2948 = vmatprep.subr.bf16.mxu1 %v4536_v21  ;;  %v4587_v20 = vld [vmem:[#allocation8 + $0x424] ss:$16 sps:$4 sm:$0xff]   ;;  %v4590_v21 = vld [vmem:[#allocation8 + $0x42c] ss:$16 sps:$4 sm:$0xff]  }
 0x1e4   :  { %2777 = vmatpush1.bf16.msra.mxu0 %v4531_v22  ;;  %2949 = vmatpush1.bf16.msra.mxu1 %v4534_v23  ;;  %v314_v22 = vrot.slane %v5348_v14, %v313_v9  ;;  %v4644_v9 = vld [vmem:[#allocation8 + $0x54c] ss:$16 sps:$4 sm:$0xff]  }
 0x1e5   :  { %2778 = vmatprep.subr.bf16.mxu0 %v4539_v25  ;;  %2950 = vmatprep.subr.bf16.mxu1 %v4542_v26  ;;  %v4585_v25 = vld [vmem:[#allocation8 + $0x420] ss:$16 sps:$4 sm:$0xff]   ;;  %v4588_v26 = vld [vmem:[#allocation8 + $0x428] ss:$16 sps:$4 sm:$0xff]  }
 0x1e8   :  { %2779 = vmatpush1.bf16.msra.mxu0 %v4537_v28  ;;  %2951 = vmatpush1.bf16.msra.mxu1 %v4540_v29 }
 0x1e9   :  { %2780 = vmatprep.subr.bf16.mxu0 %v4545_v31  ;;  %2952 = vmatprep.subr.bf16.mxu1 %v4548_v32  ;;  %v4593_v31 = vld [vmem:[#allocation8 + $0x444] ss:$16 sps:$4 sm:$0xff]   ;;  %v4596_v32 = vld [vmem:[#allocation8 + $0x44c] ss:$16 sps:$4 sm:$0xff]  }
 0x1ec   :  { %2781 = vmatpush1.bf16.msra.mxu0 %v4543_v4  ;;  %2953 = vmatpush1.bf16.msra.mxu1 %v4546_v33 }
 0x1ed   :  { %2782 = vmatprep.subr.bf16.mxu0 %v4551_v34  ;;  %2954 = vmatprep.subr.bf16.mxu1 %v4554_v35 }
 0x1f0   :  { %2783 = vmatpush1.bf16.msra.mxu0 %v4549_v36  ;;  %2955 = vmatpush1.bf16.msra.mxu1 %v4552_v37  ;;  %v4591_v37 = vld [vmem:[#allocation8 + $0x440] ss:$16 sps:$4 sm:$0xff]  }
 0x1f1   :  { %2784 = vmatprep.subr.bf16.mxu0 %v4557_v38  ;;  %2956 = vmatprep.subr.bf16.mxu1 %v4560_v39  ;;  %v4594_v38 = vld [vmem:[#allocation8 + $0x448] ss:$16 sps:$4 sm:$0xff]  }
 0x1f4   :  { %2785 = vmatpush1.bf16.msra.mxu0 %v4555_v40  ;;  %2957 = vmatpush1.bf16.msra.mxu1 %v4558_v41  ;;  %v4599_v40 = vld [vmem:[#allocation8 + $0x464] ss:$16 sps:$4 sm:$0xff]   ;;  %v4602_v41 = vld [vmem:[#allocation8 + $0x46c] ss:$16 sps:$4 sm:$0xff]  }
 0x1f5   :  { %2786 = vmatprep.subr.bf16.mxu0 %v4563_v42  ;;  %2958 = vmatprep.subr.bf16.mxu1 %v4566_v43 }
 0x1f8   :  { %2787 = vmatpush1.bf16.msra.mxu0 %v4561_v46  ;;  %2959 = vmatpush1.bf16.msra.mxu1 %v4564_v47  ;;  %v1083_v53 = vpop.f32.mrb[4].mxu0  ;;  %v4600_v46 = vld [vmem:[#allocation8 + $0x468] ss:$16 sps:$4 sm:$0xff]   ;;  %v4605_v47 = vld [vmem:[#allocation8 + $0x484] ss:$16 sps:$4 sm:$0xff]  }
 0x1f9   :  { %2788 = vmatprep.subr.bf16.mxu0 %v4569_v48  ;;  %2960 = vmatprep.subr.bf16.mxu1 %v4572_v49  ;;  %v1084_v56 = vadd.f32 %v1083_v53, %v302_v50  ;;  %v1085_v57 = vpop.f32.mrb[5].mxu0  ;;  %v4608_v48 = vld [vmem:[#allocation8 + $0x48c] ss:$16 sps:$4 sm:$0xff]   ;;  %v4603_v49 = vld [vmem:[#allocation8 + $0x480] ss:$16 sps:$4 sm:$0xff]  }
 0x1fa   :  { %v1086_v58 = vadd.f32 %v1085_v57, %v306_v51  ;;  %v1087_v60 = vpop.f32.mrb[6].mxu0  ;;  %v1126_v23 = vpop.f32.mrb[4].mxu1  ;;  %v4612_v53 = vld [vmem:[#allocation8 + $0x4a8] ss:$16 sps:$4 sm:$0xff]  }
 0x1fb   :  { %v1139_v61 = vmax.f32 %v1084_v56, 0.0  ;;  %v1088_v62 = vadd.f32 %v1087_v60, %v302_v50  ;;  %v1089_v63 = vpop.f32.mrb[7].mxu0  ;;  %v1127_v28 = vadd.f32 %v1126_v23, %v310_v19  ;;  %v1128_v29 = vpop.f32.mrb[5].mxu1  ;;  %v4606_v50 = vld [vmem:[#allocation8 + $0x488] ss:$16 sps:$4 sm:$0xff]  }
 0x1fc   :  { %2789 = vmatpush1.bf16.msra.mxu0 %v4567_v24  ;;  %2961 = vmatpush1.bf16.msra.mxu1 %v4570_v52  ;;  %v1140_v2 = vmax.f32 %v1086_v58, 0.0  ;;  %v1090_v3 = vadd.f32 %v1089_v63, %v306_v51  ;;  %v1129_v4 = vadd.f32 %v1128_v29, %v314_v22  ;;  %v1130_v33 = vpop.f32.mrb[6].mxu1  ;;  %v4611_v51 = vld [vmem:[#allocation8 + $0x4a4] ss:$16 sps:$4 sm:$0xff]   ;;  %v4614_v24 = vld [vmem:[#allocation8 + $0x4ac] ss:$16 sps:$4 sm:$0xff]  }
 0x1fd   :  { %2790 = vmatprep.subr.bf16.mxu0 %v4575_v54  ;;  %2962 = vmatprep.subr.bf16.mxu1 %v4578_v55  ;;  %v1147_v8 = vmax.f32 %v1088_v62, 0.0  ;;  %v1141_v14 = vmax.f32 %v1127_v28, 0.0  ;;  %v1131_v34 = vadd.f32 %v1130_v33, %v310_v19  ;;  %v1132_v35 = vpop.f32.mrb[7].mxu1  ;;  %v4609_v52 = vld [vmem:[#allocation8 + $0x4a0] ss:$16 sps:$4 sm:$0xff]  }
 0x1fe   :  { %v1148_v10 = vmax.f32 %v1090_v3, 0.0  ;;  %v1142_v36 = vmax.f32 %v1129_v4, 0.0  ;;  %v4617_v54 = vld [vmem:[#allocation8 + $0x4c4] ss:$16 sps:$4 sm:$0xff]   ;;  %v4620_v55 = vld [vmem:[#allocation8 + $0x4cc] ss:$16 sps:$4 sm:$0xff]  }
 0x1ff   :  { %v5373_v11 = vpack.c.bf16 %v1147_v8, %v1139_v61  ;;  %v1149_v39 = vmax.f32 %v1131_v34, 0.0  ;;  %v4615_v56 = vld [vmem:[#allocation8 + $0x4c0] ss:$16 sps:$4 sm:$0xff]   ;;  %v4618_v57 = vld [vmem:[#allocation8 + $0x4c8] ss:$16 sps:$4 sm:$0xff]  }
 0x200   :  { %2791 = vmatpush1.bf16.msra.mxu0 %v4573_v0  ;;  %2963 = vmatpush1.bf16.msra.mxu1 %v4576_v1  ;;  %v1156_v18 = vpack.c.bf16 %v1148_v10, %v1140_v2  ;;  %v4623_v58 = vld [vmem:[#allocation8 + $0x4e4] ss:$16 sps:$4 sm:$0xff]   ;;  %v4626_v60 = vld [vmem:[#allocation8 + $0x4ec] ss:$16 sps:$4 sm:$0xff]   ;;  %v4621_v61 = vld [vmem:[#allocation8 + $0x4e0] ss:$16 sps:$4 sm:$0xff]  }
 0x201   :  { %2803 = vmatprep.subr.bf16.mxu0 %v4581_v6  ;;  %2975 = vmatprep.subr.bf16.mxu1 %v4584_v7  ;;  %v5379_v43 = vpack.c.bf16 %v1149_v39, %v1141_v14  ;;  %v4624_v62 = vld [vmem:[#allocation8 + $0x4e8] ss:$16 sps:$4 sm:$0xff]   ;;  %v4629_v63 = vld [vmem:[#allocation8 + $0x504] ss:$16 sps:$4 sm:$0xff]   ;;  %v4632_v0 = vld [vmem:[#allocation8 + $0x50c] ss:$16 sps:$4 sm:$0xff]  }
 0x202   :  { %v4627_v1 = vld [vmem:[#allocation8 + $0x500] ss:$16 sps:$4 sm:$0xff]   ;;  %v4630_v2 = vld [vmem:[#allocation8 + $0x508] ss:$16 sps:$4 sm:$0xff]   ;;  %v4635_v3 = vld [vmem:[#allocation8 + $0x524] ss:$16 sps:$4 sm:$0xff]  }
 0x203   :  { %2793 = vmatmul.mubr.bf16.vlgmr.msra.gmra.mrb[8].mxu0 %v5365_v59  ;;  %2965 = vmatmul.mubr.bf16.vlgmr.msra.gmra.mrb[8].mxu1 %v5365_v59  ;;  %v1133_v59 = vadd.f32 %v1132_v35, %v314_v22  ;;  %v4633_v6 = vld [vmem:[#allocation8 + $0x520] ss:$16 sps:$4 sm:$0xff]   ;;  %v4636_v7 = vld [vmem:[#allocation8 + $0x528] ss:$16 sps:$4 sm:$0xff]   ;;  %v4641_v8 = vld [vmem:[#allocation8 + $0x544] ss:$16 sps:$4 sm:$0xff]  }
 0x204   :  { %2804 = vmatpush1.bf16.msra.mxu0 %v4579_v16  ;;  %2976 = vmatpush1.bf16.msra.mxu1 %v4582_v17  ;;  %v4639_v10 = vld [vmem:[#allocation8 + $0x540] ss:$16 sps:$4 sm:$0xff]   ;;  %v4642_v16 = vld [vmem:[#allocation8 + $0x548] ss:$16 sps:$4 sm:$0xff]   ;;  %v4647_v17 = vld [vmem:[#allocation8 + $0x564] ss:$16 sps:$4 sm:$0xff]  }
 0x205   :  { %2805 = vmatprep.subr.bf16.mxu0 %v4587_v20  ;;  %2977 = vmatprep.subr.bf16.mxu1 %v4590_v21  ;;  %v1150_v42 = vmax.f32 %v1133_v59, 0.0  ;;  %v4645_v19 = vld [vmem:[#allocation8 + $0x560] ss:$16 sps:$4 sm:$0xff]   ;;  %v4648_v20 = vld [vmem:[#allocation8 + $0x568] ss:$16 sps:$4 sm:$0xff]  }
 0x206   :  { %2835 = vmatprep.mubr.bf16.mxu0 %v1156_v18  ;;  %3007 = vmatprep.mubr.bf16.mxu1 %v1156_v18  ;;  %v4650_v18 = vld [vmem:[#allocation8 + $0x56c] ss:$16 sps:$4 sm:$0xff]   ;;  %v4653_v21 = vld [vmem:[#allocation8 + $0x584] ss:$16 sps:$4 sm:$0xff]   ;;  %v4651_v23 = vld [vmem:[#allocation8 + $0x580] ss:$16 sps:$4 sm:$0xff]  }
 0x207   :  { %v5381_v44 = vpack.c.bf16 %v1150_v42, %v1142_v36  ;;  %v4656_v22 = vld [vmem:[#allocation8 + $0x58c] ss:$16 sps:$4 sm:$0xff]   ;;  %v4657_v29 = vld [vmem:[#allocation8 + $0x5a0] ss:$16 sps:$4 sm:$0xff]   ;;  %v4666_v14 = vld [vmem:[#allocation8 + $0x5c8] ss:$16 sps:$4 sm:$0xff]  }
 0x208   :  { %2806 = vmatpush1.bf16.msra.mxu0 %v4585_v25  ;;  %2978 = vmatpush1.bf16.msra.mxu1 %v4588_v26  ;;  %v4654_v25 = vld [vmem:[#allocation8 + $0x588] ss:$16 sps:$4 sm:$0xff]   ;;  %v4659_v26 = vld [vmem:[#allocation8 + $0x5a4] ss:$16 sps:$4 sm:$0xff]   ;;  %v4662_v28 = vld [vmem:[#allocation8 + $0x5ac] ss:$16 sps:$4 sm:$0xff]  }
 0x209   :  { %2807 = vmatprep.subr.bf16.mxu0 %v4593_v31  ;;  %2979 = vmatprep.subr.bf16.mxu1 %v4596_v32  ;;  %v4660_v31 = vld [vmem:[#allocation8 + $0x5a8] ss:$16 sps:$4 sm:$0xff]   ;;  %v4665_v32 = vld [vmem:[#allocation8 + $0x5c4] ss:$16 sps:$4 sm:$0xff]   ;;  %v4668_v4 = vld [vmem:[#allocation8 + $0x5cc] ss:$16 sps:$4 sm:$0xff]  }
 0x20a   :  { %v4663_v33 = vld [vmem:[#allocation8 + $0x5c0] ss:$16 sps:$4 sm:$0xff]   ;;  %v4671_v34 = vld [vmem:[#allocation8 + $0x5e4] ss:$16 sps:$4 sm:$0xff]   ;;  %v4674_v35 = vld [vmem:[#allocation8 + $0x5ec] ss:$16 sps:$4 sm:$0xff]  }
 0x20b   :  { %v4669_v36 = vld [vmem:[#allocation8 + $0x5e0] ss:$16 sps:$4 sm:$0xff]   ;;  %v4672_v59 = vld [vmem:[#allocation8 + $0x5e8] ss:$16 sps:$4 sm:$0xff]   ;;  %v4686_v42 = vld [vmem:[#allocation8 + $0x62c] ss:$16 sps:$4 sm:$0xff]  }
 0x20c   :  { %2808 = vmatpush1.bf16.msra.mxu0 %v4591_v37  ;;  %2980 = vmatpush1.bf16.msra.mxu1 %v4594_v38  ;;  %v4677_v37 = vld [vmem:[#allocation8 + $0x604] ss:$16 sps:$4 sm:$0xff]   ;;  %v4680_v38 = vld [vmem:[#allocation8 + $0x60c] ss:$16 sps:$4 sm:$0xff]   ;;  %v4675_v39 = vld [vmem:[#allocation8 + $0x600] ss:$16 sps:$4 sm:$0xff]  }
 0x20d   :  { %2809 = vmatprep.subr.bf16.mxu0 %v4599_v40  ;;  %2981 = vmatprep.subr.bf16.mxu1 %v4602_v41  ;;  %v4678_v40 = vld [vmem:[#allocation8 + $0x608] ss:$16 sps:$4 sm:$0xff]   ;;  %v4683_v41 = vld [vmem:[#allocation8 + $0x624] ss:$16 sps:$4 sm:$0xff]  }
 0x210   :  { %2810 = vmatpush1.bf16.msra.mxu0 %v4597_v45  ;;  %2982 = vmatpush1.bf16.msra.mxu1 %v4600_v46  ;;  %v4681_v45 = vld [vmem:[#allocation8 + $0x620] ss:$16 sps:$4 sm:$0xff]   ;;  %v4684_v46 = vld [vmem:[#allocation8 + $0x628] ss:$16 sps:$4 sm:$0xff]  }
 0x211   :  { %2811 = vmatprep.subr.bf16.mxu0 %v4605_v47  ;;  %2983 = vmatprep.subr.bf16.mxu1 %v4608_v48  ;;  %v4689_v47 = vld [vmem:[#allocation8 + $0x644] ss:$16 sps:$4 sm:$0xff]   ;;  %v4692_v48 = vld [vmem:[#allocation8 + $0x64c] ss:$16 sps:$4 sm:$0xff]  }
 0x214   :  { %2812 = vmatpush1.bf16.msra.mxu0 %v4603_v49  ;;  %2984 = vmatpush1.bf16.msra.mxu1 %v4606_v50  ;;  %v4687_v49 = vld [vmem:[#allocation8 + $0x640] ss:$16 sps:$4 sm:$0xff]   ;;  %v4690_v50 = vld [vmem:[#allocation8 + $0x648] ss:$16 sps:$4 sm:$0xff]  }
 0x215   :  { %2813 = vmatprep.subr.bf16.mxu0 %v4611_v51  ;;  %2985 = vmatprep.subr.bf16.mxu1 %v4614_v24  ;;  %v4695_v51 = vld [vmem:[#allocation8 + $0x664] ss:$16 sps:$4 sm:$0xff]   ;;  %v4693_v24 = vld [vmem:[#allocation8 + $0x660] ss:$16 sps:$4 sm:$0xff]  }
 0x218   :  { %2814 = vmatpush1.bf16.msra.mxu0 %v4609_v52  ;;  %2986 = vmatpush1.bf16.msra.mxu1 %v4612_v53  ;;  %v4696_v52 = vld [vmem:[#allocation8 + $0x668] ss:$16 sps:$4 sm:$0xff]   ;;  %v4701_v53 = vld [vmem:[#allocation8 + $0x684] ss:$16 sps:$4 sm:$0xff]  }
 0x219   :  { %2815 = vmatprep.subr.bf16.mxu0 %v4617_v54  ;;  %2987 = vmatprep.subr.bf16.mxu1 %v4620_v55  ;;  %v4704_v54 = vld [vmem:[#allocation8 + $0x68c] ss:$16 sps:$4 sm:$0xff]   ;;  %v4699_v55 = vld [vmem:[#allocation8 + $0x680] ss:$16 sps:$4 sm:$0xff]  }
 0x21c   :  { %2816 = vmatpush1.bf16.msra.mxu0 %v4615_v56  ;;  %2988 = vmatpush1.bf16.msra.mxu1 %v4618_v57  ;;  %v4707_v56 = vld [vmem:[#allocation8 + $0x6a4] ss:$16 sps:$4 sm:$0xff]   ;;  %v4710_v57 = vld [vmem:[#allocation8 + $0x6ac] ss:$16 sps:$4 sm:$0xff]  }
 0x21d   :  { %2817 = vmatprep.subr.bf16.mxu0 %v4623_v58  ;;  %2989 = vmatprep.subr.bf16.mxu1 %v4626_v60  ;;  %v4705_v58 = vld [vmem:[#allocation8 + $0x6a0] ss:$16 sps:$4 sm:$0xff]   ;;  %v4708_v60 = vld [vmem:[#allocation8 + $0x6a8] ss:$16 sps:$4 sm:$0xff]  }
 0x220   :  { %2818 = vmatpush1.bf16.msra.mxu0 %v4621_v61  ;;  %2990 = vmatpush1.bf16.msra.mxu1 %v4624_v62  ;;  %v4713_v61 = vld [vmem:[#allocation8 + $0x6c4] ss:$16 sps:$4 sm:$0xff]   ;;  %v4716_v62 = vld [vmem:[#allocation8 + $0x6cc] ss:$16 sps:$4 sm:$0xff]  }
 0x221   :  { %2819 = vmatprep.subr.bf16.mxu0 %v4629_v63  ;;  %2991 = vmatprep.subr.bf16.mxu1 %v4632_v0  ;;  %v4711_v63 = vld [vmem:[#allocation8 + $0x6c0] ss:$16 sps:$4 sm:$0xff]   ;;  %v4714_v0 = vld [vmem:[#allocation8 + $0x6c8] ss:$16 sps:$4 sm:$0xff]  }
 0x224   :  { %2820 = vmatpush1.bf16.msra.mxu0 %v4627_v1  ;;  %2992 = vmatpush1.bf16.msra.mxu1 %v4630_v2  ;;  %v4719_v1 = vld [vmem:[#allocation8 + $0x6e4] ss:$16 sps:$4 sm:$0xff]   ;;  %v4722_v2 = vld [vmem:[#allocation8 + $0x6ec] ss:$16 sps:$4 sm:$0xff]  }
 0x225   :  { %2821 = vmatprep.subr.bf16.mxu0 %v4635_v3  ;;  %2993 = vmatprep.subr.bf16.mxu1 %v4638_v5  ;;  %v4717_v3 = vld [vmem:[#allocation8 + $0x6e0] ss:$16 sps:$4 sm:$0xff]   ;;  %v4720_v5 = vld [vmem:[#allocation8 + $0x6e8] ss:$16 sps:$4 sm:$0xff]  }
 0x228   :  { %2822 = vmatpush1.bf16.msra.mxu0 %v4633_v6  ;;  %2994 = vmatpush1.bf16.msra.mxu1 %v4636_v7  ;;  %v4725_v6 = vld [vmem:[#allocation8 + $0x704] ss:$16 sps:$4 sm:$0xff]   ;;  %v4728_v7 = vld [vmem:[#allocation8 + $0x70c] ss:$16 sps:$4 sm:$0xff]  }
 0x229   :  { %2823 = vmatprep.subr.bf16.mxu0 %v4641_v8  ;;  %2995 = vmatprep.subr.bf16.mxu1 %v4644_v9  ;;  %v4723_v8 = vld [vmem:[#allocation8 + $0x700] ss:$16 sps:$4 sm:$0xff]   ;;  %v4726_v9 = vld [vmem:[#allocation8 + $0x708] ss:$16 sps:$4 sm:$0xff]  }
 0x22c   :  { %2824 = vmatpush1.bf16.msra.mxu0 %v4639_v10  ;;  %2996 = vmatpush1.bf16.msra.mxu1 %v4642_v16  ;;  %v4731_v10 = vld [vmem:[#allocation8 + $0x724] ss:$16 sps:$4 sm:$0xff]   ;;  %v4734_v16 = vld [vmem:[#allocation8 + $0x72c] ss:$16 sps:$4 sm:$0xff]  }
 0x22d   :  { %2825 = vmatprep.subr.bf16.mxu0 %v4647_v17  ;;  %2997 = vmatprep.subr.bf16.mxu1 %v4650_v18  ;;  %v4729_v17 = vld [vmem:[#allocation8 + $0x720] ss:$16 sps:$4 sm:$0xff]   ;;  %v4732_v18 = vld [vmem:[#allocation8 + $0x728] ss:$16 sps:$4 sm:$0xff]  }
 0x230   :  { %2826 = vmatpush1.bf16.msra.mxu0 %v4645_v19  ;;  %2998 = vmatpush1.bf16.msra.mxu1 %v4648_v20  ;;  %v4737_v19 = vld [vmem:[#allocation8 + $0x744] ss:$16 sps:$4 sm:$0xff]   ;;  %v4740_v20 = vld [vmem:[#allocation8 + $0x74c] ss:$16 sps:$4 sm:$0xff]  }
 0x231   :  { %2827 = vmatprep.subr.bf16.mxu0 %v4653_v21  ;;  %2999 = vmatprep.subr.bf16.mxu1 %v4656_v22  ;;  %v4735_v21 = vld [vmem:[#allocation8 + $0x740] ss:$16 sps:$4 sm:$0xff]   ;;  %v4738_v22 = vld [vmem:[#allocation8 + $0x748] ss:$16 sps:$4 sm:$0xff]  }
 0x234   :  { %2828 = vmatpush1.bf16.msra.mxu0 %v4651_v23  ;;  %3000 = vmatpush1.bf16.msra.mxu1 %v4654_v25  ;;  %v4743_v23 = vld [vmem:[#allocation8 + $0x764] ss:$16 sps:$4 sm:$0xff]   ;;  %v4746_v25 = vld [vmem:[#allocation8 + $0x76c] ss:$16 sps:$4 sm:$0xff]  }
 0x235   :  { %2829 = vmatprep.subr.bf16.mxu0 %v4659_v26  ;;  %3001 = vmatprep.subr.bf16.mxu1 %v4662_v28  ;;  %v4741_v26 = vld [vmem:[#allocation8 + $0x760] ss:$16 sps:$4 sm:$0xff]   ;;  %v4744_v28 = vld [vmem:[#allocation8 + $0x768] ss:$16 sps:$4 sm:$0xff]  }
 0x238   :  { %2830 = vmatpush1.bf16.msra.mxu0 %v4657_v29  ;;  %3002 = vmatpush1.bf16.msra.mxu1 %v4660_v31  ;;  %v4749_v29 = vld [vmem:[#allocation8 + $0x784] ss:$16 sps:$4 sm:$0xff]   ;;  %v4752_v31 = vld [vmem:[#allocation8 + $0x78c] ss:$16 sps:$4 sm:$0xff]  }
 0x239   :  { %2831 = vmatprep.subr.bf16.mxu0 %v4665_v32  ;;  %3003 = vmatprep.subr.bf16.mxu1 %v4668_v4  ;;  %v4747_v32 = vld [vmem:[#allocation8 + $0x780] ss:$16 sps:$4 sm:$0xff]   ;;  %v4750_v4 = vld [vmem:[#allocation8 + $0x788] ss:$16 sps:$4 sm:$0xff]  }
 0x23c   :  { %2832 = vmatpush1.bf16.msra.mxu0 %v4663_v33  ;;  %3004 = vmatpush1.bf16.msra.mxu1 %v4666_v14  ;;  %v4755_v33 = vld [vmem:[#allocation8 + $0x7a4] ss:$16 sps:$4 sm:$0xff]   ;;  %v4758_v14 = vld [vmem:[#allocation8 + $0x7ac] ss:$16 sps:$4 sm:$0xff]  }
 0x23d   :  { %2833 = vmatprep.subr.bf16.mxu0 %v4671_v34  ;;  %3005 = vmatprep.subr.bf16.mxu1 %v4674_v35  ;;  %v4753_v34 = vld [vmem:[#allocation8 + $0x7a0] ss:$16 sps:$4 sm:$0xff]   ;;  %v4756_v35 = vld [vmem:[#allocation8 + $0x7a8] ss:$16 sps:$4 sm:$0xff]  }
 0x240   :  { %2834 = vmatpush1.bf16.msra.mxu0 %v4669_v36  ;;  %3006 = vmatpush1.bf16.msra.mxu1 %v4672_v59  ;;  %v4761_v36 = vld [vmem:[#allocation8 + $0x7c4] ss:$16 sps:$4 sm:$0xff]   ;;  %v4764_v59 = vld [vmem:[#allocation8 + $0x7cc] ss:$16 sps:$4 sm:$0xff]  }
 0x241   :  { %2846 = vmatprep.subr.bf16.mxu0 %v4677_v37  ;;  %3018 = vmatprep.subr.bf16.mxu1 %v4680_v38  ;;  %v4759_v37 = vld [vmem:[#allocation8 + $0x7c0] ss:$16 sps:$4 sm:$0xff]   ;;  %v4762_v38 = vld [vmem:[#allocation8 + $0x7c8] ss:$16 sps:$4 sm:$0xff]  }
 0x243   :  { %2836 = vmatmul.mubr.bf16.vlgmr.msra.gmra.mrb[8].mxu0 %v5373_v11  ;;  %3008 = vmatmul.mubr.bf16.vlgmr.msra.gmra.mrb[8].mxu1 %v5373_v11  ;;  %v4698_v11 = vld [vmem:[#allocation8 + $0x66c] ss:$16 sps:$4 sm:$0xff]  }
 0x244   :  { %2847 = vmatpush1.bf16.msra.mxu0 %v4675_v39  ;;  %3019 = vmatpush1.bf16.msra.mxu1 %v4678_v40  ;;  %v4767_v39 = vld [vmem:[#allocation8 + $0x7e4] ss:$16 sps:$4 sm:$0xff]   ;;  %v4770_v40 = vld [vmem:[#allocation8 + $0x7ec] ss:$16 sps:$4 sm:$0xff]  }
 0x245   :  { %2848 = vmatprep.subr.bf16.mxu0 %v4683_v41  ;;  %3020 = vmatprep.subr.bf16.mxu1 %v4686_v42  ;;  %v4765_v41 = vld [vmem:[#allocation8 + $0x7e0] ss:$16 sps:$4 sm:$0xff]   ;;  %v4768_v42 = vld [vmem:[#allocation8 + $0x7e8] ss:$16 sps:$4 sm:$0xff]  }
 0x246   :  { %2878 = vmatprep.mubr.bf16.mxu0 %v5381_v44  ;;  %3050 = vmatprep.mubr.bf16.mxu1 %v5381_v44  ;;  %v4702_v44 = vld [vmem:[#allocation8 + $0x688] ss:$16 sps:$4 sm:$0xff]  }
 0x248   :  { %2849 = vmatpush1.bf16.msra.mxu0 %v4681_v45  ;;  %3021 = vmatpush1.bf16.msra.mxu1 %v4684_v46  ;;  %v4773_v45 = vld [vmem:[#allocation11 + $0x4] ss:$8 sps:$4 sm:$0xff]   ;;  %v4771_v46 = vld [vmem:[#allocation11] ss:$8 sps:$4 sm:$0xff]  }
 0x249   :  { %2850 = vmatprep.subr.bf16.mxu0 %v4689_v47  ;;  %3022 = vmatprep.subr.bf16.mxu1 %v4692_v48  ;;  %v4776_v47 = vld [vmem:[#allocation11 + $0x14] ss:$8 sps:$4 sm:$0xff]   ;;  %v4774_v48 = vld [vmem:[#allocation11 + $0x10] ss:$8 sps:$4 sm:$0xff]  }
 0x24c   :  { %2851 = vmatpush1.bf16.msra.mxu0 %v4687_v49  ;;  %3023 = vmatpush1.bf16.msra.mxu1 %v4690_v50  ;;  %v4779_v49 = vld [vmem:[#allocation11 + $0x24] ss:$8 sps:$4 sm:$0xff]   ;;  %v4777_v50 = vld [vmem:[#allocation11 + $0x20] ss:$8 sps:$4 sm:$0xff]  }
 0x24d   :  { %2852 = vmatprep.subr.bf16.mxu0 %v4695_v51  ;;  %3024 = vmatprep.subr.bf16.mxu1 %v4698_v11  ;;  %v4782_v51 = vld [vmem:[#allocation11 + $0x34] ss:$8 sps:$4 sm:$0xff]   ;;  %v4780_v11 = vld [vmem:[#allocation11 + $0x30] ss:$8 sps:$4 sm:$0xff]  }
 0x250   :  { %2853 = vmatpush1.bf16.msra.mxu0 %v4693_v24  ;;  %3025 = vmatpush1.bf16.msra.mxu1 %v4696_v52  ;;  %v4785_v24 = vld [vmem:[#allocation11 + $0x44] ss:$8 sps:$4 sm:$0xff]   ;;  %v4783_v52 = vld [vmem:[#allocation11 + $0x40] ss:$8 sps:$4 sm:$0xff]  }
 0x251   :  { %2854 = vmatprep.subr.bf16.mxu0 %v4701_v53  ;;  %3026 = vmatprep.subr.bf16.mxu1 %v4704_v54  ;;  %v4788_v53 = vld [vmem:[#allocation11 + $0x54] ss:$8 sps:$4 sm:$0xff]   ;;  %v4786_v54 = vld [vmem:[#allocation11 + $0x50] ss:$8 sps:$4 sm:$0xff]  }
 0x254   :  { %2855 = vmatpush1.bf16.msra.mxu0 %v4699_v55  ;;  %3027 = vmatpush1.bf16.msra.mxu1 %v4702_v44  ;;  %v4789_v55 = vld [vmem:[#allocation11 + $0x60] ss:$8 sps:$4 sm:$0xff]   ;;  %v4794_v44 = vld [vmem:[#allocation11 + $0x74] ss:$8 sps:$4 sm:$0xff]  }
 0x255   :  { %2856 = vmatprep.subr.bf16.mxu0 %v4707_v56  ;;  %3028 = vmatprep.subr.bf16.mxu1 %v4710_v57  ;;  %v4792_v56 = vld [vmem:[#allocation11 + $0x70] ss:$8 sps:$4 sm:$0xff]   ;;  %v4797_v57 = vld [vmem:[#allocation11 + $0x84] ss:$8 sps:$4 sm:$0xff]  }
 0x258   :  { %2857 = vmatpush1.bf16.msra.mxu0 %v4705_v58  ;;  %3029 = vmatpush1.bf16.msra.mxu1 %v4708_v60  ;;  %v4795_v58 = vld [vmem:[#allocation11 + $0x80] ss:$8 sps:$4 sm:$0xff]   ;;  %v4800_v60 = vld [vmem:[#allocation11 + $0x94] ss:$8 sps:$4 sm:$0xff]  }
 0x259   :  { %2858 = vmatprep.subr.bf16.mxu0 %v4713_v61  ;;  %3030 = vmatprep.subr.bf16.mxu1 %v4716_v62  ;;  %v4798_v61 = vld [vmem:[#allocation11 + $0x90] ss:$8 sps:$4 sm:$0xff]   ;;  %v4803_v62 = vld [vmem:[#allocation11 + $0xa4] ss:$8 sps:$4 sm:$0xff]  }
 0x25c   :  { %2859 = vmatpush1.bf16.msra.mxu0 %v4711_v63  ;;  %3031 = vmatpush1.bf16.msra.mxu1 %v4714_v0  ;;  %v4801_v63 = vld [vmem:[#allocation11 + $0xa0] ss:$8 sps:$4 sm:$0xff]   ;;  %v4806_v0 = vld [vmem:[#allocation11 + $0xb4] ss:$8 sps:$4 sm:$0xff]  }
 0x25d   :  { %2860 = vmatprep.subr.bf16.mxu0 %v4719_v1  ;;  %3032 = vmatprep.subr.bf16.mxu1 %v4722_v2  ;;  %v4804_v1 = vld [vmem:[#allocation11 + $0xb0] ss:$8 sps:$4 sm:$0xff]   ;;  %v4809_v2 = vld [vmem:[#allocation11 + $0xc4] ss:$8 sps:$4 sm:$0xff]  }
 0x260   :  { %2861 = vmatpush1.bf16.msra.mxu0 %v4717_v3  ;;  %3033 = vmatpush1.bf16.msra.mxu1 %v4720_v5  ;;  %v4807_v3 = vld [vmem:[#allocation11 + $0xc0] ss:$8 sps:$4 sm:$0xff]   ;;  %v4812_v5 = vld [vmem:[#allocation11 + $0xd4] ss:$8 sps:$4 sm:$0xff]  }
 0x261   :  { %2862 = vmatprep.subr.bf16.mxu0 %v4725_v6  ;;  %3034 = vmatprep.subr.bf16.mxu1 %v4728_v7  ;;  %v4810_v6 = vld [vmem:[#allocation11 + $0xd0] ss:$8 sps:$4 sm:$0xff]   ;;  %v4815_v7 = vld [vmem:[#allocation11 + $0xe4] ss:$8 sps:$4 sm:$0xff]  }
 0x264   :  { %2863 = vmatpush1.bf16.msra.mxu0 %v4723_v8  ;;  %3035 = vmatpush1.bf16.msra.mxu1 %v4726_v9  ;;  %v4813_v8 = vld [vmem:[#allocation11 + $0xe0] ss:$8 sps:$4 sm:$0xff]   ;;  %v4818_v9 = vld [vmem:[#allocation11 + $0xf4] ss:$8 sps:$4 sm:$0xff]  }
 0x265   :  { %2864 = vmatprep.subr.bf16.mxu0 %v4731_v10  ;;  %3036 = vmatprep.subr.bf16.mxu1 %v4734_v16  ;;  %v4816_v10 = vld [vmem:[#allocation11 + $0xf0] ss:$8 sps:$4 sm:$0xff]   ;;  %v4821_v16 = vld [vmem:[#allocation11 + $0x104] ss:$8 sps:$4 sm:$0xff]  }
 0x268   :  { %2865 = vmatpush1.bf16.msra.mxu0 %v4729_v17  ;;  %3037 = vmatpush1.bf16.msra.mxu1 %v4732_v18  ;;  %v4867_v17 = vld [vmem:[#allocation14] ss:$8 sps:$4 sm:$0xff]   ;;  %v4869_v18 = vld [vmem:[#allocation14 + $0x4] ss:$8 sps:$4 sm:$0xff]  }
 0x269   :  { %2866 = vmatprep.subr.bf16.mxu0 %v4737_v19  ;;  %3038 = vmatprep.subr.bf16.mxu1 %v4740_v20  ;;  %v4872_v19 = vld [vmem:[#allocation14 + $0x14] ss:$8 sps:$4 sm:$0xff]   ;;  %v4870_v20 = vld [vmem:[#allocation14 + $0x10] ss:$8 sps:$4 sm:$0xff]  }
 0x26c   :  { %2867 = vmatpush1.bf16.msra.mxu0 %v4735_v21  ;;  %3039 = vmatpush1.bf16.msra.mxu1 %v4738_v22  ;;  %v4875_v21 = vld [vmem:[#allocation14 + $0x24] ss:$8 sps:$4 sm:$0xff]   ;;  %v4873_v22 = vld [vmem:[#allocation14 + $0x20] ss:$8 sps:$4 sm:$0xff]  }
 0x26d   :  { %2868 = vmatprep.subr.bf16.mxu0 %v4743_v23  ;;  %3040 = vmatprep.subr.bf16.mxu1 %v4746_v25  ;;  %v4878_v23 = vld [vmem:[#allocation14 + $0x34] ss:$8 sps:$4 sm:$0xff]   ;;  %v4876_v25 = vld [vmem:[#allocation14 + $0x30] ss:$8 sps:$4 sm:$0xff]  }
 0x270   :  { %2869 = vmatpush1.bf16.msra.mxu0 %v4741_v26  ;;  %3041 = vmatpush1.bf16.msra.mxu1 %v4744_v28  ;;  %v4881_v26 = vld [vmem:[#allocation14 + $0x44] ss:$8 sps:$4 sm:$0xff]   ;;  %v4879_v28 = vld [vmem:[#allocation14 + $0x40] ss:$8 sps:$4 sm:$0xff]  }
 0x271   :  { %2870 = vmatprep.subr.bf16.mxu0 %v4749_v29  ;;  %3042 = vmatprep.subr.bf16.mxu1 %v4752_v31  ;;  %v4884_v29 = vld [vmem:[#allocation14 + $0x54] ss:$8 sps:$4 sm:$0xff]   ;;  %v4882_v31 = vld [vmem:[#allocation14 + $0x50] ss:$8 sps:$4 sm:$0xff]  }
 0x274   :  { %2871 = vmatpush1.bf16.msra.mxu0 %v4747_v32  ;;  %3043 = vmatpush1.bf16.msra.mxu1 %v4750_v4  ;;  %v4887_v32 = vld [vmem:[#allocation14 + $0x64] ss:$8 sps:$4 sm:$0xff]   ;;  %v4885_v4 = vld [vmem:[#allocation14 + $0x60] ss:$8 sps:$4 sm:$0xff]  }
 0x275   :  { %2872 = vmatprep.subr.bf16.mxu0 %v4755_v33  ;;  %3044 = vmatprep.subr.bf16.mxu1 %v4758_v14  ;;  %v4890_v33 = vld [vmem:[#allocation14 + $0x74] ss:$8 sps:$4 sm:$0xff]   ;;  %v4888_v14 = vld [vmem:[#allocation14 + $0x70] ss:$8 sps:$4 sm:$0xff]  }
 0x278   :  { %2873 = vmatpush1.bf16.msra.mxu0 %v4753_v34  ;;  %3045 = vmatpush1.bf16.msra.mxu1 %v4756_v35  ;;  %v4893_v34 = vld [vmem:[#allocation14 + $0x84] ss:$8 sps:$4 sm:$0xff]   ;;  %v4891_v35 = vld [vmem:[#allocation14 + $0x80] ss:$8 sps:$4 sm:$0xff]  }
 0x279   :  { %2874 = vmatprep.subr.bf16.mxu0 %v4761_v36  ;;  %3046 = vmatprep.subr.bf16.mxu1 %v4764_v59  ;;  %v4896_v36 = vld [vmem:[#allocation14 + $0x94] ss:$8 sps:$4 sm:$0xff]   ;;  %v4894_v59 = vld [vmem:[#allocation14 + $0x90] ss:$8 sps:$4 sm:$0xff]  }
 0x27c   :  { %2875 = vmatpush1.bf16.msra.mxu0 %v4759_v37  ;;  %3047 = vmatpush1.bf16.msra.mxu1 %v4762_v38  ;;  %v4899_v37 = vld [vmem:[#allocation14 + $0xa4] ss:$8 sps:$4 sm:$0xff]   ;;  %v4897_v38 = vld [vmem:[#allocation14 + $0xa0] ss:$8 sps:$4 sm:$0xff]  }
 0x27d   :  { %2876 = vmatprep.subr.bf16.mxu0 %v4767_v39  ;;  %3048 = vmatprep.subr.bf16.mxu1 %v4770_v40  ;;  %v4902_v39 = vld [vmem:[#allocation14 + $0xb4] ss:$8 sps:$4 sm:$0xff]   ;;  %v4900_v40 = vld [vmem:[#allocation14 + $0xb0] ss:$8 sps:$4 sm:$0xff]  }
 0x280   :  { %2877 = vmatpush1.bf16.msra.mxu0 %v4765_v41  ;;  %3049 = vmatpush1.bf16.msra.mxu1 %v4768_v42  ;;  %v4905_v41 = vld [vmem:[#allocation14 + $0xc4] ss:$8 sps:$4 sm:$0xff]   ;;  %v1415_v42 = vld [vmem:[#allocation10] sm:$0xf] }
 0x281   :  { %3469 = vmatprep.subr.bf16.mxu0 %v4773_v45  ;;  %3765 = vmatprep.subr.bf16.mxu1 %v4869_v18  ;;  %v4903_v45 = vld [vmem:[#allocation14 + $0xc0] ss:$8 sps:$4 sm:$0xff]   ;;  %v4822_v18 = vld [vmem:[#allocation11 + $0x110] ss:$8 sps:$4 sm:$0xff]  }
 0x283   :  { %2879 = vmatmul.mubr.bf16.vlgmr.msra.gmra.mrb[8].mxu0 %v5379_v43  ;;  %3051 = vmatmul.mubr.bf16.vlgmr.msra.gmra.mrb[8].mxu1 %v5379_v43  ;;  %v4791_v43 = vld [vmem:[#allocation11 + $0x64] ss:$8 sps:$4 sm:$0xff]  }
 0x284   :  { %3470 = vmatpush1.bf16.msra.mxu0 %v4771_v46  ;;  %3766 = vmatpush1.bf16.msra.mxu1 %v4867_v17  ;;  %v4908_v46 = vld [vmem:[#allocation14 + $0xd4] ss:$8 sps:$4 sm:$0xff]  }
 0x285   :  { %3471 = vmatprep.subr.bf16.mxu0 %v4776_v47  ;;  %3767 = vmatprep.subr.bf16.mxu1 %v4872_v19  ;;  %v1420_v47 = vrot.slane %v1415_v42, %v5346_v13  ;;  %v4824_v17 = vld [vmem:[#allocation11 + $0x114] ss:$8 sps:$4 sm:$0xff]   ;;  %v4827_v19 = vld [vmem:[#allocation11 + $0x124] ss:$8 sps:$4 sm:$0xff]  }
 0x288   :  { %3472 = vmatpush1.bf16.msra.mxu0 %v4774_v48  ;;  %3768 = vmatpush1.bf16.msra.mxu1 %v4870_v20  ;;  %v1428_v48 = vrot.slane %v1415_v42, %v293_v27  ;;  %v4825_v20 = vld [vmem:[#allocation11 + $0x120] ss:$8 sps:$4 sm:$0xff]  }
 0x289   :  { %3473 = vmatprep.subr.bf16.mxu0 %v4779_v49  ;;  %3769 = vmatprep.subr.bf16.mxu1 %v4875_v21  ;;  %v1424_v49 = vrot.slane %v1415_v42, %v5351_v15  ;;  %v4830_v21 = vld [vmem:[#allocation11 + $0x134] ss:$8 sps:$4 sm:$0xff]  }
 0x28c   :  { %3474 = vmatpush1.bf16.msra.mxu0 %v4777_v50  ;;  %3770 = vmatpush1.bf16.msra.mxu1 %v4873_v22  ;;  %v1432_v50 = vrot.slane %v1415_v42, %v297_v30  ;;  %v4828_v22 = vld [vmem:[#allocation11 + $0x130] ss:$8 sps:$4 sm:$0xff]  }
 0x28d   :  { %3475 = vmatprep.subr.bf16.mxu0 %v4782_v51  ;;  %3771 = vmatprep.subr.bf16.mxu1 %v4878_v23  ;;  %v4906_v51 = vld [vmem:[#allocation14 + $0xd0] ss:$8 sps:$4 sm:$0xff]   ;;  %v4833_v23 = vld [vmem:[#allocation11 + $0x144] ss:$8 sps:$4 sm:$0xff]  }
 0x28e   :  { %v4858_v42 = vld [vmem:[#allocation11 + $0x1d0] ss:$8 sps:$4 sm:$0xff]  }
 0x290   :  { %3476 = vmatpush1.bf16.msra.mxu0 %v4780_v11  ;;  %3772 = vmatpush1.bf16.msra.mxu1 %v4876_v25  ;;  %v4831_v25 = vld [vmem:[#allocation11 + $0x140] ss:$8 sps:$4 sm:$0xff]  }
 0x291   :  { %3477 = vmatprep.subr.bf16.mxu0 %v4785_v24  ;;  %3773 = vmatprep.subr.bf16.mxu1 %v4881_v26  ;;  %v4836_v26 = vld [vmem:[#allocation11 + $0x154] ss:$8 sps:$4 sm:$0xff]  }
 0x294   :  { %3478 = vmatpush1.bf16.msra.mxu0 %v4783_v52  ;;  %3774 = vmatpush1.bf16.msra.mxu1 %v4879_v28  ;;  %v4834_v28 = vld [vmem:[#allocation11 + $0x150] ss:$8 sps:$4 sm:$0xff]  }
 0x295   :  { %3479 = vmatprep.subr.bf16.mxu0 %v4788_v53  ;;  %3775 = vmatprep.subr.bf16.mxu1 %v4884_v29  ;;  %v4839_v29 = vld [vmem:[#allocation11 + $0x164] ss:$8 sps:$4 sm:$0xff]  }
 0x298   :  { %3480 = vmatpush1.bf16.msra.mxu0 %v4786_v54  ;;  %3776 = vmatpush1.bf16.msra.mxu1 %v4882_v31  ;;  %v4837_v31 = vld [vmem:[#allocation11 + $0x160] ss:$8 sps:$4 sm:$0xff]  }
 0x299   :  { %3481 = vmatprep.subr.bf16.mxu0 %v4791_v43  ;;  %3777 = vmatprep.subr.bf16.mxu1 %v4887_v32  ;;  %v4842_v32 = vld [vmem:[#allocation11 + $0x174] ss:$8 sps:$4 sm:$0xff]  }
 0x29c   :  { %3482 = vmatpush1.bf16.msra.mxu0 %v4789_v55  ;;  %3778 = vmatpush1.bf16.msra.mxu1 %v4885_v4  ;;  %v4840_v4 = vld [vmem:[#allocation11 + $0x170] ss:$8 sps:$4 sm:$0xff]  }
 0x29d   :  { %3483 = vmatprep.subr.bf16.mxu0 %v4794_v44  ;;  %3779 = vmatprep.subr.bf16.mxu1 %v4890_v33  ;;  %v4845_v33 = vld [vmem:[#allocation11 + $0x184] ss:$8 sps:$4 sm:$0xff]  }
 0x2a0   :  { %3484 = vmatpush1.bf16.msra.mxu0 %v4792_v56  ;;  %3780 = vmatpush1.bf16.msra.mxu1 %v4888_v14  ;;  %v4843_v14 = vld [vmem:[#allocation11 + $0x180] ss:$8 sps:$4 sm:$0xff]  }
 0x2a1   :  { %3485 = vmatprep.subr.bf16.mxu0 %v4797_v57  ;;  %3781 = vmatprep.subr.bf16.mxu1 %v4893_v34  ;;  %v4848_v34 = vld [vmem:[#allocation11 + $0x194] ss:$8 sps:$4 sm:$0xff]  }
 0x2a4   :  { %3486 = vmatpush1.bf16.msra.mxu0 %v4795_v58  ;;  %3782 = vmatpush1.bf16.msra.mxu1 %v4891_v35  ;;  %v4846_v35 = vld [vmem:[#allocation11 + $0x190] ss:$8 sps:$4 sm:$0xff]  }
 0x2a5   :  { %3487 = vmatprep.subr.bf16.mxu0 %v4800_v60  ;;  %3783 = vmatprep.subr.bf16.mxu1 %v4896_v36  ;;  %v4851_v36 = vld [vmem:[#allocation11 + $0x1a4] ss:$8 sps:$4 sm:$0xff]  }
 0x2a8   :  { %3488 = vmatpush1.bf16.msra.mxu0 %v4798_v61  ;;  %3784 = vmatpush1.bf16.msra.mxu1 %v4894_v59  ;;  %v4849_v59 = vld [vmem:[#allocation11 + $0x1a0] ss:$8 sps:$4 sm:$0xff]  }
 0x2a9   :  { %3489 = vmatprep.subr.bf16.mxu0 %v4803_v62  ;;  %3785 = vmatprep.subr.bf16.mxu1 %v4899_v37  ;;  %v4854_v37 = vld [vmem:[#allocation11 + $0x1b4] ss:$8 sps:$4 sm:$0xff]  }
 0x2ac   :  { %3490 = vmatpush1.bf16.msra.mxu0 %v4801_v63  ;;  %3786 = vmatpush1.bf16.msra.mxu1 %v4897_v38  ;;  %v4852_v38 = vld [vmem:[#allocation11 + $0x1b0] ss:$8 sps:$4 sm:$0xff]  }
 0x2ad   :  { %3491 = vmatprep.subr.bf16.mxu0 %v4806_v0  ;;  %3787 = vmatprep.subr.bf16.mxu1 %v4902_v39  ;;  %v4857_v39 = vld [vmem:[#allocation11 + $0x1c4] ss:$8 sps:$4 sm:$0xff]  }
 0x2b0   :  { %3492 = vmatpush1.bf16.msra.mxu0 %v4804_v1  ;;  %3788 = vmatpush1.bf16.msra.mxu1 %v4900_v40  ;;  %v4855_v40 = vld [vmem:[#allocation11 + $0x1c0] ss:$8 sps:$4 sm:$0xff]  }
 0x2b1   :  { %3493 = vmatprep.subr.bf16.mxu0 %v4809_v2  ;;  %3789 = vmatprep.subr.bf16.mxu1 %v4905_v41  ;;  %v4860_v41 = vld [vmem:[#allocation11 + $0x1d4] ss:$8 sps:$4 sm:$0xff]  }
 0x2b4   :  { %3494 = vmatpush1.bf16.msra.mxu0 %v4807_v3  ;;  %3790 = vmatpush1.bf16.msra.mxu1 %v4903_v45  ;;  %v4863_v45 = vld [vmem:[#allocation11 + $0x1e4] ss:$8 sps:$4 sm:$0xff]  }
 0x2b5   :  { %3495 = vmatprep.subr.bf16.mxu0 %v4812_v5  ;;  %3791 = vmatprep.subr.bf16.mxu1 %v4908_v46  ;;  %v4861_v46 = vld [vmem:[#allocation11 + $0x1e0] ss:$8 sps:$4 sm:$0xff]  }
 0x2b8   :  { %3496 = vmatpush1.bf16.msra.mxu0 %v4810_v6  ;;  %3792 = vmatpush1.bf16.msra.mxu1 %v4906_v51  ;;  %v4914_v51 = vld [vmem:[#allocation14 + $0xf4] ss:$8 sps:$4 sm:$0xff]  }
 0x2b9   :  { %3497 = vmatprep.subr.bf16.mxu0 %v4815_v7 }
 0x2bc   :  { %3498 = vmatpush1.bf16.msra.mxu0 %v4813_v8 }
 0x2bd   :  { %3499 = vmatprep.subr.bf16.mxu0 %v4818_v9 }
 0x2c0   :  { %3500 = vmatpush1.bf16.msra.mxu0 %v4816_v10 }
 0x2c1   :  { %3512 = vmatprep.subr.bf16.mxu0 %v4821_v16  ;;  %v4819_v16 = vld [vmem:[#allocation11 + $0x100] ss:$8 sps:$4 sm:$0xff]  }
 0x356   :  { %v2880_v11 = vpop.f32.mrb[8].mxu0  ;;  %v3052_v24 = vpop.f32.mrb[8].mxu1 }
 0x357   :  { %v4331_v52 = vadd.f32 %v2880_v11, %v1420_v47  ;;  %v4335_v53 = vadd.f32 %v3052_v24, %v1428_v48  ;;  %v2882_v54 = vpop.f32.mrb[9].mxu0  ;;  %v3054_v43 = vpop.f32.mrb[9].mxu1  ;;  %v4912_v11 = vld [vmem:[#allocation14 + $0xf0] ss:$8 sps:$4 sm:$0xff]   ;;  %v3137_v24 = vld [vmem:[#allocation13] sm:$0x3] }
 0x358   :  { %v4332_v55 = vadd.f32 %v2882_v54, %v1424_v49  ;;  %v4336_v44 = vadd.f32 %v3054_v43, %v1432_v50  ;;  %v2884_v56 = vpop.f32.mrb[10].mxu0  ;;  %v3056_v57 = vpop.f32.mrb[10].mxu1 }
 0x359   :  { %v4333_v27 = vadd.f32 %v2884_v56, %v1420_v47  ;;  %v4337_v58 = vadd.f32 %v3056_v57, %v1428_v48  ;;  %v2886_v60 = vpop.f32.mrb[11].mxu0  ;;  %v3058_v61 = vpop.f32.mrb[11].mxu1  ;;  %v3061_v62 = vmax.f32 %v4331_v52, 0.0  ;;  %v3063_v63 = vmax.f32 %v4335_v53, 0.0  ;;  %v4866_v47 = vld [vmem:[#allocation11 + $0x1f4] ss:$8 sps:$4 sm:$0xff]  }
 0x35a   :  { %v4334_v12 = vadd.f32 %v2886_v60, %v1424_v49  ;;  %v4338_v30 = vadd.f32 %v3058_v61, %v1432_v50  ;;  %v3062_v2 = vmax.f32 %v4332_v55, 0.0  ;;  %v3064_v3 = vmax.f32 %v4336_v44, 0.0  ;;  %v4864_v48 = vld [vmem:[#allocation11 + $0x1f0] ss:$8 sps:$4 sm:$0xff]   ;;  %v4909_v50 = vld [vmem:[#allocation14 + $0xe0] ss:$8 sps:$4 sm:$0xff]  }
 0x35b   :  { %v3065_v0 = vmax.f32 %v4333_v27, 0.0  ;;  %v3067_v1 = vmax.f32 %v4337_v58, 0.0  ;;  %v4911_v49 = vld [vmem:[#allocation14 + $0xe4] ss:$8 sps:$4 sm:$0xff]   ;;  %v3142_v52 = vrot.slane %v3137_v24, %v5346_v13  ;;  %v3146_v53 = vrot.slane %v3137_v24, %v5351_v15 }
 0x35c   :  { %v3066_v5 = vmax.f32 %v4334_v12, 0.0  ;;  %v3068_v6 = vmax.f32 %v4338_v30, 0.0  ;;  %3793 = vmatprep.subr.bf16.mxu1 %v4911_v49 }
 0x35d   :  { %v3069_v7 = vpack.c.bf16 %v3065_v0, %v3061_v62  ;;  %v5395_v8 = vpack.c.bf16 %v3067_v1, %v3063_v63  ;;  %3794 = vmatpush1.bf16.msra.mxu1 %v4909_v50  ;;  %v3593_v0 = vld [vmem:[#allocation16] sm:$0x3] }
 0x35e   :  { %v3070_v9 = vpack.c.bf16 %v3066_v5, %v3062_v2  ;;  %v3072_v10 = vpack.c.bf16 %v3068_v6, %v3064_v3  ;;  %3795 = vmatprep.subr.bf16.mxu1 %v4914_v51  ;;  %v3598_v1 = vrot.slane %v3593_v0, %v5346_v13  ;;  %v3602_v2 = vrot.slane %v3593_v0, %v5351_v15 }
 0x360   :  { %3501 = vmatprep.mubr.bf16.mxu0 %v3070_v9 }
 0x361   :  { %3502 = vmatmul.mubr.bf16.vlgmr.msra.gmra.mrb[12].mxu0 %v3069_v7  ;;  %3796 = vmatpush1.bf16.msra.mxu1 %v4912_v11 }
 0x362   :  { %3513 = vmatpush1.bf16.msra.mxu0 %v4819_v16  ;;  %3544 = vmatprep.mubr.bf16.mxu0 %v3072_v10 }
 0x363   :  { %3514 = vmatprep.subr.bf16.mxu0 %v4824_v17 }
 0x366   :  { %3515 = vmatpush1.bf16.msra.mxu0 %v4822_v18 }
 0x367   :  { %3516 = vmatprep.subr.bf16.mxu0 %v4827_v19 }
 0x36a   :  { %3517 = vmatpush1.bf16.msra.mxu0 %v4825_v20 }
 0x36b   :  { %3518 = vmatprep.subr.bf16.mxu0 %v4830_v21 }
 0x36e   :  { %3519 = vmatpush1.bf16.msra.mxu0 %v4828_v22 }
 0x36f   :  { %3520 = vmatprep.subr.bf16.mxu0 %v4833_v23 }
 0x372   :  { %3521 = vmatpush1.bf16.msra.mxu0 %v4831_v25 }
 0x373   :  { %3522 = vmatprep.subr.bf16.mxu0 %v4836_v26 }
 0x376   :  { %3523 = vmatpush1.bf16.msra.mxu0 %v4834_v28 }
 0x377   :  { %3524 = vmatprep.subr.bf16.mxu0 %v4839_v29 }
 0x37a   :  { %3525 = vmatpush1.bf16.msra.mxu0 %v4837_v31 }
 0x37b   :  { %3526 = vmatprep.subr.bf16.mxu0 %v4842_v32 }
 0x37e   :  { %3527 = vmatpush1.bf16.msra.mxu0 %v4840_v4 }
 0x37f   :  { %3528 = vmatprep.subr.bf16.mxu0 %v4845_v33 }
 0x382   :  { %3529 = vmatpush1.bf16.msra.mxu0 %v4843_v14 }
 0x383   :  { %3530 = vmatprep.subr.bf16.mxu0 %v4848_v34 }
 0x386   :  { %3531 = vmatpush1.bf16.msra.mxu0 %v4846_v35 }
 0x387   :  { %3532 = vmatprep.subr.bf16.mxu0 %v4851_v36 }
 0x38a   :  { %3533 = vmatpush1.bf16.msra.mxu0 %v4849_v59 }
 0x38b   :  { %3534 = vmatprep.subr.bf16.mxu0 %v4854_v37 }
 0x38e   :  { %3535 = vmatpush1.bf16.msra.mxu0 %v4852_v38 }
 0x38f   :  { %3536 = vmatprep.subr.bf16.mxu0 %v4857_v39 }
 0x392   :  { %3537 = vmatpush1.bf16.msra.mxu0 %v4855_v40 }
 0x393   :  { %3538 = vmatprep.subr.bf16.mxu0 %v4860_v41 }
 0x396   :  { %3539 = vmatpush1.bf16.msra.mxu0 %v4858_v42 }
 0x397   :  { %3540 = vmatprep.subr.bf16.mxu0 %v4863_v45 }
 0x39a   :  { %3541 = vmatpush1.bf16.msra.mxu0 %v4861_v46 }
 0x39b   :  { %3542 = vmatprep.subr.bf16.mxu0 %v4866_v47 }
 0x39e   :  { %3543 = vmatpush1.bf16.msra.mxu0 %v4864_v48 }
 0x3a1   :  { %3545 = vmatmul.mubr.bf16.vlgmr.msra.gmra.mrb[12].mxu0 %v5395_v8 }
 0x474   :  { %v3546_v54 = vpop.f32.mrb[12].mxu0 }
 0x475   :  { %v4339_v43 = vadd.f32 %v3546_v54, %v3142_v52  ;;  %v3548_v55 = vpop.f32.mrb[13].mxu0 }
 0x476   :  { %v4340_v44 = vadd.f32 %v3548_v55, %v3146_v53  ;;  %v3550_v56 = vpop.f32.mrb[14].mxu0 }
 0x477   :  { %v4341_v57 = vadd.f32 %v3550_v56, %v3142_v52  ;;  %v3552_v27 = vpop.f32.mrb[15].mxu0  ;;  %v3555_v60 = vmax.f32 %v4339_v43, 0.0 }
 0x478   :  { %v4342_v58 = vadd.f32 %v3552_v27, %v3146_v53  ;;  %v3556_v12 = vmax.f32 %v4340_v44, 0.0 }
 0x479   :  { %v3557_v61 = vmax.f32 %v4341_v57, 0.0 }
 0x47a   :  { %v3558_v30 = vmax.f32 %v4342_v58, 0.0 }
 0x47b   :  { %v3559_v62 = vpack.c.bf16 %v3557_v61, %v3555_v60 }
 0x47c   :  { %v3560_v63 = vpack.c.bf16 %v3558_v30, %v3556_v12 }
 0x47e   :  { %3797 = vmatprep.mubr.bf16.mxu1 %v3560_v63 }
 0x47f   :  { %3798 = vmatmul.mubr.bf16.vlgmr.msra.gmra.mrb[12].mxu1 %v3559_v62 }
 0x552   :  { %v3799_v3 = vpop.f32.mrb[12].mxu1 }
 0x553   :  { %v3800_v5 = vadd.f32 %v3799_v3, %v3598_v1  ;;  %v3801_v6 = vpop.f32.mrb[13].mxu1 }
 0x554   :  { %v3802_v7 = vadd.f32 %v3801_v6, %v3602_v2  ;;  %v3803_v8 = vpop.f32.mrb[14].mxu1 }
 0x555   :  { %v3804_v9 = vadd.f32 %v3803_v8, %v3598_v1  ;;  %v3805_v10 = vpop.f32.mrb[15].mxu1  ;;  %v3808_v16 = vmul.f32 %v3800_v5, %v3800_v5 }
 0x556   :  { %v3806_v17 = vadd.f32 %v3805_v10, %v3602_v2  ;;  %v3809_v18 = vmul.f32 %v3802_v7, %v3802_v7 }
 0x557   :  { %v3810_v19 = vmul.f32 %v3804_v9, %v3804_v9 }
 0x558   :  { %v3811_v20 = vmul.f32 %v3806_v17, %v3806_v17  ;;  %v3812_v21 = vadd.f32 %v3809_v18, %v3808_v16 }
 0x55a   :  { %3813 = vadd.xlane.f32.xlu0 %v3812_v21  ;;  %v3815_v22 = vadd.f32 %v3811_v20, %v3810_v19 }
 0x55e   :  { %3816 = vadd.xlane.f32.xlu0 %v3815_v22 }
 0x5e7   :  { %v3814_v23 = vpop.xlane.xlu0 %3813 }
 0x5e8   :  { %v3818_v13 = vmax.f32 %v3814_v23, 1e-24 }
 0x5ea   :  { %4915 = vrsqrt.f32 %v3818_v13 }
 0x5eb   :  { %v3817_v15 = vpop.xlane.xlu0 %3816 }
 0x5ec   :  { %v3819_v25 = vmax.f32 %v3817_v15, 1e-24 }
 0x5ee   :  { %4917 = vrsqrt.f32 %v3819_v25 }
 0x5f4   :  { %v4916_v26 = vpop.eup %4915 }
 0x5f5   :  { %v3822_v28 = vmul.f32 %v4916_v26, %v3800_v5  ;;  %v3823_v29 = vmul.f32 %v4916_v26, %v3802_v7 }
 0x5f7   :  { %3826 = vst [vmem:[#allocation17] sm:$0xff] %v3822_v28  ;;  %3827 = vst [vmem:[#allocation17 + $0x8] sm:$0xff] %v3823_v29 }
 0x5f8   :  { %v4918_v31 = vpop.eup %4917 }
 0x5f9   :  { %v3824_v32 = vmul.f32 %v4918_v31, %v3804_v9  ;;  %v3825_v4 = vmul.f32 %v4918_v31, %v3806_v17 }
 0x5fb   :  { %3828 = vst [vmem:[#allocation17 + $0x10] sm:$0xff] %v3824_v32  ;;  %3829 = vst [vmem:[#allocation17 + $0x18] sm:$0xff] %v3825_v4 }
 0x5fc   :  { %5128 = shalt.err (!%p5125_p6)
}
 0x5fd   :  { %s5129_s24 = scalar_lea.hbm %s5426_s9, 512 }
 0x5fe   :  { %p5130_p7 = scmp.ne.s32.totalorder %s5426_s9, %s5129_s24  ;;  %p5133_p8 = scmp.lt.u32.totalorder %s5129_s24, %s5426_s9 }
 0x600   :  { %p5135_p9 = pnand %p5133_p8, %p5130_p7 }
 0x602   :  { %5138 = shalt.err (!%p5135_p9)
}
 0x603   :  { %3841 = dma.vmem_to_hbm [thread:$0]  %s3836_s11, 512, %s5426_s9, [#allocation4], %s5156_s10, %s5156_s10, %s5157_s14  }
 0x604   :  { %5149 = dma.done.wait [#allocation4], 512  }
 0x605   :  { %5150 = vsyncadd [#allocation4], 4294966784 }
 0x606   :  { %3845 = vsyncpa [#allocation3], 1 }
 0x607   :  { %3846 = vsyncpa [#allocation6], 1 }
 0x608   :  { %3847 = vsyncpa [#allocation9], 1 }
 0x609   :  { %3848 = vsyncpa [#allocation12], 1 }
 0x60a   :  { %3849 = vsyncpa [#allocation15], 1 }
 0x60b   :  { %3850 = vsyncpa [#allocation4], 1 }

</bundles_post_ra>
